<compile_context>
chip_gen: v7x
topology: tpu7x:2x2x1
jax: 0.10.0
libtpu: 0.0.40
codegen_flags: <defaults>
</compile_context>

<pallas_src>
import jax
import jax.numpy as jnp
from jax.experimental import pallas as pl
from jax.experimental.pallas import tpu as pltpu

FEAT = 4          # pos(2) + vel(2)
EMB_DIM = 4       # conv emb_dim
LAYER_OUT = 4     # conv out_dim
OUT_DIM = 2       # lin_pred out_dim
N_STAGES = 4      # nn_layers=4 -> 4 effective linear stages per MLP
ACC_ROWS = LAYER_OUT + 1   # 4 message rows + 1 count row
EDGE_TILE = 1024           # edges per grid step (multiple of 128)
CORE_GROUPS = 2            # edge-axis split for megacore (v7x); harmless on 1-TC chips

_PREC = jax.lax.Precision.HIGHEST   # explicit per-dot precision (no global config)


# ------------------------------ kernel A: edges ------------------------------

def _edge_kernel(h_ref, idx_ref, wm_ref, bm_ref, part_ref):
    t = pl.program_id(1)

    @pl.when(t == 0)
    def _init():
        part_ref[...] = jnp.zeros_like(part_ref)

    idx = idx_ref[...]            # [2, TE] int32 (row0 = src, row1 = dst, sentinel N pads)
    src = idx[0:1, :]             # [1, TE]
    dst = idx[1:2, :]             # [1, TE]
    n = h_ref.shape[1]
    te = idx.shape[1]

    # --- one selector per tile: nodes on sublanes, edges on lanes ---
    node_ids = jax.lax.broadcasted_iota(jnp.int32, (n, te), 0)          # [N, TE]
    sel_dst = (node_ids == dst).astype(jnp.float32)                     # +1 at dst node
    diff_sel = sel_dst - (node_ids == src).astype(jnp.float32)          # +1 dst, -1 src

    # --- gather: [ACC_ROWS, N] @ [N, TE] -> [ACC_ROWS, TE]; row 4 of h_ref is zero ---
    x = jnp.dot(h_ref[...], diff_sel,
                preferred_element_type=jnp.float32, precision=_PREC)
    zero_msg = jnp.all(x == 0.0, axis=0, keepdims=True)                 # [1, TE]

    # --- message MLP (BatchNorm folded), feature-major; last stage also emits the
    #     count row (weights row 4 = 0, bias row 4 = 1.0) ---
    wm = wm_ref[...]              # [S, ACC_ROWS, ACC_ROWS]
    bm = bm_ref[...]              # [S, ACC_ROWS, 1]
    for s in range(N_STAGES):
        x = jnp.dot(wm[s], x, preferred_element_type=jnp.float32,
                    precision=_PREC) + bm[s]
        if s < N_STAGES - 1:
            x = jnp.tanh(x)
    # x: rows 0..3 = msg, row 4 = 1.0 (edge count)

    # msg[(h_dif == 0).all(features)] = 0, but keep the count row.
    row_ids = jax.lax.broadcasted_iota(jnp.int32, (ACC_ROWS, 1), 0)
    msg_aug = jnp.where(jnp.logical_and(zero_msg, row_ids < LAYER_OUT), 0.0, x)

    # --- scatter-add of messages AND counts in one contraction over the edge axis ---
    partial = jax.lax.dot_general(
        msg_aug, sel_dst,
        dimension_numbers=(((1,), (1,)), ((), ())),
        preferred_element_type=jnp.float32,
        precision=_PREC)                                               # [ACC_ROWS, N]
    part_ref[...] = part_ref[...] + partial[None]


# ------------------------------ kernel B: nodes ------------------------------

def _node_kernel(part_ref, wu_ref, bu_ref, wp_ref, bp_ref, out_ref):
    p = part_ref[...]                      # [G, ACC_ROWS, N]
    acc = p[0]
    for g in range(1, p.shape[0]):
        acc = acc + p[g]

    summed = acc[:LAYER_OUT, :]            # [4, N]
    counts = acc[LAYER_OUT:ACC_ROWS, :]    # [1, N]
    denom = jnp.maximum(counts, 1.0)
    half = LAYER_OUT // 2
    row_ids = jax.lax.broadcasted_iota(jnp.int32, (LAYER_OUT, 1), 0)
    aggr = jnp.where(row_ids >= half, summed / denom, summed)          # add | mean

    wu = wu_ref[...]
    bu = bu_ref[...]
    y = aggr
    for s in range(N_STAGES):
        y = jnp.tanh(jnp.dot(wu[s], y, preferred_element_type=jnp.float32,
                             precision=_PREC) + bu[s])
    out_ref[...] = (jnp.dot(wp_ref[...], y, preferred_element_type=jnp.float32,
                            precision=_PREC) + bp_ref[...])


# --------------------------------- wrapper -----------------------------------

def flocking_forward(pos, vel, edge_index, params, *,
                     edge_tile=EDGE_TILE, core_groups=CORE_GROUPS):
    wm, bm, wu, bu, wp, bp = params
    h = jnp.concatenate([pos, vel], axis=-1).astype(jnp.float32)        # [N, 4]
    n = h.shape[0]
    e = edge_index.shape[1]

    n_tiles = max(1, pl.cdiv(e, edge_tile))
    tiles_per_group = max(1, pl.cdiv(n_tiles, core_groups))
    e_pad = core_groups * tiles_per_group * edge_tile

    # Pad with the out-of-range sentinel `n`: padded edges match no node, so they
    # contribute nothing to the scatter sums or the counts.
    idx = edge_index.astype(jnp.int32)
    pad = jnp.full((2, e_pad - e), n, jnp.int32)
    idx_all = jnp.concatenate([idx, pad], axis=1)                       # [2, E_pad]

    # Feature-major node features with a zero row appended (gives ACC_ROWS input rows so
    # the last message-MLP stage can emit the count row).
    h_aug = jnp.concatenate([h.T, jnp.zeros((1, n), jnp.float32)], axis=0)   # [5, N]

    # Message-MLP slab: real weights in the top-left 4x4 of each [5,5] stage; biases in
    # [S,5,1]; last-stage bias row 4 = 1.0 -> matmul output row 4 == 1.0 (edge count).
    wm_slab = jnp.zeros((N_STAGES, ACC_ROWS, ACC_ROWS), jnp.float32)
    wm_slab = wm_slab.at[:, :LAYER_OUT, :FEAT].set(jnp.swapaxes(wm, 1, 2))
    bm_slab = jnp.zeros((N_STAGES, ACC_ROWS, 1), jnp.float32)
    bm_slab = bm_slab.at[:, :LAYER_OUT, :].set(jnp.swapaxes(bm, 1, 2))
    bm_slab = bm_slab.at[N_STAGES - 1, LAYER_OUT, 0].set(1.0)

    wu_slab = jnp.swapaxes(wu, 1, 2)      # [S, out, in]
    bu_slab = jnp.swapaxes(bu, 1, 2)      # [S, out, 1]
    wp_k = wp.T                           # [OUT_DIM, LAYER_OUT]
    bp_k = bp.T                           # [OUT_DIM, 1]

    grid_spec = pltpu.PrefetchScalarGridSpec(
        num_scalar_prefetch=0,
        grid=(core_groups, tiles_per_group),
        in_specs=[
            pl.BlockSpec((ACC_ROWS, n), lambda c, t: (0, 0)),            # node feats (resident)
            pl.BlockSpec((2, edge_tile),                                 # packed src/dst tile
                         lambda c, t: (0, c * tiles_per_group + t)),
            pl.BlockSpec((N_STAGES, ACC_ROWS, ACC_ROWS), lambda c, t: (0, 0, 0)),
            pl.BlockSpec((N_STAGES, ACC_ROWS, 1), lambda c, t: (0, 0, 0)),
        ],
        out_specs=pl.BlockSpec((1, ACC_ROWS, n), lambda c, t: (c, 0, 0)),
    )

    cost = pl.CostEstimate(
        flops=int(4 * e_pad * n * ACC_ROWS
                  + 2 * e_pad * N_STAGES * ACC_ROWS * ACC_ROWS),
        transcendentals=int(e_pad * ACC_ROWS * (N_STAGES - 1)),
        bytes_accessed=int(4 * (ACC_ROWS * n + 2 * e_pad
                                + core_groups * ACC_ROWS * n
                                + wm_slab.size + bm_slab.size)),
    )

    partials = pl.pallas_call(
        _edge_kernel,
        out_shape=jax.ShapeDtypeStruct((core_groups, ACC_ROWS, n), jnp.float32),
        grid_spec=grid_spec,
        compiler_params=pltpu.CompilerParams(
            dimension_semantics=("parallel", "arbitrary")),   # edge axis split across TCs
        cost_estimate=cost,
    )(h_aug, idx_all, wm_slab, bm_slab)

    out_t = pl.pallas_call(
        _node_kernel,
        out_shape=jax.ShapeDtypeStruct((OUT_DIM, n), jnp.float32),
    )(partials, wu_slab, bu_slab, wp_k, bp_k)
    return out_t.T                                   # [N, OUT_DIM]


# ----------------------- deterministic parameter setup -----------------------

def _linear_params(key, fan_in, fan_out):
    kw, kb = jax.random.split(key)
    bound = 1.0 / (fan_in ** 0.5)
    W = jax.random.uniform(kw, (fan_out, fan_in), jnp.float32, -bound, bound)  # torch [out,in]
    b = jax.random.uniform(kb, (fan_out,), jnp.float32, -bound, bound)
    return W, b


def _bn_fold(gamma, beta, running_mean, running_var, eps=1e-5):
    scale = gamma / jnp.sqrt(running_var + eps)
    shift = beta - running_mean * scale
    return scale, shift


def _fold_linear_bn(W, b, scale, shift):
    # y = (x @ W.T + b) * scale + shift  ->  x @ Wt_eff + b_eff, Wt_eff is [in,out]
    return W.T * scale[None, :], b * scale + shift


def build_params(key):
    keys = jax.random.split(key, 16)
    zeros_e = jnp.zeros((EMB_DIM,), jnp.float32)
    ones_e = jnp.ones((EMB_DIM,), jnp.float32)

    # ---- mlp_msg: Linear(4,emb), [BN_a,Tanh,Linear_a(emb,emb)] x2 (shared), BN_b, Tanh,
    #               Linear(emb,layer_out)
    Wm0, bm0 = _linear_params(keys[0], FEAT, EMB_DIM)
    Wma, bma = _linear_params(keys[1], EMB_DIM, EMB_DIM)      # shared middle Linear
    Wmo, bmo = _linear_params(keys[2], EMB_DIM, LAYER_OUT)
    g_a = jax.random.uniform(keys[3], (EMB_DIM,), jnp.float32, 0.5, 1.5)
    be_a = jax.random.uniform(keys[4], (EMB_DIM,), jnp.float32, -0.5, 0.5)
    g_b = jax.random.uniform(keys[5], (EMB_DIM,), jnp.float32, 0.5, 1.5)
    be_b = jax.random.uniform(keys[6], (EMB_DIM,), jnp.float32, -0.5, 0.5)
    sa, ha = _bn_fold(g_a, be_a, zeros_e, ones_e)
    sb, hb = _bn_fold(g_b, be_b, zeros_e, ones_e)

    wm_stages, bm_stages = [], []
    for (W, b, s, h) in [(Wm0, bm0, sa, ha), (Wma, bma, sa, ha), (Wma, bma, sb, hb)]:
        Wt, be = _fold_linear_bn(W, b, s, h)
        wm_stages.append(Wt); bm_stages.append(be)
    wm_stages.append(Wmo.T); bm_stages.append(bmo)
    wm = jnp.stack(wm_stages)                            # [4, in, out]
    bm = jnp.stack(bm_stages).reshape(N_STAGES, 1, -1)   # [4, 1, out]

    # ---- mlp_upd: Linear(layer_out,emb), [BN,Tanh,Linear(emb,emb)] x2 (shared), BN, Tanh,
    #               Linear(emb,layer_out), BN, Tanh
    Wu0, bu0 = _linear_params(keys[7], LAYER_OUT, EMB_DIM)
    Wua, bua = _linear_params(keys[8], EMB_DIM, EMB_DIM)      # shared middle Linear
    Wup, bup = _linear_params(keys[9], EMB_DIM, LAYER_OUT)
    g_ua = jax.random.uniform(keys[10], (EMB_DIM,), jnp.float32, 0.5, 1.5)
    be_ua = jax.random.uniform(keys[11], (EMB_DIM,), jnp.float32, -0.5, 0.5)
    g_ub = jax.random.uniform(keys[12], (EMB_DIM,), jnp.float32, 0.5, 1.5)
    be_ub = jax.random.uniform(keys[13], (EMB_DIM,), jnp.float32, -0.5, 0.5)
    sua, hua = _bn_fold(g_ua, be_ua, zeros_e, ones_e)
    sub_, hub = _bn_fold(g_ub, be_ub, zeros_e, ones_e)
    zeros_o = jnp.zeros((LAYER_OUT,), jnp.float32)
    ones_o = jnp.ones((LAYER_OUT,), jnp.float32)
    suc, huc = _bn_fold(ones_o, zeros_o, zeros_o, ones_o)      # final BN at torch defaults

    wu_stages, bu_stages = [], []
    for (W, b, s, h) in [(Wu0, bu0, sua, hua), (Wua, bua, sua, hua),
                         (Wua, bua, sub_, hub), (Wup, bup, suc, huc)]:
        Wt, be = _fold_linear_bn(W, b, s, h)
        wu_stages.append(Wt); bu_stages.append(be)
    wu = jnp.stack(wu_stages)                            # [4, in, out]
    bu = jnp.stack(bu_stages).reshape(N_STAGES, 1, -1)   # [4, 1, out]

    Wp, bp_ = _linear_params(keys[14], LAYER_OUT, OUT_DIM)
    wp = Wp.T                                            # [4, 2]
    bp = bp_.reshape(1, OUT_DIM)                         # [1, 2]
    return wm, bm, wu, bu, wp, bp


# ----------------------------- pure-JAX reference -----------------------------

def flocking_reference(pos, vel, edge_index, params):
    wm, bm, wu, bu, wp, bp = params
    h = jnp.concatenate([pos, vel], axis=-1)
    src, dst = edge_index[0], edge_index[1]
    h_dif = h[dst] - h[src]
    x = h_dif
    for s in range(N_STAGES):
        x = jnp.dot(x, wm[s], precision=_PREC) + bm[s]
        if s < N_STAGES - 1:
            x = jnp.tanh(x)
    msg = jnp.where(jnp.all(h_dif == 0.0, axis=1, keepdims=True), 0.0, x)
    n = h.shape[0]
    half = LAYER_OUT // 2
    add_out = jnp.zeros((n, half)).at[dst].add(msg[:, :half])
    sum2 = jnp.zeros((n, LAYER_OUT - half)).at[dst].add(msg[:, half:])
    cnt = jnp.zeros((n, 1)).at[dst].add(1.0)
    mean_out = sum2 / jnp.maximum(cnt, 1.0)
    y = jnp.concatenate([add_out, mean_out], axis=1)
    for s in range(N_STAGES):
        y = jnp.tanh(jnp.dot(y, wu[s], precision=_PREC) + bu[s])
    return jnp.dot(y, wp, precision=_PREC) + bp


if __name__ == "__main__":
    key = jax.random.PRNGKey(0)
    k_pos, k_vel, k_par = jax.random.split(key, 3)
    N = 16
    pos = jax.random.normal(k_pos, (N, 2), jnp.float32)
    vel = jax.random.normal(k_vel, (N, 2), jnp.float32)

    # Dense directed multigraph (all ordered pairs i != j, repeated 3x) plus two
    # self-loops, so that (a) the edge grid spans multiple tiles / both core groups and
    # (b) the zero-message mask path is exercised.  E = 3*240 + 2 = 722.
    src_list, dst_list = [], []
    for _ in range(3):
        for i in range(N):
            for j in range(N):
                if i != j:
                    src_list.append(j)
                    dst_list.append(i)
    src_list += [0, 3]
    dst_list += [0, 3]
    edge_index = jnp.array([src_list, dst_list], dtype=jnp.int32)   # [2, 722]

    params = build_params(k_par)
    ref = flocking_reference(pos, vel, edge_index, params)

    # Default config (EDGE_TILE=1024, 2 core groups).
    out = jax.block_until_ready(flocking_forward(pos, vel, edge_index, params))
    assert out.shape == (N, OUT_DIM)
    assert bool(jnp.allclose(out, ref, atol=1e-4, rtol=1e-4)), \
        float(jnp.max(jnp.abs(out - ref)))

    # Smaller tiles: exercises multi-tile accumulation within each core group.
    out_small = jax.block_until_ready(
        flocking_forward(pos, vel, edge_index, params, edge_tile=128))
    assert bool(jnp.allclose(out_small, ref, atol=1e-4, rtol=1e-4)), \
        float(jnp.max(jnp.abs(out_small - ref)))

    print("KERNEL_OK")
</pallas_src>

<mosaic_0001>
module attributes {stable_mosaic.version = 11 : i64} {
  func.func @_edge_kernel(%arg0: i32, %arg1: i32, %arg2: memref<5x16xf32, #tpu.memory_space<vmem>>, %arg3: memref<2x1024xi32, #tpu.memory_space<vmem>>, %arg4: memref<4x5x5xf32, #tpu.memory_space<vmem>>, %arg5: memref<4x5x1xf32, #tpu.memory_space<vmem>>, %arg6: memref<1x5x16xf32, #tpu.memory_space<vmem>>) attributes {dimension_semantics = [#tpu.dimension_semantics<parallel>, #tpu.dimension_semantics<arbitrary>], iteration_bounds = array<i64: 2, 1>, scalar_prefetch = 0 : i64, scratch_operands = 0 : i64, tpu.core_type = #tpu.core_type<tc>, window_params = [{pipeline_mode = #tpu.pipeline_mode<synchronous>, transform_indices = @transform_0, window_bounds = array<i64: 5, 16>}, {transform_indices = @transform_1, window_bounds = array<i64: 2, 1024>}, {pipeline_mode = #tpu.pipeline_mode<synchronous>, transform_indices = @transform_2, window_bounds = array<i64: 4, 5, 5>}, {pipeline_mode = #tpu.pipeline_mode<synchronous>, transform_indices = @transform_3, window_bounds = array<i64: 4, 5, 1>}, {transform_indices = @transform_4, window_bounds = array<i64: 1, 5, 16>}]} {
    %c0_i32 = arith.constant 0 : i32
    %0 = arith.cmpi eq, %arg1, %c0_i32 : i32
    %1 = arith.extui %0 : i1 to i32
    %c0_i32_0 = arith.constant 0 : i32
    %2 = arith.cmpi ne, %1, %c0_i32_0 : i32
    scf.if %2 {
      %cst_27 = arith.constant 0.000000e+00 : f32
      %73 = vector.broadcast %cst_27 : f32 to vector<1x5x16xf32>
      %c0_28 = arith.constant 0 : index
      %c0_29 = arith.constant 0 : index
      %c0_30 = arith.constant 0 : index
      %74 = vector.load %arg6[%c0_28, %c0_29, %c0_30] : memref<1x5x16xf32, #tpu.memory_space<vmem>>, vector<1x5x16xf32>
      tpu.vector_store %arg6[%c0_28, %c0_29, %c0_30], %73 {strides = array<i32>} : memref<1x5x16xf32, #tpu.memory_space<vmem>>, vector<1x5x16xf32>,
    } else {
    }
    %c0 = arith.constant 0 : index
    %c0_1 = arith.constant 0 : index
    %3 = vector.load %arg3[%c0, %c0_1] : memref<2x1024xi32, #tpu.memory_space<vmem>>, vector<2x1024xi32>
    %4 = vector.extract_strided_slice %3 {offsets = [0, 0], sizes = [1, 1024], strides = [1, 1]} : vector<2x1024xi32> to vector<1x1024xi32>
    %5 = vector.extract_strided_slice %3 {offsets = [1, 0], sizes = [1, 1024], strides = [1, 1]} : vector<2x1024xi32> to vector<1x1024xi32>
    %6 = tpu.iota {dimensions = array<i32: 0>} : vector<16x1024xi32>
    %7 = vector.broadcast %5 : vector<1x1024xi32> to vector<16x1024xi32>
    %8 = arith.cmpi eq, %6, %7 : vector<16x1024xi32>
    %9 = arith.extui %8 : vector<16x1024xi1> to vector<16x1024xi32>
    %10 = arith.sitofp %9 : vector<16x1024xi32> to vector<16x1024xf32>
    %11 = vector.broadcast %4 : vector<1x1024xi32> to vector<16x1024xi32>
    %12 = arith.cmpi eq, %6, %11 : vector<16x1024xi32>
    %13 = arith.extui %12 : vector<16x1024xi1> to vector<16x1024xi32>
    %14 = arith.sitofp %13 : vector<16x1024xi32> to vector<16x1024xf32>
    %15 = arith.subf %10, %14 : vector<16x1024xf32>
    %c0_2 = arith.constant 0 : index
    %c0_3 = arith.constant 0 : index
    %16 = vector.load %arg2[%c0_2, %c0_3] : memref<5x16xf32, #tpu.memory_space<vmem>>, vector<5x16xf32>
    %cst = arith.constant dense<0.000000e+00> : vector<5x1024xf32>
    %17 = tpu.matmul %16, %15, %cst {dimension_numbers = #tpu.dot_dimension_numbers<[1], [0], [0], [1], [0, 0, 1, 1], [], []>, precision = #tpu.contract_precision<fp32>} : vector<5x16xf32>, vector<16x1024xf32>, vector<5x1024xf32> -> vector<5x1024xf32>
    %cst_4 = arith.constant 0.000000e+00 : f32
    %18 = vector.broadcast %cst_4 : f32 to vector<5x1024xf32>
    %19 = arith.cmpf oeq, %17, %18 : vector<5x1024xf32>
    %cst_5 = arith.constant 1.000000e+00 : f32
    %cst_6 = arith.constant 0.000000e+00 : f32
    %20 = vector.broadcast %cst_5 : f32 to vector<5x1024xf32>
    %21 = vector.broadcast %cst_6 : f32 to vector<5x1024xf32>
    %22 = arith.select %19, %20, %21 : vector<5x1024xi1>, vector<5x1024xf32>
    %cst_7 = arith.constant dense<0x7F800000> : vector<1024xf32>
    %23 = vector.multi_reduction <minimumf>, %22, %cst_7 [0] : vector<5x1024xf32> to vector<1024xf32>
    %cst_8 = arith.constant 0.000000e+00 : f32
    %24 = vector.broadcast %cst_8 : f32 to vector<1024xf32>
    %25 = arith.cmpf ogt, %23, %24 : vector<1024xf32>
    %26 = vector.shape_cast %25 : vector<1024xi1> to vector<1x1024xi1>
    %c0_9 = arith.constant 0 : index
    %c0_10 = arith.constant 0 : index
    %c0_11 = arith.constant 0 : index
    %27 = vector.load %arg4[%c0_9, %c0_10, %c0_11] : memref<4x5x5xf32, #tpu.memory_space<vmem>>, vector<4x5x5xf32>
    %c0_12 = arith.constant 0 : index
    %c0_13 = arith.constant 0 : index
    %c0_14 = arith.constant 0 : index
    %28 = vector.load %arg5[%c0_12, %c0_13, %c0_14] : memref<4x5x1xf32, #tpu.memory_space<vmem>>, vector<4x5x1xf32>
    %29 = vector.extract_strided_slice %27 {offsets = [0, 0, 0], sizes = [1, 5, 5], strides = [1, 1, 1]} : vector<4x5x5xf32> to vector<1x5x5xf32>
    %30 = vector.shape_cast %29 : vector<1x5x5xf32> to vector<5x5xf32>
    %cst_15 = arith.constant dense<0.000000e+00> : vector<5x1024xf32>
    %31 = tpu.matmul %30, %17, %cst_15 {dimension_numbers = #tpu.dot_dimension_numbers<[1], [0], [0], [1], [0, 0, 1, 1], [], []>, precision = #tpu.contract_precision<fp32>} : vector<5x5xf32>, vector<5x1024xf32>, vector<5x1024xf32> -> vector<5x1024xf32>
    %32 = vector.extract_strided_slice %28 {offsets = [0, 0, 0], sizes = [1, 5, 1], strides = [1, 1, 1]} : vector<4x5x1xf32> to vector<1x5x1xf32>
    %33 = vector.shape_cast %32 : vector<1x5x1xf32> to vector<5x1xf32>
    %34 = vector.broadcast %33 : vector<5x1xf32> to vector<5x1024xf32>
    %35 = arith.addf %31, %34 : vector<5x1024xf32>
    %36 = math.tanh %35 : vector<5x1024xf32>
    %37 = vector.extract_strided_slice %27 {offsets = [1, 0, 0], sizes = [1, 5, 5], strides = [1, 1, 1]} : vector<4x5x5xf32> to vector<1x5x5xf32>
    %38 = vector.shape_cast %37 : vector<1x5x5xf32> to vector<5x5xf32>
    %cst_16 = arith.constant dense<0.000000e+00> : vector<5x1024xf32>
    %39 = tpu.matmul %38, %36, %cst_16 {dimension_numbers = #tpu.dot_dimension_numbers<[1], [0], [0], [1], [0, 0, 1, 1], [], []>, precision = #tpu.contract_precision<fp32>} : vector<5x5xf32>, vector<5x1024xf32>, vector<5x1024xf32> -> vector<5x1024xf32>
    %40 = vector.extract_strided_slice %28 {offsets = [1, 0, 0], sizes = [1, 5, 1], strides = [1, 1, 1]} : vector<4x5x1xf32> to vector<1x5x1xf32>
    %41 = vector.shape_cast %40 : vector<1x5x1xf32> to vector<5x1xf32>
    %42 = vector.broadcast %41 : vector<5x1xf32> to vector<5x1024xf32>
    %43 = arith.addf %39, %42 : vector<5x1024xf32>
    %44 = math.tanh %43 : vector<5x1024xf32>
    %45 = vector.extract_strided_slice %27 {offsets = [2, 0, 0], sizes = [1, 5, 5], strides = [1, 1, 1]} : vector<4x5x5xf32> to vector<1x5x5xf32>
    %46 = vector.shape_cast %45 : vector<1x5x5xf32> to vector<5x5xf32>
    %cst_17 = arith.constant dense<0.000000e+00> : vector<5x1024xf32>
    %47 = tpu.matmul %46, %44, %cst_17 {dimension_numbers = #tpu.dot_dimension_numbers<[1], [0], [0], [1], [0, 0, 1, 1], [], []>, precision = #tpu.contract_precision<fp32>} : vector<5x5xf32>, vector<5x1024xf32>, vector<5x1024xf32> -> vector<5x1024xf32>
    %48 = vector.extract_strided_slice %28 {offsets = [2, 0, 0], sizes = [1, 5, 1], strides = [1, 1, 1]} : vector<4x5x1xf32> to vector<1x5x1xf32>
    %49 = vector.shape_cast %48 : vector<1x5x1xf32> to vector<5x1xf32>
    %50 = vector.broadcast %49 : vector<5x1xf32> to vector<5x1024xf32>
    %51 = arith.addf %47, %50 : vector<5x1024xf32>
    %52 = math.tanh %51 : vector<5x1024xf32>
    %53 = vector.extract_strided_slice %27 {offsets = [3, 0, 0], sizes = [1, 5, 5], strides = [1, 1, 1]} : vector<4x5x5xf32> to vector<1x5x5xf32>
    %54 = vector.shape_cast %53 : vector<1x5x5xf32> to vector<5x5xf32>
    %cst_18 = arith.constant dense<0.000000e+00> : vector<5x1024xf32>
    %55 = tpu.matmul %54, %52, %cst_18 {dimension_numbers = #tpu.dot_dimension_numbers<[1], [0], [0], [1], [0, 0, 1, 1], [], []>, precision = #tpu.contract_precision<fp32>} : vector<5x5xf32>, vector<5x1024xf32>, vector<5x1024xf32> -> vector<5x1024xf32>
    %56 = vector.extract_strided_slice %28 {offsets = [3, 0, 0], sizes = [1, 5, 1], strides = [1, 1, 1]} : vector<4x5x1xf32> to vector<1x5x1xf32>
    %57 = vector.shape_cast %56 : vector<1x5x1xf32> to vector<5x1xf32>
    %58 = vector.broadcast %57 : vector<5x1xf32> to vector<5x1024xf32>
    %59 = arith.addf %55, %58 : vector<5x1024xf32>
    %60 = tpu.iota {dimensions = array<i32: 0>} : vector<5x1xi32>
    %c4_i32 = arith.constant 4 : i32
    %61 = vector.broadcast %c4_i32 : i32 to vector<5x1xi32>
    %62 = arith.cmpi slt, %60, %61 : vector<5x1xi32>
    %63 = vector.broadcast %26 : vector<1x1024xi1> to vector<5x1024xi1>
    %64 = vector.broadcast %62 : vector<5x1xi1> to vector<5x1024xi1>
    %65 = arith.andi %63, %64 : vector<5x1024xi1>
    %cst_19 = arith.constant 0.000000e+00 : f32
    %66 = vector.broadcast %cst_19 : f32 to vector<5x1024xf32>
    %67 = arith.select %65, %66, %59 : vector<5x1024xi1>, vector<5x1024xf32>
    %cst_20 = arith.constant dense<0.000000e+00> : vector<5x16xf32>
    %68 = tpu.matmul %67, %10, %cst_20 {dimension_numbers = #tpu.dot_dimension_numbers<[1], [1], [0], [0], [0, 0, 1, 0], [], []>, precision = #tpu.contract_precision<fp32>} : vector<5x1024xf32>, vector<16x1024xf32>, vector<5x16xf32> -> vector<5x16xf32>
    %c0_21 = arith.constant 0 : index
    %c0_22 = arith.constant 0 : index
    %c0_23 = arith.constant 0 : index
    %69 = vector.load %arg6[%c0_21, %c0_22, %c0_23] : memref<1x5x16xf32, #tpu.memory_space<vmem>>, vector<1x5x16xf32>
    %70 = vector.shape_cast %68 : vector<5x16xf32> to vector<1x5x16xf32>
    %71 = arith.addf %69, %70 : vector<1x5x16xf32>
    %c0_24 = arith.constant 0 : index
    %c0_25 = arith.constant 0 : index
    %c0_26 = arith.constant 0 : index
    %72 = vector.load %arg6[%c0_24, %c0_25, %c0_26] : memref<1x5x16xf32, #tpu.memory_space<vmem>>, vector<1x5x16xf32>
    tpu.vector_store %arg6[%c0_24, %c0_25, %c0_26], %71 {strides = array<i32>} : memref<1x5x16xf32, #tpu.memory_space<vmem>>, vector<1x5x16xf32>,
    return
  }
  func.func @transform_0(%arg0: i32, %arg1: i32) -> (i32, i32) {
    %c0_i32 = arith.constant 0 : i32
    %c0_i32_0 = arith.constant 0 : i32
    %c0_i32_1 = arith.constant 0 : i32
    return %c0_i32, %c0_i32_0 : i32, i32
  }
  func.func @transform_1(%arg0: i32, %arg1: i32) -> (i32, i32) {
    %c1_i32 = arith.constant 1 : i32
    %0 = arith.muli %arg0, %c1_i32 : i32
    %1 = arith.addi %0, %arg1 : i32
    %c0_i32 = arith.constant 0 : i32
    %c0_i32_0 = arith.constant 0 : i32
    return %c0_i32, %1 : i32, i32
  }
  func.func @transform_2(%arg0: i32, %arg1: i32) -> (i32, i32, i32) {
    %c0_i32 = arith.constant 0 : i32
    %c0_i32_0 = arith.constant 0 : i32
    %c0_i32_1 = arith.constant 0 : i32
    %c0_i32_2 = arith.constant 0 : i32
    return %c0_i32, %c0_i32_0, %c0_i32_1 : i32, i32, i32
  }
  func.func @transform_3(%arg0: i32, %arg1: i32) -> (i32, i32, i32) {
    %c0_i32 = arith.constant 0 : i32
    %c0_i32_0 = arith.constant 0 : i32
    %c0_i32_1 = arith.constant 0 : i32
    %c0_i32_2 = arith.constant 0 : i32
    return %c0_i32, %c0_i32_0, %c0_i32_1 : i32, i32, i32
  }
  func.func @transform_4(%arg0: i32, %arg1: i32) -> (i32, i32, i32) {
    %c0_i32 = arith.constant 0 : i32
    %c0_i32_0 = arith.constant 0 : i32
    %c0_i32_1 = arith.constant 0 : i32
    return %arg0, %c0_i32, %c0_i32_0 : i32, i32, i32
  }
}

</mosaic_0001>

<bundles_post_ra>
// kernel: tpu_custom_call.1
= control target key start
LH: loop header
LB: loop body
LE: loop exit
PB: predicated region body
PF: predicated region fallthrough
CT: control target
= control target key end

     0   :  { %s13124_s15 = smov 0   ;;  %s13126_s16 = smov 0   ;;  %s15061_s0 = inlined_call_operand.vmem [shape: f32[5,16], index: 0, kind: input, shape index: {}]   ;;  %s15062_s1 = inlined_call_operand.vmem [shape: s32[2,2048], index: 1, kind: input, shape index: {}]   ;;  %s15063_s2 = inlined_call_operand.vmem [shape: f32[4,5,5], index: 2, kind: input, shape index: {}]   ;;  %s15064_s3 = inlined_call_operand.vmem [shape: f32[4,5,1], index: 3, kind: input, shape index: {}]   ;;  %s15065_s4 = inlined_call_operand.vmem [shape: f32[2,5,16], index: 4, kind: output, shape index: {}]  }
   0x1   :  { %s13128_s17 = smov 0  }
   0x2 LB: > { %s26_s18 = sadd.s32 1, %s13090_s16  ;;  %p12485_p0 = scmp.ge.s32.totalorder %s13094_s17, 1  ;;  %s13094_s17 = sphi %s13128_s17, %s14_s17   ;;  %s13090_s16 = sphi %s13126_s16, %s15464_s16   ;;  %s13086_s15 = sphi %s13124_s15, %s15463_s15  }
   0x3   : > { %p28_p1 = scmp.ge.s32.totalorder %s26_s18, 2  ;;  %p179_p2 = scmp.lt.s32.totalorder %s13094_s17, 3 }
   0x5   : > { %s15466_s18 = smov (%p28_p1, %s26_s18), 0  ;;  %p180_p3 = pnand %p12485_p0, %p179_p2 }
   0x7   : > { %183 = sbr.rel (%p180_p3) target bundleno = 1712 (0x6b0), region = 36 }
   0xe   : > { %s12486_s19 = sshll.u32 %s13086_s15, 3  ;;  %v225_v0 = vlaneseq  ;;  %v15078_v1 = vmov 0.0   ;;  %v468_v3 = vld [vmem:[%s15061_s0] sm:$0x1f]  ;;  %vm469_vm0 = vcmask 130048   ;;  %p213_p5 = scmp.lt.s32.totalorder %s13086_s15, 1 }
   0xf   : > { %p207_p4 = scmp.lt.s32.totalorder %s12486_s19, 15  ;;  %541 = vmatprep.mubr.f32.mxu0 %v15078_v1  ;;  %1032 = vmatprep.mubr.f32.mxu1 %v15078_v1  ;;  %v471_v10 = vsel %vm469_vm0, %v468_v3, 0 }
  0x10   : > { %v13147_v2 = vshrl.u32 %v225_v0, 7  ;;  %v13180_v18 = vand.u32 4294901760, %v471_v10  ;;  %s15470_s15 = smov (!%p213_p5, %s13086_s15), 1 }
  0x11   : > { %s15468_s19 = smov (!%p207_p4, %s12486_s19), 15  ;;  %s12488_s20 = sshll.u32 %s15470_s15, 3 }
  0x12   : > { %v234_v4 = vsub.s32 3, %v13147_v2  ;;  %s12487_s22 = sshll.u32 %s15468_s19, 1  ;;  %v346_v5 = vsub.s32 2, %v13147_v2  ;;  %v242_v6 = vsub.s32 7, %v13147_v2  ;;  %v354_v7 = vsub.s32 6, %v13147_v2  ;;  %s15044_s23 = scalar_lea.vmem %s15065_s4, %s12488_s20 }
  0x13   : > { %s13159_s25 = scalar_lea.vmem %s15062_s1, %s12487_s22  ;;  %v13162_v8 = vsub.s32 1, %v13147_v2  ;;  %v13165_v9 = vsub.s32 0, %v13147_v2  ;;  %v13169_v12 = vadd.s32 8, %v13147_v2  ;;  %v238_v13 = vsub.s32 5, %v13147_v2 }
  0x14   : > { %v223_v11 = vld [vmem:[%s13159_s25] sm:$0xff]  ;;  %v350_v26 = vsub.s32 4, %v13147_v2  ;;  %v13250_v45 = vsub.f32 %v471_v10, %v13180_v18 }
  0x15   : > { %v235_v14 = vrot.slane %v223_v11, %v234_v4  ;;  %v347_v15 = vrot.slane %v223_v11, %v346_v5  ;;  %v243_v16 = vrot.slane %v223_v11, %v242_v6  ;;  %v355_v17 = vrot.slane %v223_v11, %v354_v7 }
  0x16   : > { %v231_v21 = vrot.slane %v223_v11, %v13162_v8  ;;  %v343_v22 = vrot.slane %v223_v11, %v13165_v9  ;;  %v239_v25 = vrot.slane %v223_v11, %v238_v13  ;;  %v351_v41 = vrot.slane %v223_v11, %v350_v26 }
  0x17   : > { %v13183_v19 = vrot.slane %v235_v14, %v13162_v8  ;;  %v379_v20 = vrot.slane %v347_v15, %v13165_v9  ;;  %v13189_v23 = vrot.slane %v243_v16, %v13162_v8  ;;  %v387_v24 = vrot.slane %v355_v17, %v13165_v9 }
  0x18   : > { %v13218_v33 = vrot.slane %v231_v21, %v13162_v8  ;;  %v375_v34 = vrot.slane %v343_v22, %v13165_v9  ;;  %v13247_v44 = vrot.slane %v239_v25, %v13162_v8  ;;  %v383_v53 = vrot.slane %v351_v41, %v13165_v9 }
  0x19   : > { %15149 = vst [vmem:[#allocation2_spill] sm:$0xff] %v13189_v23  ;;  %vm15094_vm1 = vcmp.eq.s32.totalorder %v13147_v2, %v13183_v19  ;;  %vm15093_vm2 = vcmp.eq.s32.totalorder %v13169_v12, %v13183_v19  ;;  %vm405_vm3 = vcmp.eq.s32.totalorder %v13147_v2, %v379_v20  ;;  %vm413_vm4 = vcmp.eq.s32.totalorder %v13169_v12, %v379_v20 }
  0x1a   : > { %v13205_v27 = vsel %vm15094_vm1, 1.0, %v15078_v1  ;;  %v13211_v28 = vsel %vm15093_vm2, 1.0, %v15078_v1  ;;  %v12506_v29 = vsel %vm405_vm3, 1.0, %v15078_v1  ;;  %v12514_v30 = vsel %vm413_vm4, 1.0, %v15078_v1  ;;  %15150 = vst [vmem:[#allocation3_spill] sm:$0xff] %v13247_v44 }
  0x1b   : > { %v453_v31 = vsub.f32 %v13205_v27, %v12506_v29  ;;  %v461_v32 = vsub.f32 %v13211_v28, %v12514_v30  ;;  %vm15089_vm5 = vcmp.eq.s32.totalorder %v13147_v2, %v13189_v23  ;;  %vm15088_vm6 = vcmp.eq.s32.totalorder %v13169_v12, %v13189_v23 }
  0x1c   : > { %vm407_vm7 = vcmp.eq.s32.totalorder %v13147_v2, %v387_v24  ;;  %vm415_vm8 = vcmp.eq.s32.totalorder %v13169_v12, %v387_v24  ;;  %v13231_v37 = vsel %vm15089_vm5, 1.0, %v15078_v1  ;;  %v13237_v38 = vsel %vm15088_vm6, 1.0, %v15078_v1 }
  0x1d   : > { %v473_v35 = vand.u32 4294901760, %v453_v31  ;;  %v477_v36 = vand.u32 4294901760, %v461_v32  ;;  %v12508_v39 = vsel %vm407_vm7, 1.0, %v15078_v1  ;;  %v12516_v40 = vsel %vm415_vm8, 1.0, %v15078_v1 }
  0x1e   : > { %v455_v43 = vsub.f32 %v13231_v37, %v12508_v39  ;;  %v463_v46 = vsub.f32 %v13237_v38, %v12516_v40  ;;  %vm15092_vm9 = vcmp.eq.s32.totalorder %v13147_v2, %v13218_v33  ;;  %vm15091_vm10 = vcmp.eq.s32.totalorder %v13169_v12, %v13218_v33 }
  0x1f   : > { %v13243_v42 = vpack.c.bf16 %v477_v36, %v473_v35  ;;  %vm404_vm11 = vcmp.eq.s32.totalorder %v13147_v2, %v375_v34  ;;  %v13263_v48 = vsel %vm15092_vm9, 1.0, %v15078_v1  ;;  %v13269_v49 = vsel %vm15091_vm10, 1.0, %v15078_v1 }
  0x20   : > { %v964_v47 = vand.u32 4294901760, %v455_v43  ;;  %vm412_vm12 = vcmp.eq.s32.totalorder %v13169_v12, %v375_v34  ;;  %v968_v50 = vand.u32 4294901760, %v463_v46  ;;  %v12505_v51 = vsel %vm404_vm11, 1.0, %v15078_v1 }
  0x21   : > { %12572 = vmatprep.subr.bf16.mxu0 %v13243_v42  ;;  %v12513_v52 = vsel %vm412_vm12, 1.0, %v15078_v1  ;;  %v13275_v54 = vsub.f32 %v453_v31, %v473_v35  ;;  %v13277_v55 = vsub.f32 %v461_v32, %v477_v36  ;;  %v452_v56 = vsub.f32 %v13263_v48, %v12505_v51 }
  0x22   : > { %v460_v57 = vsub.f32 %v13269_v49, %v12513_v52  ;;  %v13281_v58 = vpack.c.bf16 %v968_v50, %v964_v47  ;;  %v13283_v59 = vsub.f32 %v455_v43, %v964_v47  ;;  %vm15087_vm13 = vcmp.eq.s32.totalorder %v13147_v2, %v13247_v44 }
  0x23   : > { %vm15086_vm14 = vcmp.eq.s32.totalorder %v13169_v12, %v13247_v44  ;;  %v13289_v60 = vsub.f32 %v463_v46, %v968_v50  ;;  %v475_v61 = vand.u32 4294901760, %v452_v56  ;;  %v13295_v63 = vsel %vm15087_vm13, 1.0, %v15078_v1 }
  0x24   : > { %v479_v62 = vand.u32 4294901760, %v460_v57  ;;  %12596 = vmatprep.subr.bf16.mxu1 %v13281_v58  ;;  %v13302_v0 = vsel %vm15086_vm14, 1.0, %v15078_v1  ;;  %vm406_vm15 = vcmp.eq.s32.totalorder %v13147_v2, %v383_v53  ;;  %vm414_vm0 = vcmp.eq.s32.totalorder %v13169_v12, %v383_v53 }
  0x25   : > { %v13308_v10 = vsub.f32 %v452_v56, %v475_v61  ;;  %v12507_v14 = vsel %vm406_vm15, 1.0, %v15078_v1  ;;  %v12515_v15 = vsel %vm414_vm0, 1.0, %v15078_v1  ;;  %v13316_v17 = vand.u32 4294901760, %v13250_v45 }
  0x26   : > { %v13306_v3 = vpack.c.bf16 %v479_v62, %v475_v61  ;;  %v13310_v11 = vsub.f32 %v460_v57, %v479_v62  ;;  %v454_v16 = vsub.f32 %v13295_v63, %v12507_v14  ;;  %v555_v20 = vand.u32 4294901760, %v13275_v54 }
  0x27   : > { %v462_v21 = vsub.f32 %v13302_v0, %v12515_v15  ;;  %v567_v22 = vand.u32 4294901760, %v13277_v55  ;;  %v1046_v24 = vand.u32 4294901760, %v13283_v59  ;;  %v1058_v25 = vand.u32 4294901760, %v13289_v60 }
  0x28   : > { %12574 = vmatpush1.bf16.msra.mxu0 %v13306_v3  ;;  %v966_v29 = vand.u32 4294901760, %v454_v16  ;;  %v545_v30 = vsub.f32 %v13250_v45, %v13316_v17  ;;  %v556_v31 = vsub.f32 %v13275_v54, %v555_v20  ;;  %v561_v32 = vand.u32 4294901760, %v13308_v10 }
  0x29   : > { %v970_v34 = vand.u32 4294901760, %v462_v21  ;;  %v568_v35 = vsub.f32 %v13277_v55, %v567_v22  ;;  %v1047_v36 = vsub.f32 %v13283_v59, %v1046_v24  ;;  %v1059_v39 = vsub.f32 %v13289_v60, %v1058_v25 }
  0x2a   : > { %v13339_v40 = vsub.f32 %v454_v16, %v966_v29  ;;  %v13341_v41 = vand.u32 4294901760, %v545_v30  ;;  %v557_v43 = vand.u32 4294901760, %v556_v31  ;;  %v562_v46 = vsub.f32 %v13308_v10, %v561_v32 }
  0x2b   : > { %v13346_v47 = vpack.c.bf16 %v970_v34, %v966_v29  ;;  %v13348_v50 = vsub.f32 %v462_v21, %v970_v34  ;;  %v569_v51 = vand.u32 4294901760, %v568_v35  ;;  %v1048_v52 = vand.u32 4294901760, %v1047_v36  ;;  %v13363_v29 = vld [vmem:[%s13159_s25 + $0x8] sm:$0xff] }
  0x2c   : > { %547 = vmatmul.mubr.f32.vlgmr.msra.gmra.mrb[0].mxu0 %v13341_v41  ;;  %v1060_v53 = vand.u32 4294901760, %v1059_v39  ;;  %v573_v56 = vand.u32 4294901760, %v13310_v11  ;;  %v1052_v57 = vand.u32 4294901760, %v13339_v40  ;;  %v563_v15 = vand.u32 4294901760, %v562_v46 }
  0x2d   : > { %12598 = vmatpush1.bf16.msra.mxu1 %v13346_v47  ;;  %v12575_v61 = vpack.c.bf16 %v569_v51, %v557_v43  ;;  %v1064_v62 = vand.u32 4294901760, %v13348_v50  ;;  %637 = vmatprep.mubr.f32.mxu0 %v15078_v1  ;;  %v12579_v35 = vpack.c.bf16 %v13277_v55, %v13275_v54  ;;  %v251_v39 = vrot.slane %v13363_v29, %v234_v4 }
  0x2e   : > { %v12599_v14 = vpack.c.bf16 %v1060_v53, %v1048_v52  ;;  %v574_v16 = vsub.f32 %v13310_v11, %v573_v56  ;;  %v1053_v21 = vsub.f32 %v13339_v40, %v1052_v57  ;;  %v363_v43 = vrot.slane %v13363_v29, %v346_v5 }
  0x2f   : > { %12576 = vmatprep.subr.bf16.mxu0 %v12575_v61  ;;  %v1065_v30 = vsub.f32 %v13348_v50, %v1064_v62  ;;  %v259_v46 = vrot.slane %v13363_v29, %v242_v6  ;;  %v12603_v52 = vpack.c.bf16 %v13289_v60, %v13283_v59  ;;  %v371_v53 = vrot.slane %v13363_v29, %v354_v7 }
  0x30   : > { %1038 = vmatmul.mubr.f32.vlgmr.msra.gmra.mrb[0].mxu1 %v13341_v41  ;;  %12600 = vmatprep.subr.bf16.mxu1 %v12599_v14  ;;  %v575_v31 = vand.u32 4294901760, %v574_v16  ;;  %v1054_v34 = vand.u32 4294901760, %v1053_v21  ;;  %v13387_v14 = vrot.slane %v251_v39, %v13162_v8  ;;  %v395_v4 = vrot.slane %v363_v43, %v13165_v9 }
  0x31   : > { %v1066_v36 = vand.u32 4294901760, %v1065_v30  ;;  %1128 = vmatprep.mubr.f32.mxu1 %v15078_v1  ;;  %v12581_v5 = vpack.c.bf16 %v13310_v11, %v13308_v10  ;;  %v13393_v6 = vrot.slane %v259_v46, %v13162_v8  ;;  %v359_v16 = vrot.slane %v13363_v29, %v13165_v9 }
  0x32   : > { %v12577_v51 = vpack.c.bf16 %v575_v31, %v563_v15  ;;  %15151 = vst [vmem:[#allocation4_spill] sm:$0xff] %v13387_v14  ;;  %v247_v15 = vrot.slane %v13363_v29, %v13162_v8  ;;  %v12605_v7 = vpack.c.bf16 %v13348_v50, %v13339_v40  ;;  %v403_v21 = vrot.slane %v371_v53, %v13165_v9 }
  0x33   : > { %v12601_v61 = vpack.c.bf16 %v1066_v36, %v1054_v34  ;;  %15152 = vst [vmem:[#allocation5_spill] sm:$0xff] %v13393_v6  ;;  %vm15085_vm3 = vcmp.eq.s32.totalorder %v13147_v2, %v13387_v14  ;;  %vm409_vm4 = vcmp.eq.s32.totalorder %v13147_v2, %v395_v4  ;;  %vm15084_vm7 = vcmp.eq.s32.totalorder %v13169_v12, %v13387_v14 }
  0x34   : > { %12578 = vmatpush1.bf16.msra.mxu0 %v12577_v51  ;;  %vm417_vm8 = vcmp.eq.s32.totalorder %v13169_v12, %v395_v4  ;;  %vm15067_vm11 = vcmp.eq.s32.totalorder %v13147_v2, %v13393_v6  ;;  %v13413_v30 = vrot.slane %v247_v15, %v13162_v8  ;;  %v391_v31 = vrot.slane %v359_v16, %v13165_v9 }
  0x35   : > { %12602 = vmatpush1.bf16.msra.mxu1 %v12601_v61  ;;  %12580 = vmatprep.subr.bf16.mxu0 %v12579_v35  ;;  %v13421_v34 = vsel %vm15085_vm3, 1.0, %v15078_v1  ;;  %v12510_v35 = vsel %vm409_vm4, 1.0, %v15078_v1  ;;  %vm15066_vm12 = vcmp.eq.s32.totalorder %v13169_v12, %v13393_v6  ;;  %vm411_vm15 = vcmp.eq.s32.totalorder %v13147_v2, %v403_v21 }
  0x36   : > { %12604 = vmatprep.subr.bf16.mxu1 %v12603_v52  ;;  %15153 = vst [vmem:[#allocation6_spill] sm:$0xff] %v13413_v30  ;;  %v13433_v36 = vsel %vm15084_vm7, 1.0, %v15078_v1  ;;  %v12518_v39 = vsel %vm417_vm8, 1.0, %v15078_v1  ;;  %vm419_vm0 = vcmp.eq.s32.totalorder %v13169_v12, %v403_v21  ;;  %v12587_v43 = vpack.c.bf16 %v567_v22, %v555_v20 }
  0x37   : > { %639 = vmatmul.mubr.f32.vlgmr.msra.gmra.mrb[0].mxu0 %v13180_v18  ;;  %v13446_v46 = vsel %vm15067_vm11, 1.0, %v15078_v1  ;;  %v12512_v51 = vsel %vm411_vm15, 1.0, %v15078_v1  ;;  %v255_v52 = vrot.slane %v13363_v29, %v238_v13  ;;  %v13453_v53 = vsub.f32 %v13421_v34, %v12510_v35 }
  0x38   : > { %1130 = vmatmul.mubr.f32.vlgmr.msra.gmra.mrb[0].mxu1 %v13180_v18  ;;  %12582 = vmatpush1.bf16.msra.mxu0 %v12581_v5  ;;  %v13459_v54 = vsel %vm15066_vm12, 1.0, %v15078_v1  ;;  %v12520_v55 = vsel %vm419_vm0, 1.0, %v15078_v1  ;;  %vm15083_vm4 = vcmp.eq.s32.totalorder %v13147_v2, %v13413_v30  ;;  %v13465_v20 = vsub.f32 %v13433_v36, %v12518_v39 }
  0x39   : > { %12606 = vmatpush1.bf16.msra.mxu1 %v12605_v7  ;;  %717 = vmatprep.mubr.f32.mxu0 %v15078_v1  ;;  %vm15082_vm8 = vcmp.eq.s32.totalorder %v13169_v12, %v13413_v30  ;;  %v13473_v13 = vsel %vm15083_vm4, 1.0, %v15078_v1  ;;  %vm408_vm15 = vcmp.eq.s32.totalorder %v13147_v2, %v391_v31  ;;  %v13477_v22 = vsub.f32 %v13446_v46, %v12512_v51 }
  0x3a   : > { %1208 = vmatprep.mubr.f32.mxu1 %v15078_v1  ;;  %12584 = vmatprep.subr.bf16.mxu0 %v13243_v42  ;;  %v13483_v61 = vsel %vm15082_vm8, 1.0, %v15078_v1  ;;  %vm416_vm0 = vcmp.eq.s32.totalorder %v13169_v12, %v391_v31  ;;  %v12509_v4 = vsel %vm408_vm15, 1.0, %v15078_v1  ;;  %v12611_v5 = vpack.c.bf16 %v1058_v25, %v1046_v24 }
  0x3b   : > { %12608 = vmatprep.subr.bf16.mxu1 %v13281_v58  ;;  %v13493_v15 = vsub.f32 %v13459_v54, %v12520_v55  ;;  %v12517_v16 = vsel %vm416_vm0, 1.0, %v15078_v1  ;;  %v13499_v7 = vsub.f32 %v13473_v13, %v12509_v4  ;;  %v13507_v59 = vrot.slane %v255_v52, %v13162_v8 }
  0x3c   : > { %v13502_v21 = vsub.f32 %v13483_v61, %v12517_v16  ;;  %v367_v60 = vrot.slane %v13363_v29, %v350_v26  ;;  %v12589_v24 = vpack.c.bf16 %v573_v56, %v561_v32  ;;  %v1455_v25 = vand.u32 4294901760, %v13453_v53 }
  0x3d   : > { %15154 = vst [vmem:[#allocation7_spill] sm:$0xff] %v13507_v59  ;;  %v1459_v31 = vand.u32 4294901760, %v13465_v20  ;;  %v1946_v35 = vand.u32 4294901760, %v13477_v22  ;;  %v1950_v8 = vand.u32 4294901760, %v13493_v15  ;;  %vm15081_vm15 = vcmp.eq.s32.totalorder %v13147_v2, %v13507_v59 }
  0x3e   : > { %vm15080_vm0 = vcmp.eq.s32.totalorder %v13169_v12, %v13507_v59  ;;  %v399_v26 = vrot.slane %v367_v60, %v13165_v9  ;;  %v1457_v10 = vand.u32 4294901760, %v13499_v7  ;;  %v1461_v11 = vand.u32 4294901760, %v13502_v21 }
  0x3f   : > { %720 = vmatmul.mubr.f32.vlgmr.msra.gmra.mrb[0].mxu0 %v13250_v45  ;;  %v13532_v32 = vsel %vm15081_vm15, 1.0, %v15078_v1  ;;  %v13538_v56 = vsel %vm15080_vm0, 1.0, %v15078_v1  ;;  %v12613_v9 = vpack.c.bf16 %v1064_v62, %v1052_v57  ;;  %v13547_v29 = vsub.f32 %v13453_v53, %v1455_v25 }
  0x40   : > { %1211 = vmatmul.mubr.f32.vlgmr.msra.gmra.mrb[0].mxu1 %v13250_v45  ;;  %12586 = vmatpush1.bf16.msra.mxu0 %v13306_v3  ;;  %vm410_vm12 = vcmp.eq.s32.totalorder %v13147_v2, %v399_v26  ;;  %vm418_vm11 = vcmp.eq.s32.totalorder %v13169_v12, %v399_v26  ;;  %v13550_v39 = vsub.f32 %v13465_v20, %v1459_v31  ;;  %vm15090_vm0 = vcmp.lt.s32.totalorder %v13147_v2, 4 }
  0x41   : > { %12610 = vmatpush1.bf16.msra.mxu1 %v13346_v47  ;;  %794 = vmatprep.mubr.f32.mxu0 %v15078_v1  ;;  %v12519_v51 = vsel %vm418_vm11, 1.0, %v15078_v1  ;;  %v13556_v40 = vsub.f32 %v13477_v22, %v1946_v35  ;;  %v13559_v50 = vsub.f32 %v13493_v15, %v1950_v8  ;;  %v13565_v52 = vsub.f32 %v13499_v7, %v1457_v10 }
  0x42   : > { %1285 = vmatprep.mubr.f32.mxu1 %v15078_v1  ;;  %12588 = vmatprep.subr.bf16.mxu0 %v12587_v43  ;;  %v12511_v43 = vsel %vm410_vm12, 1.0, %v15078_v1  ;;  %v466_v62 = vsub.f32 %v13538_v56, %v12519_v51  ;;  %v13568_v53 = vsub.f32 %v13502_v21, %v1461_v11  ;;  %v15073_v22 = vand.u32 4294901760, %v13547_v29 }
  0x43   : > { %12612 = vmatprep.subr.bf16.mxu1 %v12611_v5  ;;  %v458_v57 = vsub.f32 %v13532_v32, %v12511_v43  ;;  %v15072_v4 = vand.u32 4294901760, %v13550_v39  ;;  %v15071_v16 = vand.u32 4294901760, %v13556_v40  ;;  %v15070_v7 = vand.u32 4294901760, %v13559_v50 }
  0x44   : > { %v1952_v20 = vand.u32 4294901760, %v466_v62  ;;  %v15069_v21 = vand.u32 4294901760, %v13565_v52  ;;  %v15068_v60 = vand.u32 4294901760, %v13568_v53  ;;  %v13586_v26 = vpack.c.bf16 %v1459_v31, %v1455_v25 }
  0x45   : > { %v1948_v55 = vand.u32 4294901760, %v458_v57  ;;  %v13595_v43 = vpack.c.bf16 %v1950_v8, %v1946_v35  ;;  %v2029_v51 = vsub.f32 %v13556_v40, %v15071_v16  ;;  %v2041_v25 = vsub.f32 %v13559_v50, %v15070_v7 }
  0x46   : > { %v13578_v15 = vsub.f32 %v466_v62, %v1952_v20  ;;  %v1544_v31 = vsub.f32 %v13565_v52, %v15069_v21  ;;  %v1556_v35 = vsub.f32 %v13568_v53, %v15068_v60  ;;  %v12621_v21 = vpack.c.bf16 %v1461_v11, %v1457_v10 }
  0x47   : > { %798 = vmatmul.mubr.f32.vlgmr.msra.gmra.mrb[0].mxu0 %v13316_v17  ;;  %v13576_v5 = vsub.f32 %v458_v57, %v1948_v55  ;;  %v2030_v60 = vand.u32 4294901760, %v2029_v51  ;;  %v12627_v10 = vpack.c.bf16 %v13550_v39, %v13547_v29  ;;  %v12651_v11 = vpack.c.bf16 %v13559_v50, %v13556_v40 }
  0x48   : > { %1289 = vmatmul.mubr.f32.vlgmr.msra.gmra.mrb[0].mxu1 %v13316_v17  ;;  %12590 = vmatpush1.bf16.msra.mxu0 %v12589_v24  ;;  %v15077_v24 = vand.u32 4294901760, %v13578_v15  ;;  %v1545_v7 = vand.u32 4294901760, %v1544_v31  ;;  %v1557_v16 = vand.u32 4294901760, %v1556_v35  ;;  %vm15095_vm11 = vcmask 39936  }
  0x49   : > { %12614 = vmatpush1.bf16.msra.mxu1 %v12613_v9  ;;  %880 = vmatprep.mubr.f32.mxu0 %v15078_v1  ;;  %v1550_v9 = vsub.f32 %v13550_v39, %v15072_v4  ;;  %v12645_v4 = vpack.c.bf16 %v1952_v20, %v1948_v55  ;;  %v12653_v55 = vpack.c.bf16 %v13578_v15, %v13576_v5  ;;  %vm15096_vm12 = vcmask 1044480  }
  0x4a   : > { %1371 = vmatprep.mubr.f32.mxu1 %v15078_v1  ;;  %12592 = vmatprep.subr.bf16.mxu0 %v13243_v42  ;;  %v15074_v42 = vand.u32 4294901760, %v13576_v5 }
  0x4b   : > { %12616 = vmatprep.subr.bf16.mxu1 %v13281_v58  ;;  %v1538_v58 = vsub.f32 %v13547_v29, %v15073_v22  ;;  %v1551_v62 = vand.u32 4294901760, %v1550_v9 }
  0x4c   : > { %v2035_v8 = vsub.f32 %v13576_v5, %v15074_v42 }
  0x4d   : > { %v1539_v57 = vand.u32 4294901760, %v1538_v58  ;;  %v15155_v58 = vmov 0.0  }
  0x4e   : > { %v2036_v22 = vand.u32 4294901760, %v2035_v8 }
  0x4f   : > { %882 = vmatmul.mubr.f32.vlgmr.msra.gmra.mrb[0].mxu0 %v13180_v18  ;;  %v12623_v59 = vpack.c.bf16 %v1551_v62, %v1539_v57 }
  0x50   : > { %1373 = vmatmul.mubr.f32.vlgmr.msra.gmra.mrb[0].mxu1 %v13180_v18  ;;  %12594 = vmatpush1.bf16.msra.mxu0 %v13306_v3  ;;  %v2047_v3 = vsub.f32 %v13578_v15, %v15077_v24 }
  0x51   : > { %12618 = vmatpush1.bf16.msra.mxu1 %v13346_v47  ;;  %956 = vmatprep.mubr.f32.mxu0 %v15078_v1  ;;  %v2042_v47 = vand.u32 4294901760, %v2041_v25 }
  0x52   : > { %1447 = vmatprep.mubr.f32.mxu1 %v15078_v1  ;;  %12620 = vmatprep.subr.bf16.mxu0 %v13586_v26  ;;  %v2048_v42 = vand.u32 4294901760, %v2047_v3  ;;  %v12625_v1 = vpack.c.bf16 %v1557_v16, %v1545_v7  ;;  %v15159_v16 = vand.u32 4294901760, %v13559_v50  ;;  %v15163_v50 = vand.u32 4294901760, %v13578_v15 }
  0x53   : > { %12644 = vmatprep.subr.bf16.mxu1 %v13595_v43  ;;  %v12647_v24 = vpack.c.bf16 %v2042_v47, %v2030_v60 }
  0x54   : > { %v12649_v9 = vpack.c.bf16 %v2048_v42, %v2036_v22  ;;  %v15158_v22 = vand.u32 4294901760, %v13556_v40  ;;  %v15162_v40 = vand.u32 4294901760, %v13576_v5 }
  0x56   : > { %v12659_v7 = vpack.c.bf16 %v15159_v16, %v15158_v22  ;;  %v12661_v42 = vpack.c.bf16 %v15163_v50, %v15162_v40 }
  0x57   : > { %958 = vmatmul.mubr.f32.vlgmr.msra.gmra.mrb[0].mxu0 %v13180_v18 }
  0x58   : > { %1449 = vmatmul.mubr.f32.vlgmr.msra.gmra.mrb[0].mxu1 %v13180_v18  ;;  %12622 = vmatpush1.bf16.msra.mxu0 %v12621_v21 }
  0x59   : > { %12646 = vmatpush1.bf16.msra.mxu1 %v12645_v4  ;;  %1523 = vmatprep.mubr.f32.mxu0 %v15155_v58 }
  0x5a   : > { %2014 = vmatprep.mubr.f32.mxu1 %v15155_v58  ;;  %12624 = vmatprep.subr.bf16.mxu0 %v12623_v59  ;;  %v12629_v59 = vpack.c.bf16 %v13568_v53, %v13565_v52 }
  0x5b   : > { %1529 = vmatmul.mubr.f32.vlgmr.msra.gmra.mrb[2].mxu0 %v13341_v41  ;;  %12648 = vmatprep.subr.bf16.mxu1 %v12647_v24 }
  0x5c   : > { %2020 = vmatmul.mubr.f32.vlgmr.msra.gmra.mrb[2].mxu1 %v13341_v41  ;;  %12626 = vmatpush1.bf16.msra.mxu0 %v12625_v1  ;;  %v15156_v1 = vand.u32 4294901760, %v13547_v29  ;;  %v15157_v41 = vand.u32 4294901760, %v13550_v39  ;;  %v15160_v29 = vand.u32 4294901760, %v13565_v52  ;;  %v15161_v39 = vand.u32 4294901760, %v13568_v53  ;;  %v2523_v52 = vld [vmem:[%s15064_s3 + $0x8] sm:$0x1f] }
  0x5d   : > { %12650 = vmatpush1.bf16.msra.mxu1 %v12649_v9  ;;  %1619 = vmatprep.mubr.f32.mxu0 %v15155_v58 }
  0x5e   : > { %2110 = vmatprep.mubr.f32.mxu1 %v15155_v58  ;;  %12628 = vmatprep.subr.bf16.mxu0 %v12627_v10  ;;  %v12635_v20 = vpack.c.bf16 %v15157_v41, %v15156_v1  ;;  %v12637_v60 = vpack.c.bf16 %v15161_v39, %v15160_v29 }
  0x5f   : > { %12652 = vmatprep.subr.bf16.mxu1 %v12651_v11 }
  0x63   : > { %1621 = vmatmul.mubr.f32.vlgmr.msra.gmra.mrb[2].mxu0 %v13180_v18 }
  0x64   : > { %2112 = vmatmul.mubr.f32.vlgmr.msra.gmra.mrb[2].mxu1 %v13180_v18  ;;  %12630 = vmatpush1.bf16.msra.mxu0 %v12629_v59 }
  0x65   : > { %12654 = vmatpush1.bf16.msra.mxu1 %v12653_v55  ;;  %1699 = vmatprep.mubr.f32.mxu0 %v15155_v58 }
  0x66   : > { %2190 = vmatprep.mubr.f32.mxu1 %v15155_v58  ;;  %12632 = vmatprep.subr.bf16.mxu0 %v13586_v26 }
  0x67   : > { %12656 = vmatprep.subr.bf16.mxu1 %v13595_v43 }
  0x6b   : > { %1702 = vmatmul.mubr.f32.vlgmr.msra.gmra.mrb[2].mxu0 %v13250_v45 }
  0x6c   : > { %2193 = vmatmul.mubr.f32.vlgmr.msra.gmra.mrb[2].mxu1 %v13250_v45  ;;  %12634 = vmatpush1.bf16.msra.mxu0 %v12621_v21  ;;  %v13097_v45 = vmov 0  }
  0x6d   : > { %12658 = vmatpush1.bf16.msra.mxu1 %v12645_v4  ;;  %1776 = vmatprep.mubr.f32.mxu0 %v15155_v58  ;;  %v13704_v31 = vsel %vm15090_vm0, 1, %v13097_v45 }
  0x6e   : > { %2267 = vmatprep.mubr.f32.mxu1 %v15155_v58  ;;  %12636 = vmatprep.subr.bf16.mxu0 %v12635_v20  ;;  %v10139_v50 = vrot.slane %v13704_v31, 1 }
  0x6f   : > { %12660 = vmatprep.subr.bf16.mxu1 %v12659_v7  ;;  %13022 = vset.pattern.permute.xlu0 %v13097_v45 }
  0x70   : > { %13023 = vset.pattern.permute.xlu1 %v13097_v45 }
  0x73   : > { %1780 = vmatmul.mubr.f32.vlgmr.msra.gmra.mrb[2].mxu0 %v13316_v17 }
  0x74   : > { %2271 = vmatmul.mubr.f32.vlgmr.msra.gmra.mrb[2].mxu1 %v13316_v17  ;;  %12638 = vmatpush1.bf16.msra.mxu0 %v12637_v60  ;;  %v2522_v17 = vld [vmem:[%s15064_s3] sm:$0x1f] }
  0x75   : > { %12662 = vmatpush1.bf16.msra.mxu1 %v12661_v42  ;;  %1862 = vmatprep.mubr.f32.mxu0 %v15155_v58 }
  0x76   : > { %2353 = vmatprep.mubr.f32.mxu1 %v15155_v58  ;;  %12640 = vmatprep.subr.bf16.mxu0 %v13586_v26 }
  0x77   : > { %12664 = vmatprep.subr.bf16.mxu1 %v13595_v43  ;;  %2528 = vperm.xlu0 %13022, %v2522_v17  }
  0x7b   : > { %1864 = vmatmul.mubr.f32.vlgmr.msra.gmra.mrb[2].mxu0 %v13180_v18  ;;  %4429 = vperm.xlu0 %13022, %v2523_v52  }
  0x7c   : > { %2355 = vmatmul.mubr.f32.vlgmr.msra.gmra.mrb[2].mxu1 %v13180_v18  ;;  %12642 = vmatpush1.bf16.msra.mxu0 %v12621_v21 }
  0x7d   : > { %12666 = vmatpush1.bf16.msra.mxu1 %v12645_v4  ;;  %1938 = vmatprep.mubr.f32.mxu0 %v15155_v58 }
  0x7e   : > { %2429 = vmatprep.mubr.f32.mxu1 %v15155_v58 }
  0x83   : > { %1940 = vmatmul.mubr.f32.vlgmr.msra.gmra.mrb[2].mxu0 %v13180_v18 }
  0x84   : > { %2431 = vmatmul.mubr.f32.vlgmr.msra.gmra.mrb[2].mxu1 %v13180_v18  ;;  %2625 = vmatprep.mubr.f32.mxu0 %v15155_v58  ;;  %v2518_v18 = vld [vmem:[%s15063_s2] sm:$0x1f] }
  0x85   : > { %3090 = vmatprep.mubr.f32.mxu1 %v15155_v58  ;;  %v2533_v53 = vsel %vm15095_vm11, %v2518_v18, 0 }
  0x86   : > { %v13688_v4 = vand.u32 4294901760, %v2533_v53 }
  0x88   : > { %v13691_v5 = vsub.f32 %v2533_v53, %v13688_v4 }
  0x8a   : > { %v13694_v15 = vand.u32 4294901760, %v13691_v5 }
  0x8c   : > { %v2629_v21 = vsub.f32 %v13691_v5, %v13694_v15 }
  0x8e   : > { %v13700_v25 = vand.u32 4294901760, %v2629_v21 }
 0x12a   : > { %v959_v24 = vpop.f32.mrb[0].mxu0 }
 0x12b   : > { %vm2437_vm15 = vcmp.eq.f32.partialorder %v959_v24, 0.0  ;;  %v2536_v26 = vsel %vm15096_vm12, %v959_v24, 0  ;;  %v1450_v43 = vpop.f32.mrb[0].mxu1  ;;  %v961_v51 = vpop.f32.mrb[1].mxu0 }
 0x12c   : > { %v2445_v35 = vsel %vm2437_vm15, 1.0, %v15155_v58  ;;  %v13707_v8 = vand.u32 4294901760, %v2536_v26  ;;  %vm2439_vm8 = vcmp.eq.f32.partialorder %v1450_v43, 0.0  ;;  %v2542_v3 = vsel %vm15096_vm12, %v1450_v43, 0  ;;  %v1452_v57 = vpop.f32.mrb[1].mxu1 }
 0x12d   : > { %v2454_v62 = vsel %vm15096_vm12, %v2445_v35, inf  ;;  %v2447_v47 = vsel %vm2439_vm8, 1.0, %v15155_v58  ;;  %v13712_v9 = vand.u32 4294901760, %v2542_v3  ;;  %vm2438_vm4 = vcmp.eq.f32.partialorder %v961_v51, 0.0 }
 0x12e   : > { %v2455_v10 = vrot.slane %v2454_v62, 4  ;;  %v13715_v11 = vsub.f32 %v2536_v26, %v13707_v8  ;;  %v2468_v59 = vsel %vm15096_vm12, %v2447_v47, inf  ;;  %v2446_v55 = vsel %vm2438_vm4, 1.0, %v15155_v58 }
 0x12f   : > { %v2469_v1 = vrot.slane %v2468_v59, 4  ;;  %v13720_v41 = vsub.f32 %v2542_v3, %v13712_v9  ;;  %v2461_v20 = vsel %vm15096_vm12, %v2446_v55, inf  ;;  %v2539_v22 = vsel %vm15096_vm12, %v961_v51, 0 }
 0x130   : > { %v2456_v16 = vmin.f32 %v2454_v62, %v2455_v10  ;;  %v2645_v7 = vand.u32 4294901760, %v13715_v11  ;;  %v2462_v29 = vrot.slane %v2461_v20, 4  ;;  %v13725_v39 = vand.u32 4294901760, %v2539_v22 }
 0x131   : > { %v2470_v60 = vmin.f32 %v2468_v59, %v2469_v1  ;;  %vm2440_vm8 = vcmp.eq.f32.partialorder %v1452_v57, 0.0  ;;  %v2545_v40 = vsel %vm15096_vm12, %v1452_v57, 0  ;;  %v3110_v45 = vand.u32 4294901760, %v13720_v41 }
 0x132   : > { %v2457_v42 = vrot.slane %v2456_v16, 2  ;;  %v2463_v17 = vmin.f32 %v2461_v20, %v2462_v29  ;;  %v13731_v52 = vsub.f32 %v2539_v22, %v13725_v39  ;;  %2560 = vmatprep.subr.mxu0 %v13725_v39  ;;  %v2646_v18 = vsub.f32 %v13715_v11, %v2645_v7 }
 0x133   : > { %v2471_v53 = vrot.slane %v2470_v60, 2  ;;  %v2448_v21 = vsel %vm2440_vm8, 1.0, %v15155_v58  ;;  %v13738_v24 = vand.u32 4294901760, %v2545_v40  ;;  %2562 = vmatpush1.msra.mxu0 %v13707_v8  ;;  %v10140_v47 = vrot.slane %v13704_v31, 2 }
 0x134   : > { %v2458_v26 = vmin.f32 %v2456_v16, %v2457_v42  ;;  %v2464_v43 = vrot.slane %v2463_v17, 2  ;;  %v2475_v51 = vsel %vm15096_vm12, %v2448_v21, inf  ;;  %2631 = vmatmul.mubr.f32.vlgmr.msra.gmra.mrb[4].mxu0 %v13700_v25  ;;  %v2639_v35 = vand.u32 4294901760, %v13731_v52 }
 0x135   : > { %v2472_v3 = vmin.f32 %v2470_v60, %v2471_v53  ;;  %v2476_v57 = vrot.slane %v2475_v51, 4  ;;  %v13745_v62 = vsub.f32 %v2545_v40, %v13738_v24  ;;  %3025 = vmatprep.subr.mxu1 %v13738_v24  ;;  %2711 = vmatprep.mubr.f32.mxu0 %v15155_v58  ;;  %v10141_v1 = vrot.slane %v13704_v31, 3 }
 0x136   : > { %v2459_v10 = vrot.slane %v2458_v26, 1  ;;  %v2465_v59 = vmin.f32 %v2463_v17, %v2464_v43  ;;  %3027 = vmatpush1.msra.mxu1 %v13712_v9  ;;  %v2640_v55 = vsub.f32 %v13731_v52, %v2639_v35  ;;  %vm13757_vm4 = vcmp.ne.s32.totalorder %v10139_v50, 0 }
 0x137   : > { %v2473_v20 = vrot.slane %v2472_v3, 1  ;;  %v2477_v22 = vmin.f32 %v2475_v51, %v2476_v57  ;;  %3096 = vmatmul.mubr.f32.vlgmr.msra.gmra.mrb[4].mxu1 %v13700_v25  ;;  %v3104_v16 = vand.u32 4294901760, %v13745_v62  ;;  %v3111_v40 = vsub.f32 %v13720_v41, %v3110_v45 }
 0x138   : > { %v13761_v60 = vmin.f32 %v2458_v26, %v2459_v10  ;;  %v2641_v42 = vand.u32 4294901760, %v2640_v55  ;;  %v2647_v17 = vand.u32 4294901760, %v2646_v18  ;;  %3176 = vmatprep.mubr.f32.mxu1 %v15155_v58  ;;  %v2466_v21 = vrot.slane %v2465_v59, 1 }
 0x139   : > { %v13767_v53 = vmin.f32 %v2472_v3, %v2473_v20  ;;  %v2478_v43 = vrot.slane %v2477_v22, 2  ;;  %v3105_v51 = vsub.f32 %v13745_v62, %v3104_v16  ;;  %vm13771_vm8 = vcmp.ne.s32.totalorder %v10140_v47, 0 }
 0x13a   : > { %vm15098_vm15 = vcmp.gt.f32.partialorder %v13761_v60, 0.0  ;;  %2642 = vmatprep.subr.mxu0 %v2641_v42  ;;  %vm13775_vm7 = vcmp.ne.s32.totalorder %v10141_v1, 0  ;;  %v3112_v3 = vand.u32 4294901760, %v3111_v40  ;;  %v13790_v10 = vmin.f32 %v2465_v59, %v2466_v21 }
 0x13b   : > { %v2479_v26 = vmin.f32 %v2477_v22, %v2478_v43  ;;  %v3106_v57 = vand.u32 4294901760, %v3105_v51  ;;  %2648 = vmatpush1.msra.mxu0 %v2647_v17  ;;  %vm13785_vm3 = vmand %vm15098_vm15, %vm13757_vm4  ;;  %vm15097_vm14 = vcmp.gt.f32.partialorder %v13767_v53, 0.0  ;;  %v15176_v20 = vmov 0 }
 0x13c   : > { %2713 = vmatmul.mubr.f32.vlgmr.msra.gmra.mrb[4].mxu0 %v13688_v4  ;;  %2721 = vmatprep.subr.mxu0 %v13731_v52  ;;  %vm13797_vm13 = vmand %vm15098_vm15, %vm13771_vm8  ;;  %vm15099_vm0 = vcmp.gt.f32.partialorder %v13790_v10, 0.0  ;;  %v15183_v40 = vmov 0  ;;  %v10142_v42 = vrot.slane %v13704_v31, 4  ;;  %v15186_v17 = vmov 0 }
 0x13d   : > { %v2480_v55 = vrot.slane %v2479_v26, 1  ;;  %3107 = vmatprep.subr.mxu1 %v3106_v57  ;;  %2724 = vmatpush1.msra.mxu0 %v13715_v11  ;;  %vm13806_vm6 = vmand %vm15098_vm15, %vm13775_vm7  ;;  %v15189_v31 = vmov 0  ;;  %v15192_v21 = vmov 0  ;;  %v15197_v52 = vmov 0 }
 0x13e   : > { %3113 = vmatpush1.msra.mxu1 %v3112_v3  ;;  %2797 = vmatprep.subr.mxu0 %v13725_v39  ;;  %vm13818_vm5 = vmand %vm15097_vm14, %vm13757_vm4  ;;  %v15203_v51 = vmov 0  ;;  %v15214_v57 = vmov 0  ;;  %v15218_v3 = vmov 0  ;;  %v15258_v29 = vmov 0 }
 0x13f   : > { %3178 = vmatmul.mubr.f32.vlgmr.msra.gmra.mrb[4].mxu1 %v13688_v4  ;;  %3186 = vmatprep.subr.mxu1 %v13745_v62  ;;  %v15177_v20 = vsel %vm13818_vm5, 4294967295, %v15176_v20  ;;  %v13823_v22 = vmin.f32 %v2479_v26, %v2480_v55  ;;  %vm13831_vm10 = vmand %vm15097_vm14, %vm13771_vm8  ;;  %v15180_v62 = vmov 0  ;;  %v15211_v26 = vmov 0 }
 0x140   : > { %3189 = vmatpush1.msra.mxu1 %v13720_v41  ;;  %2787 = vmatprep.mubr.f32.mxu0 %v15155_v58  ;;  %15178 = vst [vmem:[#allocation8_spill] sm:$0xff] %v15177_v20  ;;  %v15181_v62 = vsel %vm13831_vm10, 4294967295, %v15180_v62  ;;  %vm13839_vm9 = vmand %vm15097_vm14, %vm13775_vm7  ;;  %vm13877_vm14 = vcmp.ne.s32.totalorder %v10142_v42, 0  ;;  %v15262_v50 = vmov 0 }
 0x141   : > { %15179 = vst [vmem:[#allocation9_spill] sm:$0xff] %v13823_v22  ;;  %3262 = vmatprep.subr.mxu1 %v13738_v24  ;;  %3252 = vmatprep.mubr.f32.mxu1 %v15155_v58  ;;  %15182 = vst [vmem:[#allocation10_spill] sm:$0xff] %v15181_v62  ;;  %v15184_v40 = vsel %vm13839_vm9, 4294967295, %v15183_v40  ;;  %vm15100_vm1 = vcmp.gt.f32.partialorder %v13823_v22, 0.0 }
 0x142   : > { %15185 = vst [vmem:[#allocation11_spill] sm:$0xff] %v15184_v40  ;;  %vm13849_vm2 = vmand %vm15099_vm0, %vm13757_vm4 }
 0x143   : > { %v15187_v17 = vsel %vm13849_vm2, 4294967295, %v15186_v17  ;;  %vm13860_vm11 = vmand %vm15099_vm0, %vm13771_vm8 }
 0x144   : > { %2790 = vmatmul.mubr.f32.vlgmr.msra.gmra.mrb[4].mxu0 %v13691_v5  ;;  %15188 = vst [vmem:[#allocation12_spill] sm:$0xff] %v15187_v17  ;;  %v15190_v31 = vsel %vm13860_vm11, 4294967295, %v15189_v31  ;;  %vm13870_vm12 = vmand %vm15099_vm0, %vm13775_vm7 }
 0x145   : > { %2799 = vmatpush1.msra.mxu0 %v13707_v8  ;;  %2862 = vmatprep.mubr.f32.mxu0 %v15155_v58  ;;  %15191 = vst [vmem:[#allocation13_spill] sm:$0xff] %v15190_v31  ;;  %v15193_v21 = vsel %vm13870_vm12, 4294967295, %v15192_v21  ;;  %vm13885_vm15 = vmand %vm15100_vm1, %vm13757_vm4 }
 0x146   : > { %2875 = vmatprep.subr.mxu0 %v2639_v35  ;;  %15194 = vst [vmem:[#allocation14_spill] sm:$0xff] %v15193_v21  ;;  %v15198_v52 = vsel %vm13885_vm15, 4294967295, %v15197_v52  ;;  %vm13893_vm0 = vmand %vm15100_vm1, %vm13771_vm8  ;;  %v15200_v35 = vmov 0  ;;  %vm15206_vm15 = vcmp.gt.f32.partialorder %v13790_v10, 0.0 }
 0x147   : > { %3255 = vmatmul.mubr.f32.vlgmr.msra.gmra.mrb[4].mxu1 %v13691_v5  ;;  %15199 = vst [vmem:[#allocation15_spill] sm:$0xff] %v15198_v52  ;;  %v15201_v35 = vsel %vm13893_vm0, 4294967295, %v15200_v35  ;;  %vm13901_vm12 = vmand %vm15100_vm1, %vm13775_vm7  ;;  %vm15210_vm0 = vcmp.gt.f32.partialorder %v13761_v60, 0.0 }
 0x148   : > { %3264 = vmatpush1.msra.mxu1 %v13712_v9  ;;  %3327 = vmatprep.mubr.f32.mxu1 %v15155_v58  ;;  %15202 = vst [vmem:[#allocation16_spill] sm:$0xff] %v15201_v35  ;;  %v15204_v51 = vsel %vm13901_vm12, 4294967295, %v15203_v51  ;;  %vm13909_vm11 = vmand %vm15206_vm15, %vm13877_vm14 }
 0x149   : > { %3340 = vmatprep.subr.mxu1 %v3104_v16  ;;  %15205 = vst [vmem:[#allocation17_spill] sm:$0xff] %v15204_v51  ;;  %v15207_v16 = vmov 0  ;;  %vm13918_vm9 = vmand %vm15210_vm0, %vm13877_vm14  ;;  %vm15217_vm0 = vcmp.gt.f32.partialorder %v13767_v53, 0.0 }
 0x14a   : > { %v15208_v16 = vsel %vm13909_vm11, 4294967295, %v15207_v16  ;;  %v15212_v26 = vsel %vm13918_vm9, 4294967295, %v15211_v26  ;;  %vm13929_vm15 = vmand %vm15100_vm1, %vm13877_vm14  ;;  %vm15221_vm1 = vcmask 1044480  }
 0x14b   : > { %15209 = vst [vmem:[#allocation18_spill] sm:$0xff] %v15208_v16  ;;  %15213 = vst [vmem:[#allocation19_spill] sm:$0xff] %v15212_v26  ;;  %v15215_v57 = vsel %vm13929_vm15, 4294967295, %v15214_v57 }
 0x14c   : > { %2866 = vmatmul.mubr.f32.vlgmr.msra.gmra.mrb[4].mxu0 %v13694_v15  ;;  %15216 = vst [vmem:[#allocation20_spill] sm:$0xff] %v15215_v57  ;;  %vm13938_vm12 = vmand %vm15217_vm0, %vm13877_vm14 }
 0x14d   : > { %2879 = vmatpush1.msra.mxu0 %v2645_v7  ;;  %2942 = vmatprep.mubr.f32.mxu0 %v15155_v58  ;;  %v15219_v3 = vsel %vm13938_vm12, 4294967295, %v15218_v3  ;;  %vm15222_vm15 = vmmov %vm15221_vm1 }
 0x14e   : > { %2951 = vmatprep.subr.mxu0 %v13725_v39  ;;  %15220 = vst [vmem:[#allocation21_spill] sm:$0xff] %v15219_v3  ;;  %vm15223_vm9 = vmmov %vm15221_vm1 }
 0x14f   : > { %3331 = vmatmul.mubr.f32.vlgmr.msra.gmra.mrb[4].mxu1 %v13694_v15 }
 0x150   : > { %3344 = vmatpush1.msra.mxu1 %v3110_v45  ;;  %3407 = vmatprep.mubr.f32.mxu1 %v15155_v58 }
 0x151   : > { %3416 = vmatprep.subr.mxu1 %v13738_v24 }
 0x154   : > { %2944 = vmatmul.mubr.f32.vlgmr.msra.gmra.mrb[4].mxu0 %v13688_v4 }
 0x155   : > { %2953 = vmatpush1.msra.mxu0 %v13707_v8  ;;  %3016 = vmatprep.mubr.f32.mxu0 %v15155_v58 }
 0x156   : > { %v1941_v11 = vpop.f32.mrb[2].mxu0 }
 0x157   : > { %3409 = vmatmul.mubr.f32.vlgmr.msra.gmra.mrb[4].mxu1 %v13688_v4  ;;  %vm2441_vm0 = vcmp.eq.f32.partialorder %v1941_v11, 0.0  ;;  %v2548_v7 = vsel %vm15221_vm1, %v1941_v11, 0  ;;  %v2432_v39 = vpop.f32.mrb[2].mxu1  ;;  %v1943_v55 = vpop.f32.mrb[3].mxu0 }
 0x158   : > { %3418 = vmatpush1.msra.mxu1 %v13712_v9  ;;  %v2449_v41 = vsel %vm2441_vm0, 1.0, %v15155_v58  ;;  %v13954_v45 = vand.u32 4294901760, %v2548_v7  ;;  %vm2443_vm12 = vcmp.eq.f32.partialorder %v2432_v39, 0.0  ;;  %v2554_v24 = vsel %vm15222_vm15, %v2432_v39, 0  ;;  %v2434_v8 = vpop.f32.mrb[3].mxu1  ;;  %3481 = vmatprep.mubr.f32.mxu1 %v15155_v58  ;;  %vm15224_vm0 = vmmov %vm15223_vm9 }
 0x159   : > { %v2482_v42 = vsel %vm15223_vm9, %v2449_v41, inf  ;;  %v2451_v6 = vsel %vm2443_vm12, 1.0, %v15155_v58  ;;  %v13960_v30 = vand.u32 4294901760, %v2554_v24  ;;  %vm2442_vm1 = vcmp.eq.f32.partialorder %v1943_v55, 0.0  ;;  %vm15225_vm15 = vmmov %vm15224_vm0 }
 0x15a   : > { %v2483_v11 = vrot.slane %v2482_v42, 4  ;;  %v13963_v9 = vsub.f32 %v2548_v7, %v13954_v45  ;;  %v2496_v14 = vsel %vm15224_vm0, %v2451_v6, inf  ;;  %v2450_v44 = vsel %vm2442_vm1, 1.0, %v15155_v58  ;;  %vm15226_vm9 = vmmov %vm15224_vm0 }
 0x15b   : > { %v2497_v23 = vrot.slane %v2496_v14, 4  ;;  %v13968_v39 = vsub.f32 %v2554_v24, %v13960_v30  ;;  %v2489_v3 = vsel %vm15225_vm15, %v2450_v44, inf  ;;  %v2551_v41 = vsel %vm15226_vm9, %v1943_v55, 0  ;;  %vm15227_vm1 = vmmov %vm15224_vm0 }
 0x15c   : > { %v2484_v57 = vmin.f32 %v2482_v42, %v2483_v11  ;;  %v15117_v51 = vand.u32 4294901760, %v13963_v9  ;;  %v2490_v35 = vrot.slane %v2489_v3, 4  ;;  %v13973_v52 = vand.u32 4294901760, %v2551_v41  ;;  %3018 = vmatmul.mubr.f32.vlgmr.msra.gmra.mrb[4].mxu0 %v13688_v4 }
 0x15d   : > { %v2498_v7 = vmin.f32 %v2496_v14, %v2497_v23  ;;  %vm2444_vm12 = vcmp.eq.f32.partialorder %v2434_v8, 0.0  ;;  %v2557_v6 = vsel %vm15224_vm0, %v2434_v8, 0  ;;  %3555 = vmatprep.mubr.f32.mxu0 %v15155_v58  ;;  %v15265_v18 = vand.u32 4294901760, %v13963_v9 }
 0x15e   : > { %v2485_v24 = vrot.slane %v2484_v57, 2  ;;  %v2491_v44 = vmin.f32 %v2489_v3, %v2490_v35  ;;  %v13980_v55 = vsub.f32 %v2551_v41, %v13973_v52  ;;  %3490 = vmatprep.subr.mxu0 %v13973_v52  ;;  %v3576_v42 = vsub.f32 %v13963_v9, %v15117_v51 }
 0x15f   : > { %v2499_v11 = vrot.slane %v2498_v7, 2  ;;  %v2452_v23 = vsel %vm2444_vm12, 1.0, %v15155_v58  ;;  %v13987_v14 = vand.u32 4294901760, %v2557_v6  ;;  %3483 = vmatmul.mubr.f32.vlgmr.msra.gmra.mrb[4].mxu1 %v13688_v4  ;;  %3492 = vmatpush1.msra.mxu0 %v13954_v45 }
 0x160   : > { %v2486_v8 = vmin.f32 %v2484_v57, %v2485_v24  ;;  %v2492_v35 = vrot.slane %v2491_v44, 2  ;;  %v2503_v3 = vsel %vm15227_vm1, %v2452_v23, inf  ;;  %4020 = vmatprep.mubr.f32.mxu1 %v15155_v58  ;;  %3561 = vmatmul.mubr.f32.vlgmr.msra.gmra.mrb[6].mxu0 %v13700_v25  ;;  %v3569_v41 = vand.u32 4294901760, %v13980_v55 }
 0x161   : > { %v2500_v51 = vmin.f32 %v2498_v7, %v2499_v11  ;;  %v2504_v22 = vrot.slane %v2503_v3, 4  ;;  %v4033_v26 = vsub.f32 %v2557_v6, %v13987_v14  ;;  %3955 = vmatprep.subr.mxu1 %v13987_v14  ;;  %3641 = vmatprep.mubr.f32.mxu0 %v15155_v58  ;;  %v15228_v7 = vand.u32 4294901760, %v13968_v39 }
 0x162   : > { %v2487_v16 = vrot.slane %v2486_v8, 1  ;;  %v2493_v21 = vmin.f32 %v2491_v44, %v2492_v35  ;;  %3957 = vmatpush1.msra.mxu1 %v13960_v30  ;;  %v3570_v57 = vsub.f32 %v13980_v55, %v3569_v41  ;;  %v3577_v17 = vand.u32 4294901760, %v3576_v42 }
 0x163   : > { %v2501_v24 = vrot.slane %v2500_v51, 1  ;;  %v2505_v23 = vmin.f32 %v2503_v3, %v2504_v22  ;;  %4026 = vmatmul.mubr.f32.vlgmr.msra.gmra.mrb[6].mxu1 %v13700_v25  ;;  %v4034_v31 = vand.u32 4294901760, %v4033_v26  ;;  %v4041_v6 = vsub.f32 %v13968_v39, %v15228_v7 }
 0x164   : > { %v14001_v40 = vmin.f32 %v2486_v8, %v2487_v16  ;;  %v3571_v11 = vand.u32 4294901760, %v3570_v57  ;;  %4106 = vmatprep.mubr.f32.mxu1 %v15155_v58  ;;  %v2494_v35 = vrot.slane %v2493_v21, 1  ;;  %v15240_v8 = vmov 0 }
 0x165   : > { %v14007_v44 = vmin.f32 %v2500_v51, %v2501_v24  ;;  %v2506_v62 = vrot.slane %v2505_v23, 2  ;;  %v4035_v20 = vsub.f32 %v4033_v26, %v4034_v31  ;;  %v4042_v16 = vand.u32 4294901760, %v4041_v6 }
 0x166   : > { %vm15126_vm15 = vcmp.gt.f32.partialorder %v14001_v40, 0.0  ;;  %3572 = vmatprep.subr.mxu0 %v3571_v11  ;;  %v15229_v51 = vmov 0  ;;  %v14021_v42 = vmin.f32 %v2493_v21, %v2494_v35  ;;  %v15235_v21 = vmov 0 }
 0x167   : > { %v2507_v25 = vmin.f32 %v2505_v23, %v2506_v62  ;;  %v4036_v22 = vand.u32 4294901760, %v4035_v20  ;;  %3578 = vmatpush1.msra.mxu0 %v3577_v17  ;;  %vm14016_vm9 = vmand %vm15126_vm15, %vm13757_vm4  ;;  %vm15127_vm12 = vcmp.gt.f32.partialorder %v14007_v44, 0.0  ;;  %v15231_v20 = vmov 0 }
 0x168   : > { %3643 = vmatmul.mubr.f32.vlgmr.msra.gmra.mrb[6].mxu0 %v13688_v4  ;;  %3651 = vmatprep.subr.mxu0 %v13980_v55  ;;  %v15230_v51 = vsel %vm14016_vm9, 4294967295, %v15229_v51  ;;  %vm14028_vm0 = vmand %vm15126_vm15, %vm13771_vm8  ;;  %v15233_v17 = vmov 0  ;;  %v15244_v57 = vmov 0  ;;  %v15246_v24 = vmov 0 }
 0x169   : > { %v2508_v62 = vrot.slane %v2507_v25, 1  ;;  %4037 = vmatprep.subr.mxu1 %v4036_v22  ;;  %3654 = vmatpush1.msra.mxu0 %v13963_v9  ;;  %v15232_v20 = vsel %vm14028_vm0, 4294967295, %v15231_v20  ;;  %vm14037_vm1 = vmand %vm15126_vm15, %vm13775_vm7  ;;  %vm15128_vm15 = vcmp.gt.f32.partialorder %v14021_v42, 0.0  ;;  %v15251_v23 = vmov 0 }
 0x16a   : > { %4043 = vmatpush1.msra.mxu1 %v4042_v16  ;;  %3727 = vmatprep.subr.mxu0 %v13973_v52  ;;  %v15234_v17 = vsel %vm14037_vm1, 4294967295, %v15233_v17  ;;  %vm14048_vm0 = vmand %vm15127_vm12, %vm13757_vm4  ;;  %v15270_v7 = vmov 0  ;;  %v15273_v9 = vand.u32 4294901760, %v13968_v39 }
 0x16b   : > { %4108 = vmatmul.mubr.f32.vlgmr.msra.gmra.mrb[6].mxu1 %v13688_v4  ;;  %4116 = vmatprep.subr.mxu1 %v4033_v26  ;;  %v15236_v21 = vsel %vm14048_vm0, 4294967295, %v15235_v21  ;;  %v14053_v55 = vmin.f32 %v2507_v25, %v2508_v62  ;;  %vm14061_vm1 = vmand %vm15127_vm12, %vm13771_vm8  ;;  %v15238_v26 = vmov 0 }
 0x16c   : > { %4119 = vmatpush1.msra.mxu1 %v13968_v39  ;;  %3717 = vmatprep.mubr.f32.mxu0 %v15155_v58  ;;  %v15239_v26 = vsel %vm14061_vm1, 4294967295, %v15238_v26  ;;  %vm14069_vm0 = vmand %vm15127_vm12, %vm13775_vm7 }
 0x16d   : > { %15237 = vst [vmem:[#allocation22_spill] sm:$0xff] %v14053_v55  ;;  %4192 = vmatprep.subr.mxu1 %v13987_v14  ;;  %4182 = vmatprep.mubr.f32.mxu1 %v15155_v58  ;;  %v15241_v8 = vsel %vm14069_vm0, 4294967295, %v15240_v8  ;;  %vm14078_vm9 = vmand %vm15128_vm15, %vm13757_vm4  ;;  %vm15129_vm1 = vcmp.gt.f32.partialorder %v14053_v55, 0.0 }
 0x16e   : > { %vm14089_vm12 = vmand %vm15128_vm15, %vm13771_vm8 }
 0x16f   : > { %v15245_v57 = vsel %vm14089_vm12, 4294967295, %v15244_v57  ;;  %vm14097_vm0 = vmand %vm15128_vm15, %vm13775_vm7 }
 0x170   : > { %3720 = vmatmul.mubr.f32.vlgmr.msra.gmra.mrb[6].mxu0 %v13691_v5  ;;  %v15247_v24 = vsel %vm14097_vm0, 4294967295, %v15246_v24  ;;  %vm14108_vm12 = vmand %vm15129_vm1, %vm13757_vm4  ;;  %vm15257_vm4 = vcmp.gt.f32.partialorder %v14021_v42, 0.0 }
 0x171   : > { %3729 = vmatpush1.msra.mxu0 %v13954_v45  ;;  %3792 = vmatprep.mubr.f32.mxu0 %v15155_v58  ;;  %vm14116_vm15 = vmand %vm15129_vm1, %vm13771_vm8  ;;  %vm15261_vm8 = vcmp.gt.f32.partialorder %v14001_v40, 0.0 }
 0x172   : > { %3805 = vmatprep.subr.mxu0 %v3569_v41  ;;  %v15248_v41 = vmov 0  ;;  %v15252_v23 = vsel %vm14116_vm15, 4294967295, %v15251_v23  ;;  %vm14124_vm0 = vmand %vm15129_vm1, %vm13775_vm7 }
 0x173   : > { %4185 = vmatmul.mubr.f32.vlgmr.msra.gmra.mrb[6].mxu1 %v13691_v5  ;;  %v15249_v41 = vsel %vm14108_vm12, 4294967295, %v15248_v41  ;;  %15253 = vst [vmem:[#allocation24_spill] sm:$0xff] %v15252_v23  ;;  %v15254_v5 = vmov 0  ;;  %vm14132_vm12 = vmand %vm15257_vm4, %vm13877_vm14  ;;  %vm15269_vm4 = vcmp.gt.f32.partialorder %v14007_v44, 0.0 }
 0x174   : > { %4194 = vmatpush1.msra.mxu1 %v13960_v30  ;;  %4257 = vmatprep.mubr.f32.mxu1 %v15155_v58  ;;  %15250 = vst [vmem:[#allocation23_spill] sm:$0xff] %v15249_v41  ;;  %v15255_v5 = vsel %vm14124_vm0, 4294967295, %v15254_v5  ;;  %v15259_v29 = vsel %vm14132_vm12, 4294967295, %v15258_v29  ;;  %vm14141_vm15 = vmand %vm15261_vm8, %vm13877_vm14 }
 0x175   : > { %4270 = vmatprep.subr.mxu1 %v4034_v31  ;;  %15256 = vst [vmem:[#allocation25_spill] sm:$0xff] %v15255_v5  ;;  %15260 = vst [vmem:[#allocation26_spill] sm:$0xff] %v15259_v29  ;;  %v15263_v50 = vsel %vm14141_vm15, 4294967295, %v15262_v50  ;;  %v15266_v31 = vmov 0 }
 0x176   : > { %15264 = vst [vmem:[#allocation27_spill] sm:$0xff] %v15263_v50  ;;  %vm14152_vm7 = vmand %vm15129_vm1, %vm13877_vm14 }
 0x177   : > { %v15267_v31 = vsel %vm14152_vm7, 4294967295, %v15266_v31  ;;  %vm14161_vm8 = vmand %vm15269_vm4, %vm13877_vm14  ;;  %vm15274_vm14 = vcmask 39936   ;;  %vm15275_vm4 = vcmask 1044480   ;;  %vm15301_vm7 = vcmp.eq.s32.totalorder %v13169_v12, %v13218_v33 }
 0x178   : > { %3796 = vmatmul.mubr.f32.vlgmr.msra.gmra.mrb[6].mxu0 %v13694_v15  ;;  %15268 = vst [vmem:[#allocation28_spill] sm:$0xff] %v15267_v31  ;;  %v15271_v7 = vsel %vm14161_vm8, 4294967295, %v15270_v7  ;;  %vm15277_vm1 = vmmov %vm15275_vm4 }
 0x179   : > { %3809 = vmatpush1.msra.mxu0 %v15265_v18  ;;  %3872 = vmatprep.mubr.f32.mxu0 %v15155_v58  ;;  %15272 = vst [vmem:[#allocation29_spill] sm:$0xff] %v15271_v7  ;;  %vm15278_vm8 = vmmov %vm15277_vm1 }
 0x17a   : > { %3881 = vmatprep.subr.mxu0 %v13973_v52  ;;  %v14184_v52 = vpop.permute.xlu0 %2528 }
 0x17b   : > { %4261 = vmatmul.mubr.f32.vlgmr.msra.gmra.mrb[6].mxu1 %v13694_v15  ;;  %v2519_v15 = vld [vmem:[%s15063_s2 + $0x8] sm:$0x1f] }
 0x17c   : > { %4274 = vmatpush1.msra.mxu1 %v15273_v9  ;;  %4337 = vmatprep.mubr.f32.mxu1 %v15155_v58  ;;  %v4433_v43 = vsel %vm15274_vm14, %v2519_v15, 0  ;;  %vm15276_vm14 = vmmov %vm15275_vm4 }
 0x17d   : > { %4346 = vmatprep.subr.mxu1 %v13987_v14 }
 0x180   : > { %3874 = vmatmul.mubr.f32.vlgmr.msra.gmra.mrb[6].mxu0 %v13688_v4 }
 0x181   : > { %3883 = vmatpush1.msra.mxu0 %v13954_v45  ;;  %3946 = vmatprep.mubr.f32.mxu0 %v15155_v58 }
 0x183   : > { %4339 = vmatmul.mubr.f32.vlgmr.msra.gmra.mrb[6].mxu1 %v13688_v4 }
 0x184   : > { %4348 = vmatpush1.msra.mxu1 %v13960_v30  ;;  %4411 = vmatprep.mubr.f32.mxu1 %v15155_v58  ;;  %v14186_v30 = vand.u32 4294901760, %v4433_v43 }
 0x186   : > { %v14192_v25 = vsub.f32 %v4433_v43, %v14186_v30 }
 0x188   : > { %3948 = vmatmul.mubr.f32.vlgmr.msra.gmra.mrb[6].mxu0 %v13688_v4  ;;  %v14196_v16 = vand.u32 4294901760, %v14192_v25 }
 0x189   : > { %4525 = vmatprep.mubr.f32.mxu0 %v15155_v58 }
 0x18a   : > { %v4529_v62 = vsub.f32 %v14192_v25, %v14196_v16 }
 0x18b   : > { %4413 = vmatmul.mubr.f32.vlgmr.msra.gmra.mrb[6].mxu1 %v13688_v4 }
 0x18c   : > { %4990 = vmatprep.mubr.f32.mxu1 %v15155_v58 }
 0x22f   : > { %v3019_v45 = vpop.f32.mrb[4].mxu0 }
 0x230   : > { %v12763_v39 = vadd.f32 %v3019_v45, %v14184_v52  ;;  %v3021_v14 = vpop.f32.mrb[5].mxu0 }
 0x231   : > { %v12764_v6 = vadd.f32 %v3021_v14, %v14184_v52 }
 0x232   : > { %13024 = vtanh.f32 %v12763_v39  ;;  %v3484_v4 = vpop.f32.mrb[4].mxu1 }
 0x233   : > { %v12765_v11 = vadd.f32 %v3484_v4, %v14184_v52  ;;  %13026 = vtanh.f32 %v12764_v6  ;;  %v3486_v35 = vpop.f32.mrb[5].mxu1  ;;  %v14204_v6 = vand.u32 4294901760, %v4529_v62 }
 0x234   : > { %v12766_v22 = vadd.f32 %v3486_v35, %v14184_v52 }
 0x235   : > { %13028 = vtanh.f32 %v12765_v11 }
 0x236   : > { %13030 = vtanh.f32 %v12766_v22 }
 0x23c   : > { %v13025_v18 = vpop.eup %13024 }
 0x23d   : > { %v13027_v9 = vpop.eup %13026  ;;  %v4436_v15 = vsel %vm15275_vm4, %v13025_v18, 0  ;;  %vm15280_vm4 = vmmov %vm15277_vm1 }
 0x23e   : > { %v4439_v45 = vsel %vm15276_vm14, %v13027_v9, 0  ;;  %v14202_v39 = vand.u32 4294901760, %v4436_v15  ;;  %vm15281_vm14 = vmmov %vm15277_vm1 }
 0x23f   : > { %v13029_v43 = vpop.eup %13028  ;;  %v4459_v14 = vand.u32 4294901760, %v4439_v45 }
 0x240   : > { %v13031_v4 = vpop.eup %13030  ;;  %v4544_v11 = vsub.f32 %v4436_v15, %v14202_v39  ;;  %v4442_v35 = vsel %vm15277_vm1, %v13029_v43, 0 }
 0x241   : > { %4460 = vmatprep.subr.mxu0 %v4459_v14  ;;  %v4445_v22 = vsel %vm15278_vm8, %v13031_v4, 0  ;;  %v14209_v7 = vand.u32 4294901760, %v4442_v35  ;;  %v4538_v31 = vsub.f32 %v4439_v45, %v4459_v14  ;;  %vm15279_vm8 = vmmov %vm15277_vm1 }
 0x242   : > { %v4924_v18 = vand.u32 4294901760, %v4445_v22  ;;  %4462 = vmatpush1.msra.mxu0 %v14202_v39  ;;  %v4545_v9 = vand.u32 4294901760, %v4544_v11 }
 0x243   : > { %v5009_v5 = vsub.f32 %v4442_v35, %v14209_v7  ;;  %4531 = vmatmul.mubr.f32.vlgmr.msra.gmra.mrb[8].mxu0 %v14204_v6  ;;  %v4539_v62 = vand.u32 4294901760, %v4538_v31 }
 0x244   : > { %4925 = vmatprep.subr.mxu1 %v4924_v18  ;;  %v5003_v23 = vsub.f32 %v4445_v22, %v4924_v18  ;;  %v4546_v15 = vsub.f32 %v4544_v11, %v4545_v9  ;;  %4611 = vmatprep.mubr.f32.mxu0 %v15155_v58 }
 0x245   : > { %4927 = vmatpush1.msra.mxu1 %v14209_v7  ;;  %v4540_v43 = vsub.f32 %v4538_v31, %v4539_v62  ;;  %v5010_v4 = vand.u32 4294901760, %v5009_v5 }
 0x246   : > { %4996 = vmatmul.mubr.f32.vlgmr.msra.gmra.mrb[8].mxu1 %v14204_v6  ;;  %v5004_v45 = vand.u32 4294901760, %v5003_v23  ;;  %v4547_v50 = vand.u32 4294901760, %v4546_v15 }
 0x247   : > { %v4541_v41 = vand.u32 4294901760, %v4540_v43  ;;  %v5011_v55 = vsub.f32 %v5009_v5, %v5010_v4  ;;  %5076 = vmatprep.mubr.f32.mxu1 %v15155_v58 }
 0x248   : > { %v5005_v35 = vsub.f32 %v5003_v23, %v5004_v45 }
 0x249   : > { %4542 = vmatprep.subr.mxu0 %v4541_v41  ;;  %v5012_v22 = vand.u32 4294901760, %v5011_v55 }
 0x24a   : > { %v5006_v29 = vand.u32 4294901760, %v5005_v35  ;;  %4548 = vmatpush1.msra.mxu0 %v4547_v50 }
 0x24b   : > { %4613 = vmatmul.mubr.f32.vlgmr.msra.gmra.mrb[8].mxu0 %v14186_v30  ;;  %4621 = vmatprep.subr.mxu0 %v4538_v31 }
 0x24c   : > { %5007 = vmatprep.subr.mxu1 %v5006_v29  ;;  %4624 = vmatpush1.msra.mxu0 %v4544_v11 }
 0x24d   : > { %5013 = vmatpush1.msra.mxu1 %v5012_v22  ;;  %4697 = vmatprep.subr.mxu0 %v4459_v14 }
 0x24e   : > { %5078 = vmatmul.mubr.f32.vlgmr.msra.gmra.mrb[8].mxu1 %v14186_v30  ;;  %5086 = vmatprep.subr.mxu1 %v5003_v23 }
 0x24f   : > { %5089 = vmatpush1.msra.mxu1 %v5009_v5  ;;  %4687 = vmatprep.mubr.f32.mxu0 %v15155_v58 }
 0x250   : > { %5162 = vmatprep.subr.mxu1 %v4924_v18  ;;  %5152 = vmatprep.mubr.f32.mxu1 %v15155_v58 }
 0x253   : > { %4690 = vmatmul.mubr.f32.vlgmr.msra.gmra.mrb[8].mxu0 %v14192_v25 }
 0x254   : > { %4699 = vmatpush1.msra.mxu0 %v14202_v39  ;;  %4762 = vmatprep.mubr.f32.mxu0 %v15155_v58 }
 0x255   : > { %4775 = vmatprep.subr.mxu0 %v4539_v62 }
 0x256   : > { %5155 = vmatmul.mubr.f32.vlgmr.msra.gmra.mrb[8].mxu1 %v14192_v25 }
 0x257   : > { %5164 = vmatpush1.msra.mxu1 %v14209_v7  ;;  %5227 = vmatprep.mubr.f32.mxu1 %v15155_v58 }
 0x258   : > { %5240 = vmatprep.subr.mxu1 %v5004_v45 }
 0x25b   : > { %v3949_v55 = vpop.f32.mrb[6].mxu0  ;;  %4766 = vmatmul.mubr.f32.vlgmr.msra.gmra.mrb[8].mxu0 %v14196_v16 }
 0x25c   : > { %v12767_v41 = vadd.f32 %v3949_v55, %v14184_v52  ;;  %4779 = vmatpush1.msra.mxu0 %v4545_v9  ;;  %v3951_v23 = vpop.f32.mrb[7].mxu0  ;;  %4842 = vmatprep.mubr.f32.mxu0 %v15155_v58 }
 0x25d   : > { %v12768_v5 = vadd.f32 %v3951_v23, %v14184_v52  ;;  %4851 = vmatprep.subr.mxu0 %v4459_v14 }
 0x25e   : > { %13032 = vtanh.f32 %v12767_v41  ;;  %v4414_v29 = vpop.f32.mrb[6].mxu1  ;;  %5231 = vmatmul.mubr.f32.vlgmr.msra.gmra.mrb[8].mxu1 %v14196_v16 }
 0x25f   : > { %v12769_v50 = vadd.f32 %v4414_v29, %v14184_v52  ;;  %5244 = vmatpush1.msra.mxu1 %v5010_v4  ;;  %13034 = vtanh.f32 %v12768_v5  ;;  %v4416_v31 = vpop.f32.mrb[7].mxu1  ;;  %5307 = vmatprep.mubr.f32.mxu1 %v15155_v58 }
 0x260   : > { %v12770_v11 = vadd.f32 %v4416_v31, %v14184_v52  ;;  %5316 = vmatprep.subr.mxu1 %v4924_v18 }
 0x261   : > { %13036 = vtanh.f32 %v12769_v50 }
 0x262   : > { %13038 = vtanh.f32 %v12770_v11 }
 0x263   : > { %4844 = vmatmul.mubr.f32.vlgmr.msra.gmra.mrb[8].mxu0 %v14186_v30 }
 0x264   : > { %4853 = vmatpush1.msra.mxu0 %v14202_v39  ;;  %4916 = vmatprep.mubr.f32.mxu0 %v15155_v58 }
 0x266   : > { %5309 = vmatmul.mubr.f32.vlgmr.msra.gmra.mrb[8].mxu1 %v14186_v30 }
 0x267   : > { %5318 = vmatpush1.msra.mxu1 %v14209_v7  ;;  %5381 = vmatprep.mubr.f32.mxu1 %v15155_v58 }
 0x268   : > { %v13033_v14 = vpop.eup %13032 }
 0x269   : > { %v13035_v9 = vpop.eup %13034  ;;  %v4448_v62 = vsel %vm15277_vm1, %v13033_v14, 0  ;;  %vm15282_vm1 = vcmask 39936  }
 0x26a   : > { %v4451_v52 = vsel %vm15279_vm8, %v13035_v9, 0  ;;  %v14244_v18 = vand.u32 4294901760, %v4448_v62  ;;  %vm15283_vm8 = vmmov %vm15280_vm4 }
 0x26b   : > { %v13037_v15 = vpop.eup %13036  ;;  %4918 = vmatmul.mubr.f32.vlgmr.msra.gmra.mrb[8].mxu0 %v14186_v30  ;;  %v5389_v39 = vand.u32 4294901760, %v4451_v52 }
 0x26c   : > { %v13039_v43 = vpop.eup %13038  ;;  %v5474_v4 = vsub.f32 %v4448_v62, %v14244_v18  ;;  %5455 = vmatprep.mubr.f32.mxu0 %v15155_v58  ;;  %v4454_v7 = vsel %vm15280_vm4, %v13037_v15, 0 }
 0x26d   : > { %5390 = vmatprep.subr.mxu0 %v5389_v39  ;;  %v4457_v45 = vsel %vm15281_vm14, %v13039_v43, 0  ;;  %v5856_v35 = vand.u32 4294901760, %v4454_v7  ;;  %v5468_v22 = vsub.f32 %v4451_v52, %v5389_v39  ;;  %vm15284_vm14 = vmmov %vm15280_vm4 }
 0x26e   : > { %5383 = vmatmul.mubr.f32.vlgmr.msra.gmra.mrb[8].mxu1 %v14186_v30  ;;  %v5854_v55 = vand.u32 4294901760, %v4457_v45  ;;  %5392 = vmatpush1.msra.mxu0 %v14244_v18  ;;  %v5475_v41 = vand.u32 4294901760, %v5474_v4 }
 0x26f   : > { %v5939_v23 = vsub.f32 %v4454_v7, %v5856_v35  ;;  %5920 = vmatprep.mubr.f32.mxu1 %v15155_v58  ;;  %5461 = vmatmul.mubr.f32.vlgmr.msra.gmra.mrb[10].mxu0 %v14204_v6  ;;  %v5469_v5 = vand.u32 4294901760, %v5468_v22 }
 0x270   : > { %5855 = vmatprep.subr.mxu1 %v5854_v55  ;;  %v5933_v29 = vsub.f32 %v4457_v45, %v5854_v55  ;;  %v5476_v50 = vsub.f32 %v5474_v4, %v5475_v41  ;;  %5541 = vmatprep.mubr.f32.mxu0 %v15155_v58 }
 0x271   : > { %5857 = vmatpush1.msra.mxu1 %v5856_v35  ;;  %v5470_v31 = vsub.f32 %v5468_v22, %v5469_v5  ;;  %v5940_v11 = vand.u32 4294901760, %v5939_v23 }
 0x272   : > { %5926 = vmatmul.mubr.f32.vlgmr.msra.gmra.mrb[10].mxu1 %v14204_v6  ;;  %v5934_v14 = vand.u32 4294901760, %v5933_v29  ;;  %v5477_v15 = vand.u32 4294901760, %v5476_v50  ;;  %v2520_v6 = vld [vmem:[%s15063_s2 + $0x10] sm:$0x1f] }
 0x273   : > { %v5471_v9 = vand.u32 4294901760, %v5470_v31  ;;  %v5941_v62 = vsub.f32 %v5939_v23, %v5940_v11  ;;  %6006 = vmatprep.mubr.f32.mxu1 %v15155_v58 }
 0x274   : > { %v5935_v52 = vsub.f32 %v5933_v29, %v5934_v14 }
 0x275   : > { %5472 = vmatprep.subr.mxu0 %v5471_v9  ;;  %v5942_v7 = vand.u32 4294901760, %v5941_v62 }
 0x276   : > { %v5936_v43 = vand.u32 4294901760, %v5935_v52  ;;  %5478 = vmatpush1.msra.mxu0 %v5477_v15 }
 0x277   : > { %5543 = vmatmul.mubr.f32.vlgmr.msra.gmra.mrb[10].mxu0 %v14186_v30  ;;  %5551 = vmatprep.subr.mxu0 %v5468_v22 }
 0x278   : > { %5937 = vmatprep.subr.mxu1 %v5936_v43  ;;  %5554 = vmatpush1.msra.mxu0 %v5474_v4 }
 0x279   : > { %5943 = vmatpush1.msra.mxu1 %v5942_v7  ;;  %5627 = vmatprep.subr.mxu0 %v5389_v39 }
 0x27a   : > { %6008 = vmatmul.mubr.f32.vlgmr.msra.gmra.mrb[10].mxu1 %v14186_v30  ;;  %6016 = vmatprep.subr.mxu1 %v5933_v29 }
 0x27b   : > { %6019 = vmatpush1.msra.mxu1 %v5939_v23  ;;  %5617 = vmatprep.mubr.f32.mxu0 %v15155_v58 }
 0x27c   : > { %6092 = vmatprep.subr.mxu1 %v5854_v55  ;;  %6082 = vmatprep.mubr.f32.mxu1 %v15155_v58 }
 0x27f   : > { %5620 = vmatmul.mubr.f32.vlgmr.msra.gmra.mrb[10].mxu0 %v14192_v25 }
 0x280   : > { %5629 = vmatpush1.msra.mxu0 %v14244_v18  ;;  %5692 = vmatprep.mubr.f32.mxu0 %v15155_v58 }
 0x281   : > { %5705 = vmatprep.subr.mxu0 %v5469_v5 }
 0x282   : > { %6085 = vmatmul.mubr.f32.vlgmr.msra.gmra.mrb[10].mxu1 %v14192_v25  ;;  %v2524_v25 = vld [vmem:[%s15064_s3 + $0x10] sm:$0x1f] }
 0x283   : > { %6094 = vmatpush1.msra.mxu1 %v5856_v35  ;;  %6157 = vmatprep.mubr.f32.mxu1 %v15155_v58 }
 0x284   : > { %6170 = vmatprep.subr.mxu1 %v5934_v14  ;;  %6329 = vperm.xlu1 %13023, %v2524_v25  }
 0x287   : > { %5696 = vmatmul.mubr.f32.vlgmr.msra.gmra.mrb[10].mxu0 %v14196_v16 }
 0x288   : > { %5709 = vmatpush1.msra.mxu0 %v5475_v41  ;;  %5772 = vmatprep.mubr.f32.mxu0 %v15155_v58 }
 0x289   : > { %5781 = vmatprep.subr.mxu0 %v5389_v39  ;;  %v14290_v39 = vpop.permute.xlu0 %4429 }
 0x28a   : > { %6161 = vmatmul.mubr.f32.vlgmr.msra.gmra.mrb[10].mxu1 %v14196_v16  ;;  %v2525_v16 = vld [vmem:[%s15064_s3 + $0x18] sm:$0x1f] }
 0x28b   : > { %6174 = vmatpush1.msra.mxu1 %v5940_v11  ;;  %6237 = vmatprep.mubr.f32.mxu1 %v15155_v58 }
 0x28c   : > { %6246 = vmatprep.subr.mxu1 %v5854_v55  ;;  %8229 = vperm.xlu1 %13023, %v2525_v16  }
 0x28f   : > { %5774 = vmatmul.mubr.f32.vlgmr.msra.gmra.mrb[10].mxu0 %v14186_v30 }
 0x290   : > { %5783 = vmatpush1.msra.mxu0 %v14244_v18  ;;  %5846 = vmatprep.mubr.f32.mxu0 %v15155_v58  ;;  %v6333_v18 = vsel %vm15282_vm1, %v2520_v6, 0  ;;  %vm15285_vm1 = vmmov %vm15280_vm4 }
 0x291   : > { %v14292_v4 = vand.u32 4294901760, %v6333_v18 }
 0x292   : > { %6239 = vmatmul.mubr.f32.vlgmr.msra.gmra.mrb[10].mxu1 %v14186_v30 }
 0x293   : > { %6248 = vmatpush1.msra.mxu1 %v5856_v35  ;;  %6311 = vmatprep.mubr.f32.mxu1 %v15155_v58  ;;  %v14298_v5 = vsub.f32 %v6333_v18, %v14292_v4 }
 0x295   : > { %v14302_v50 = vand.u32 4294901760, %v14298_v5 }
 0x297   : > { %5848 = vmatmul.mubr.f32.vlgmr.msra.gmra.mrb[10].mxu0 %v14186_v30  ;;  %v6429_v31 = vsub.f32 %v14298_v5, %v14302_v50 }
 0x298   : > { %6425 = vmatprep.mubr.f32.mxu0 %v15155_v58 }
 0x299   : > { %v14310_v7 = vand.u32 4294901760, %v6429_v31 }
 0x29a   : > { %6313 = vmatmul.mubr.f32.vlgmr.msra.gmra.mrb[10].mxu1 %v14186_v30 }
 0x29b   : > { %6890 = vmatprep.mubr.f32.mxu1 %v15155_v58 }
 0x33e   : > { %v4919_v30 = vpop.f32.mrb[8].mxu0 }
 0x33f   : > { %v12771_v45 = vadd.f32 %v4919_v30, %v14290_v39  ;;  %v4921_v35 = vpop.f32.mrb[9].mxu0 }
 0x340   : > { %v12772_v22 = vadd.f32 %v4921_v35, %v14290_v39 }
 0x341   : > { %13040 = vtanh.f32 %v12771_v45  ;;  %v5384_v55 = vpop.f32.mrb[8].mxu1 }
 0x342   : > { %v12773_v41 = vadd.f32 %v5384_v55, %v14290_v39  ;;  %13042 = vtanh.f32 %v12772_v22  ;;  %v5386_v23 = vpop.f32.mrb[9].mxu1 }
 0x343   : > { %v12774_v29 = vadd.f32 %v5386_v23, %v14290_v39 }
 0x344   : > { %13044 = vtanh.f32 %v12773_v41 }
 0x345   : > { %13046 = vtanh.f32 %v12774_v29 }
 0x34b   : > { %v13041_v11 = vpop.eup %13040 }
 0x34c   : > { %v13043_v14 = vpop.eup %13042  ;;  %v6336_v9 = vsel %vm15283_vm8, %v13041_v11, 0  ;;  %vm15286_vm8 = vmmov %vm15285_vm1 }
 0x34d   : > { %v6339_v62 = vsel %vm15280_vm4, %v13043_v14, 0  ;;  %v14308_v52 = vand.u32 4294901760, %v6336_v9  ;;  %vm15287_vm4 = vmmov %vm15285_vm1 }
 0x34e   : > { %v13045_v15 = vpop.eup %13044  ;;  %v6359_v43 = vand.u32 4294901760, %v6339_v62 }
 0x34f   : > { %v13047_v25 = vpop.eup %13046  ;;  %v6444_v16 = vsub.f32 %v6336_v9, %v14308_v52  ;;  %v6342_v6 = vsel %vm15284_vm14, %v13045_v15, 0  ;;  %vm15288_vm14 = vmmov %vm15285_vm1 }
 0x350   : > { %6360 = vmatprep.subr.mxu0 %v6359_v43  ;;  %v6345_v18 = vsel %vm15285_vm1, %v13047_v25, 0  ;;  %v14315_v30 = vand.u32 4294901760, %v6342_v6  ;;  %v6438_v45 = vsub.f32 %v6339_v62, %v6359_v43 }
 0x351   : > { %v6824_v35 = vand.u32 4294901760, %v6345_v18  ;;  %6362 = vmatpush1.msra.mxu0 %v14308_v52  ;;  %v6445_v22 = vand.u32 4294901760, %v6444_v16 }
 0x352   : > { %v6909_v55 = vsub.f32 %v6342_v6, %v14315_v30  ;;  %6431 = vmatmul.mubr.f32.vlgmr.msra.gmra.mrb[12].mxu0 %v14310_v7  ;;  %v6439_v41 = vand.u32 4294901760, %v6438_v45 }
 0x353   : > { %6825 = vmatprep.subr.mxu1 %v6824_v35  ;;  %v6903_v23 = vsub.f32 %v6345_v18, %v6824_v35  ;;  %v6446_v29 = vsub.f32 %v6444_v16, %v6445_v22  ;;  %6511 = vmatprep.mubr.f32.mxu0 %v15155_v58 }
 0x354   : > { %6827 = vmatpush1.msra.mxu1 %v14315_v30  ;;  %v6440_v31 = vsub.f32 %v6438_v45, %v6439_v41  ;;  %v6910_v11 = vand.u32 4294901760, %v6909_v55 }
 0x355   : > { %6896 = vmatmul.mubr.f32.vlgmr.msra.gmra.mrb[12].mxu1 %v14310_v7  ;;  %v6904_v14 = vand.u32 4294901760, %v6903_v23  ;;  %v6447_v25 = vand.u32 4294901760, %v6446_v29 }
 0x356   : > { %v6441_v9 = vand.u32 4294901760, %v6440_v31  ;;  %v6911_v62 = vsub.f32 %v6909_v55, %v6910_v11  ;;  %6976 = vmatprep.mubr.f32.mxu1 %v15155_v58 }
 0x357   : > { %v6905_v15 = vsub.f32 %v6903_v23, %v6904_v14 }
 0x358   : > { %6442 = vmatprep.subr.mxu0 %v6441_v9  ;;  %v6912_v18 = vand.u32 4294901760, %v6911_v62 }
 0x359   : > { %v6906_v6 = vand.u32 4294901760, %v6905_v15  ;;  %6448 = vmatpush1.msra.mxu0 %v6447_v25 }
 0x35a   : > { %6513 = vmatmul.mubr.f32.vlgmr.msra.gmra.mrb[12].mxu0 %v14292_v4  ;;  %6521 = vmatprep.subr.mxu0 %v6438_v45 }
 0x35b   : > { %6907 = vmatprep.subr.mxu1 %v6906_v6  ;;  %6524 = vmatpush1.msra.mxu0 %v6444_v16 }
 0x35c   : > { %6913 = vmatpush1.msra.mxu1 %v6912_v18  ;;  %6597 = vmatprep.subr.mxu0 %v6359_v43 }
 0x35d   : > { %6978 = vmatmul.mubr.f32.vlgmr.msra.gmra.mrb[12].mxu1 %v14292_v4  ;;  %6986 = vmatprep.subr.mxu1 %v6903_v23 }
 0x35e   : > { %6989 = vmatpush1.msra.mxu1 %v6909_v55  ;;  %6587 = vmatprep.mubr.f32.mxu0 %v15155_v58 }
 0x35f   : > { %7062 = vmatprep.subr.mxu1 %v6824_v35  ;;  %7052 = vmatprep.mubr.f32.mxu1 %v15155_v58 }
 0x362   : > { %6590 = vmatmul.mubr.f32.vlgmr.msra.gmra.mrb[12].mxu0 %v14298_v5 }
 0x363   : > { %6599 = vmatpush1.msra.mxu0 %v14308_v52  ;;  %6662 = vmatprep.mubr.f32.mxu0 %v15155_v58 }
 0x364   : > { %6675 = vmatprep.subr.mxu0 %v6439_v41 }
 0x365   : > { %7055 = vmatmul.mubr.f32.vlgmr.msra.gmra.mrb[12].mxu1 %v14298_v5 }
 0x366   : > { %7064 = vmatpush1.msra.mxu1 %v14315_v30  ;;  %7127 = vmatprep.mubr.f32.mxu1 %v15155_v58 }
 0x367   : > { %7140 = vmatprep.subr.mxu1 %v6904_v14 }
 0x36a   : > { %v5849_v16 = vpop.f32.mrb[10].mxu0  ;;  %6666 = vmatmul.mubr.f32.vlgmr.msra.gmra.mrb[12].mxu0 %v14302_v50 }
 0x36b   : > { %v12775_v45 = vadd.f32 %v5849_v16, %v14290_v39  ;;  %6679 = vmatpush1.msra.mxu0 %v6445_v22  ;;  %v5851_v55 = vpop.f32.mrb[11].mxu0  ;;  %6742 = vmatprep.mubr.f32.mxu0 %v15155_v58 }
 0x36c   : > { %v12776_v23 = vadd.f32 %v5851_v55, %v14290_v39  ;;  %6751 = vmatprep.subr.mxu0 %v6359_v43 }
 0x36d   : > { %13048 = vtanh.f32 %v12775_v45  ;;  %v6314_v41 = vpop.f32.mrb[10].mxu1  ;;  %7131 = vmatmul.mubr.f32.vlgmr.msra.gmra.mrb[12].mxu1 %v14302_v50 }
 0x36e   : > { %v12777_v29 = vadd.f32 %v6314_v41, %v14290_v39  ;;  %7144 = vmatpush1.msra.mxu1 %v6910_v11  ;;  %13050 = vtanh.f32 %v12776_v23  ;;  %v6316_v31 = vpop.f32.mrb[11].mxu1  ;;  %7207 = vmatprep.mubr.f32.mxu1 %v15155_v58 }
 0x36f   : > { %v12778_v14 = vadd.f32 %v6316_v31, %v14290_v39  ;;  %7216 = vmatprep.subr.mxu1 %v6824_v35 }
 0x370   : > { %13052 = vtanh.f32 %v12777_v29 }
 0x371   : > { %13054 = vtanh.f32 %v12778_v14 }
 0x372   : > { %6744 = vmatmul.mubr.f32.vlgmr.msra.gmra.mrb[12].mxu0 %v14292_v4 }
 0x373   : > { %6753 = vmatpush1.msra.mxu0 %v14308_v52  ;;  %6816 = vmatprep.mubr.f32.mxu0 %v15155_v58 }
 0x375   : > { %7209 = vmatmul.mubr.f32.vlgmr.msra.gmra.mrb[12].mxu1 %v14292_v4 }
 0x376   : > { %7218 = vmatpush1.msra.mxu1 %v14315_v30  ;;  %7281 = vmatprep.mubr.f32.mxu1 %v15155_v58 }
 0x377   : > { %v13049_v43 = vpop.eup %13048 }
 0x378   : > { %v13051_v22 = vpop.eup %13050  ;;  %v6348_v11 = vsel %vm15286_vm8, %v13049_v43, 0  ;;  %vm15289_vm8 = vcmask 39936  }
 0x379   : > { %v6351_v39 = vsel %vm15287_vm4, %v13051_v22, 0  ;;  %v14350_v35 = vand.u32 4294901760, %v6348_v11  ;;  %vm15290_vm4 = vmmov %vm15285_vm1 }
 0x37a   : > { %v13053_v9 = vpop.eup %13052  ;;  %6818 = vmatmul.mubr.f32.vlgmr.msra.gmra.mrb[12].mxu0 %v14292_v4  ;;  %v7289_v52 = vand.u32 4294901760, %v6351_v39 }
 0x37b   : > { %v13055_v62 = vpop.eup %13054  ;;  %v7374_v15 = vsub.f32 %v6348_v11, %v14350_v35  ;;  %7355 = vmatprep.mubr.f32.mxu0 %v15155_v58  ;;  %v6354_v30 = vsel %vm15288_vm14, %v13053_v9, 0  ;;  %vm15291_vm14 = vmmov %vm15285_vm1 }
 0x37c   : > { %7290 = vmatprep.subr.mxu0 %v7289_v52  ;;  %v6357_v25 = vsel %vm15285_vm1, %v13055_v62, 0  ;;  %v7756_v6 = vand.u32 4294901760, %v6354_v30  ;;  %v7368_v18 = vsub.f32 %v6351_v39, %v7289_v52 }
 0x37d   : > { %7283 = vmatmul.mubr.f32.vlgmr.msra.gmra.mrb[12].mxu1 %v14292_v4  ;;  %v7754_v16 = vand.u32 4294901760, %v6357_v25  ;;  %7292 = vmatpush1.msra.mxu0 %v14350_v35  ;;  %v7375_v45 = vand.u32 4294901760, %v7374_v15 }
 0x37e   : > { %v7839_v55 = vsub.f32 %v6354_v30, %v7756_v6  ;;  %7820 = vmatprep.mubr.f32.mxu1 %v15155_v58  ;;  %7361 = vmatmul.mubr.f32.vlgmr.msra.gmra.mrb[14].mxu0 %v14310_v7  ;;  %v7369_v23 = vand.u32 4294901760, %v7368_v18 }
 0x37f   : > { %7755 = vmatprep.subr.mxu1 %v7754_v16  ;;  %v7833_v41 = vsub.f32 %v6357_v25, %v7754_v16  ;;  %v7376_v29 = vsub.f32 %v7374_v15, %v7375_v45  ;;  %7441 = vmatprep.mubr.f32.mxu0 %v15155_v58 }
 0x380   : > { %7757 = vmatpush1.msra.mxu1 %v7756_v6  ;;  %v7370_v31 = vsub.f32 %v7368_v18, %v7369_v23  ;;  %v7840_v14 = vand.u32 4294901760, %v7839_v55 }
 0x381   : > { %7826 = vmatmul.mubr.f32.vlgmr.msra.gmra.mrb[14].mxu1 %v14310_v7  ;;  %v7834_v43 = vand.u32 4294901760, %v7833_v41  ;;  %v7377_v9 = vand.u32 4294901760, %v7376_v29  ;;  %v14390_v7 = vpop.permute.xlu1 %6329 }
 0x382   : > { %v7371_v22 = vand.u32 4294901760, %v7370_v31  ;;  %v7841_v11 = vsub.f32 %v7839_v55, %v7840_v14  ;;  %7906 = vmatprep.mubr.f32.mxu1 %v15155_v58 }
 0x383   : > { %v7835_v39 = vsub.f32 %v7833_v41, %v7834_v43 }
 0x384   : > { %7372 = vmatprep.subr.mxu0 %v7371_v22  ;;  %v7842_v30 = vand.u32 4294901760, %v7841_v11 }
 0x385   : > { %v7836_v62 = vand.u32 4294901760, %v7835_v39  ;;  %7378 = vmatpush1.msra.mxu0 %v7377_v9 }
 0x386   : > { %7443 = vmatmul.mubr.f32.vlgmr.msra.gmra.mrb[14].mxu0 %v14292_v4  ;;  %7451 = vmatprep.subr.mxu0 %v7368_v18 }
 0x387   : > { %7837 = vmatprep.subr.mxu1 %v7836_v62  ;;  %7454 = vmatpush1.msra.mxu0 %v7374_v15 }
 0x388   : > { %7843 = vmatpush1.msra.mxu1 %v7842_v30  ;;  %7527 = vmatprep.subr.mxu0 %v7289_v52 }
 0x389   : > { %7908 = vmatmul.mubr.f32.vlgmr.msra.gmra.mrb[14].mxu1 %v14292_v4  ;;  %7916 = vmatprep.subr.mxu1 %v7833_v41 }
 0x38a   : > { %7919 = vmatpush1.msra.mxu1 %v7839_v55  ;;  %7517 = vmatprep.mubr.f32.mxu0 %v15155_v58 }
 0x38b   : > { %7992 = vmatprep.subr.mxu1 %v7754_v16  ;;  %7982 = vmatprep.mubr.f32.mxu1 %v15155_v58 }
 0x38e   : > { %7520 = vmatmul.mubr.f32.vlgmr.msra.gmra.mrb[14].mxu0 %v14298_v5 }
 0x38f   : > { %7529 = vmatpush1.msra.mxu0 %v14350_v35  ;;  %7592 = vmatprep.mubr.f32.mxu0 %v15155_v58 }
 0x390   : > { %7605 = vmatprep.subr.mxu0 %v7369_v23 }
 0x391   : > { %7985 = vmatmul.mubr.f32.vlgmr.msra.gmra.mrb[14].mxu1 %v14298_v5  ;;  %v2521_v5 = vld [vmem:[%s15063_s2 + $0x18] sm:$0x1f] }
 0x392   : > { %7994 = vmatpush1.msra.mxu1 %v7756_v6  ;;  %8057 = vmatprep.mubr.f32.mxu1 %v15155_v58 }
 0x393   : > { %8070 = vmatprep.subr.mxu1 %v7834_v43 }
 0x396   : > { %7596 = vmatmul.mubr.f32.vlgmr.msra.gmra.mrb[14].mxu0 %v14302_v50 }
 0x397   : > { %7609 = vmatpush1.msra.mxu0 %v7375_v45  ;;  %7672 = vmatprep.mubr.f32.mxu0 %v15155_v58 }
 0x398   : > { %7681 = vmatprep.subr.mxu0 %v7289_v52 }
 0x399   : > { %8061 = vmatmul.mubr.f32.vlgmr.msra.gmra.mrb[14].mxu1 %v14302_v50  ;;  %v8233_v50 = vsel %vm15289_vm8, %v2521_v5, 0  ;;  %vm15292_vm8 = vmmov %vm15285_vm1 }
 0x39a   : > { %8074 = vmatpush1.msra.mxu1 %v7840_v14  ;;  %8137 = vmatprep.mubr.f32.mxu1 %v15155_v58  ;;  %v14392_v52 = vand.u32 4294901760, %v8233_v50 }
 0x39b   : > { %8146 = vmatprep.subr.mxu1 %v7754_v16 }
 0x39c   : > { %v14398_v45 = vsub.f32 %v8233_v50, %v14392_v52 }
 0x39e   : > { %7674 = vmatmul.mubr.f32.vlgmr.msra.gmra.mrb[14].mxu0 %v14292_v4  ;;  %v14402_v23 = vand.u32 4294901760, %v14398_v45 }
 0x39f   : > { %7683 = vmatpush1.msra.mxu0 %v14350_v35  ;;  %7746 = vmatprep.mubr.f32.mxu0 %v15155_v58 }
 0x3a0   : > { %v8329_v41 = vsub.f32 %v14398_v45, %v14402_v23 }
 0x3a1   : > { %8139 = vmatmul.mubr.f32.vlgmr.msra.gmra.mrb[14].mxu1 %v14292_v4 }
 0x3a2   : > { %8148 = vmatpush1.msra.mxu1 %v7756_v6  ;;  %8211 = vmatprep.mubr.f32.mxu1 %v15155_v58  ;;  %v14410_v9 = vand.u32 4294901760, %v8329_v41 }
 0x3a6   : > { %7748 = vmatmul.mubr.f32.vlgmr.msra.gmra.mrb[14].mxu0 %v14292_v4 }
 0x3a7   : > { %8325 = vmatprep.mubr.f32.mxu0 %v15155_v58 }
 0x3a9   : > { %8213 = vmatmul.mubr.f32.vlgmr.msra.gmra.mrb[14].mxu1 %v14292_v4 }
 0x3aa   : > { %8790 = vmatprep.mubr.f32.mxu1 %v15155_v58 }
 0x44d   : > { %v6819_v35 = vpop.f32.mrb[12].mxu0 }
 0x44e   : > { %v12779_v15 = vadd.f32 %v6819_v35, %v14390_v7  ;;  %v6821_v25 = vpop.f32.mrb[13].mxu0 }
 0x44f   : > { %v12780_v6 = vadd.f32 %v6821_v25, %v14390_v7 }
 0x450   : > { %13056 = vtanh.f32 %v12779_v15  ;;  %v7284_v4 = vpop.f32.mrb[12].mxu1 }
 0x451   : > { %v12781_v18 = vadd.f32 %v7284_v4, %v14390_v7  ;;  %13058 = vtanh.f32 %v12780_v6  ;;  %v7286_v16 = vpop.f32.mrb[13].mxu1 }
 0x452   : > { %v12782_v55 = vadd.f32 %v7286_v16, %v14390_v7 }
 0x453   : > { %13060 = vtanh.f32 %v12781_v18 }
 0x454   : > { %13062 = vtanh.f32 %v12782_v55 }
 0x45a   : > { %v13057_v29 = vpop.eup %13056 }
 0x45b   : > { %v13059_v31 = vpop.eup %13058  ;;  %v8236_v14 = vsel %vm15290_vm4, %v13057_v29, 0  ;;  %vm15293_vm4 = vmmov %vm15285_vm1 }
 0x45c   : > { %v8239_v43 = vsel %vm15291_vm14, %v13059_v31, 0  ;;  %v14408_v22 = vand.u32 4294901760, %v8236_v14  ;;  %vm15294_vm14 = vmmov %vm15285_vm1 }
 0x45d   : > { %v13061_v11 = vpop.eup %13060  ;;  %v8259_v39 = vand.u32 4294901760, %v8239_v43 }
 0x45e   : > { %v13063_v62 = vpop.eup %13062  ;;  %v8344_v30 = vsub.f32 %v8236_v14, %v14408_v22  ;;  %v8242_v5 = vsel %vm15285_vm1, %v13061_v11, 0 }
 0x45f   : > { %8260 = vmatprep.subr.mxu0 %v8259_v39  ;;  %v8245_v50 = vsel %vm15292_vm8, %v13063_v62, 0  ;;  %v14415_v35 = vand.u32 4294901760, %v8242_v5  ;;  %v8338_v15 = vsub.f32 %v8239_v43, %v8259_v39  ;;  %vm15295_vm8 = vmmov %vm15285_vm1 }
 0x460   : > { %v8724_v25 = vand.u32 4294901760, %v8245_v50  ;;  %8262 = vmatpush1.msra.mxu0 %v14408_v22  ;;  %v8345_v6 = vand.u32 4294901760, %v8344_v30 }
 0x461   : > { %v8809_v4 = vsub.f32 %v8242_v5, %v14415_v35  ;;  %8331 = vmatmul.mubr.f32.vlgmr.msra.gmra.mrb[16].mxu0 %v14410_v9  ;;  %v8339_v18 = vand.u32 4294901760, %v8338_v15 }
 0x462   : > { %8725 = vmatprep.subr.mxu1 %v8724_v25  ;;  %v8803_v16 = vsub.f32 %v8245_v50, %v8724_v25  ;;  %v8346_v55 = vsub.f32 %v8344_v30, %v8345_v6  ;;  %8411 = vmatprep.mubr.f32.mxu0 %v15155_v58 }
 0x463   : > { %8727 = vmatpush1.msra.mxu1 %v14415_v35  ;;  %v8340_v41 = vsub.f32 %v8338_v15, %v8339_v18  ;;  %v8810_v29 = vand.u32 4294901760, %v8809_v4 }
 0x464   : > { %8796 = vmatmul.mubr.f32.vlgmr.msra.gmra.mrb[16].mxu1 %v14410_v9  ;;  %v8804_v31 = vand.u32 4294901760, %v8803_v16  ;;  %v8347_v62 = vand.u32 4294901760, %v8346_v55 }
 0x465   : > { %v8341_v14 = vand.u32 4294901760, %v8340_v41  ;;  %v8811_v43 = vsub.f32 %v8809_v4, %v8810_v29  ;;  %8876 = vmatprep.mubr.f32.mxu1 %v15155_v58 }
 0x466   : > { %v8805_v11 = vsub.f32 %v8803_v16, %v8804_v31 }
 0x467   : > { %8342 = vmatprep.subr.mxu0 %v8341_v14  ;;  %v8812_v50 = vand.u32 4294901760, %v8811_v43 }
 0x468   : > { %v8806_v5 = vand.u32 4294901760, %v8805_v11  ;;  %8348 = vmatpush1.msra.mxu0 %v8347_v62 }
 0x469   : > { %8413 = vmatmul.mubr.f32.vlgmr.msra.gmra.mrb[16].mxu0 %v14392_v52  ;;  %8421 = vmatprep.subr.mxu0 %v8338_v15 }
 0x46a   : > { %8807 = vmatprep.subr.mxu1 %v8806_v5  ;;  %8424 = vmatpush1.msra.mxu0 %v8344_v30 }
 0x46b   : > { %8813 = vmatpush1.msra.mxu1 %v8812_v50  ;;  %8497 = vmatprep.subr.mxu0 %v8259_v39 }
 0x46c   : > { %8878 = vmatmul.mubr.f32.vlgmr.msra.gmra.mrb[16].mxu1 %v14392_v52  ;;  %8886 = vmatprep.subr.mxu1 %v8803_v16 }
 0x46d   : > { %8889 = vmatpush1.msra.mxu1 %v8809_v4  ;;  %8487 = vmatprep.mubr.f32.mxu0 %v15155_v58 }
 0x46e   : > { %8962 = vmatprep.subr.mxu1 %v8724_v25  ;;  %8952 = vmatprep.mubr.f32.mxu1 %v15155_v58 }
 0x471   : > { %8490 = vmatmul.mubr.f32.vlgmr.msra.gmra.mrb[16].mxu0 %v14398_v45 }
 0x472   : > { %8499 = vmatpush1.msra.mxu0 %v14408_v22  ;;  %8562 = vmatprep.mubr.f32.mxu0 %v15155_v58 }
 0x473   : > { %8575 = vmatprep.subr.mxu0 %v8339_v18 }
 0x474   : > { %8955 = vmatmul.mubr.f32.vlgmr.msra.gmra.mrb[16].mxu1 %v14398_v45 }
 0x475   : > { %8964 = vmatpush1.msra.mxu1 %v14415_v35  ;;  %9027 = vmatprep.mubr.f32.mxu1 %v15155_v58 }
 0x476   : > { %9040 = vmatprep.subr.mxu1 %v8804_v31 }
 0x479   : > { %v7749_v30 = vpop.f32.mrb[14].mxu0  ;;  %8566 = vmatmul.mubr.f32.vlgmr.msra.gmra.mrb[16].mxu0 %v14402_v23 }
 0x47a   : > { %v12783_v15 = vadd.f32 %v7749_v30, %v14390_v7  ;;  %8579 = vmatpush1.msra.mxu0 %v8345_v6  ;;  %v7751_v4 = vpop.f32.mrb[15].mxu0  ;;  %8642 = vmatprep.mubr.f32.mxu0 %v15155_v58 }
 0x47b   : > { %v12784_v16 = vadd.f32 %v7751_v4, %v14390_v7  ;;  %8651 = vmatprep.subr.mxu0 %v8259_v39 }
 0x47c   : > { %13064 = vtanh.f32 %v12783_v15  ;;  %v8214_v18 = vpop.f32.mrb[14].mxu1  ;;  %9031 = vmatmul.mubr.f32.vlgmr.msra.gmra.mrb[16].mxu1 %v14402_v23 }
 0x47d   : > { %v12785_v55 = vadd.f32 %v8214_v18, %v14390_v7  ;;  %9044 = vmatpush1.msra.mxu1 %v8810_v29  ;;  %13066 = vtanh.f32 %v12784_v16  ;;  %v8216_v41 = vpop.f32.mrb[15].mxu1  ;;  %9107 = vmatprep.mubr.f32.mxu1 %v15155_v58 }
 0x47e   : > { %v12786_v31 = vadd.f32 %v8216_v41, %v14390_v7  ;;  %9116 = vmatprep.subr.mxu1 %v8724_v25 }
 0x47f   : > { %13068 = vtanh.f32 %v12785_v55 }
 0x480   : > { %13070 = vtanh.f32 %v12786_v31 }
 0x481   : > { %8644 = vmatmul.mubr.f32.vlgmr.msra.gmra.mrb[16].mxu0 %v14392_v52 }
 0x482   : > { %8653 = vmatpush1.msra.mxu0 %v14408_v22  ;;  %8716 = vmatprep.mubr.f32.mxu0 %v15155_v58 }
 0x484   : > { %9109 = vmatmul.mubr.f32.vlgmr.msra.gmra.mrb[16].mxu1 %v14392_v52 }
 0x485   : > { %9118 = vmatpush1.msra.mxu1 %v14415_v35  ;;  %9181 = vmatprep.mubr.f32.mxu1 %v15155_v58 }
 0x486   : > { %v13065_v39 = vpop.eup %13064 }
 0x487   : > { %v13067_v6 = vpop.eup %13066  ;;  %v8248_v29 = vsel %vm15293_vm4, %v13065_v39, 0  ;;  %vm15296_vm4 = vcmp.eq.s32.totalorder %v13147_v2, %v13183_v19 }
 0x488   : > { %v8251_v7 = vsel %vm15294_vm14, %v13067_v6, 0  ;;  %v14450_v25 = vand.u32 4294901760, %v8248_v29  ;;  %vm15297_vm14 = vcmp.eq.s32.totalorder %v13169_v12, %v13183_v19 }
 0x489   : > { %v13069_v14 = vpop.eup %13068  ;;  %8718 = vmatmul.mubr.f32.vlgmr.msra.gmra.mrb[16].mxu0 %v14392_v52  ;;  %v9189_v22 = vand.u32 4294901760, %v8251_v7 }
 0x48a   : > { %v13071_v43 = vpop.eup %13070  ;;  %v9274_v11 = vsub.f32 %v8248_v29, %v14450_v25  ;;  %9255 = vmatprep.mubr.f32.mxu0 %v15155_v58  ;;  %v8254_v35 = vsel %vm15285_vm1, %v13069_v14, 0  ;;  %vm14506_vm1 = vmpackc.low %vm15297_vm14, %vm15296_vm4  ;;  %vm15318_vm14 = vcmp.lt.s32.totalorder %v13147_v2, 4  ;;  %vm10355_vm4 = vcmask 1043459  }
 0x48b   : > { %9190 = vmatprep.subr.mxu0 %v9189_v22  ;;  %v8257_v62 = vsel %vm15295_vm8, %v13071_v43, 0  ;;  %v9656_v5 = vand.u32 4294901760, %v8254_v35  ;;  %v9268_v50 = vsub.f32 %v8251_v7, %v9189_v22  ;;  %vm15300_vm8 = vcmp.eq.s32.totalorder %v13147_v2, %v13218_v33 }
 0x48c   : > { %9183 = vmatmul.mubr.f32.vlgmr.msra.gmra.mrb[16].mxu1 %v14392_v52  ;;  %v9654_v30 = vand.u32 4294901760, %v8257_v62  ;;  %9192 = vmatpush1.msra.mxu0 %v14450_v25  ;;  %v9275_v15 = vand.u32 4294901760, %v9274_v11  ;;  %vm14519_vm0 = vmpackc.low %vm15301_vm7, %vm15300_vm8  ;;  %v14533_v33 = vsub.f32 %v13231_v37, %v13231_v37  ;;  %vm15319_vm8 = vcmp.gt.f32.partialorder %v13761_v60, 0.0 }
 0x48d   : > { %v9739_v4 = vsub.f32 %v8254_v35, %v9656_v5  ;;  %9720 = vmatprep.mubr.f32.mxu1 %v15155_v58  ;;  %9261 = vmatmul.mubr.f32.vlgmr.msra.gmra.mrb[18].mxu0 %v14410_v9  ;;  %v9269_v16 = vand.u32 4294901760, %v9268_v50  ;;  %vm14651_vm15 = vmand %vm15319_vm8, %vm15318_vm14  ;;  %vm10358_vm14 = vcmask 1044484   ;;  %vm15323_vm8 = vcmp.gt.f32.partialorder %v13767_v53, 0.0  ;;  %v15354_v53 = vld [vmem:[#allocation17_spill] sm:$0xff] }
 0x48e   : > { %9655 = vmatprep.subr.mxu1 %v9654_v30  ;;  %v9733_v18 = vsub.f32 %v8257_v62, %v9654_v30  ;;  %v9276_v55 = vsub.f32 %v9274_v11, %v9275_v15  ;;  %9341 = vmatprep.mubr.f32.mxu0 %v15155_v58 }
 0x48f   : > { %9657 = vmatpush1.msra.mxu1 %v9656_v5  ;;  %v9270_v41 = vsub.f32 %v9268_v50, %v9269_v16  ;;  %v9740_v31 = vand.u32 4294901760, %v9739_v4 }
 0x490   : > { %9726 = vmatmul.mubr.f32.vlgmr.msra.gmra.mrb[18].mxu1 %v14410_v9  ;;  %v9734_v39 = vand.u32 4294901760, %v9733_v18  ;;  %v9277_v14 = vand.u32 4294901760, %v9276_v55  ;;  %v14490_v9 = vsub.f32 %v13263_v48, %v13263_v48 }
 0x491   : > { %v9271_v6 = vand.u32 4294901760, %v9270_v41  ;;  %v9741_v29 = vsub.f32 %v9739_v4, %v9740_v31  ;;  %9806 = vmatprep.mubr.f32.mxu1 %v15155_v58 }
 0x492   : > { %v9735_v7 = vsub.f32 %v9733_v18, %v9734_v39  ;;  %v10516_v62 = vand.u32 4294901760, %v14490_v9 }
 0x493   : > { %9272 = vmatprep.subr.mxu0 %v9271_v6  ;;  %v9742_v35 = vand.u32 4294901760, %v9741_v29  ;;  %v14541_v6 = vsub.f32 %v13295_v63, %v13295_v63  ;;  %v14545_v29 = vsub.f32 %v13302_v0, %v13302_v0 }
 0x494   : > { %v9736_v43 = vand.u32 4294901760, %v9735_v7  ;;  %9278 = vmatpush1.msra.mxu0 %v9277_v14  ;;  %v11008_v14 = vand.u32 4294901760, %v14533_v33 }
 0x495   : > { %9343 = vmatmul.mubr.f32.vlgmr.msra.gmra.mrb[18].mxu0 %v14392_v52  ;;  %9351 = vmatprep.subr.mxu0 %v9268_v50 }
 0x496   : > { %9737 = vmatprep.subr.mxu1 %v9736_v43  ;;  %9354 = vmatpush1.msra.mxu0 %v9274_v11 }
 0x497   : > { %9743 = vmatpush1.msra.mxu1 %v9742_v35  ;;  %9427 = vmatprep.subr.mxu0 %v9189_v22  ;;  %v11014_v35 = vand.u32 4294901760, %v14541_v6 }
 0x498   : > { %9808 = vmatmul.mubr.f32.vlgmr.msra.gmra.mrb[18].mxu1 %v14392_v52  ;;  %9816 = vmatprep.subr.mxu1 %v9733_v18  ;;  %v15138_v18 = vmov 1.0|1.0  }
 0x499   : > { %9819 = vmatpush1.msra.mxu1 %v9739_v4  ;;  %9417 = vmatprep.mubr.f32.mxu0 %v15155_v58 }
 0x49a   : > { %9892 = vmatprep.subr.mxu1 %v9654_v30  ;;  %9882 = vmatprep.mubr.f32.mxu1 %v15155_v58 }
 0x49d   : > { %9420 = vmatmul.mubr.f32.vlgmr.msra.gmra.mrb[18].mxu0 %v14398_v45 }
 0x49e   : > { %9429 = vmatpush1.msra.mxu0 %v14450_v25  ;;  %9492 = vmatprep.mubr.f32.mxu0 %v15155_v58 }
 0x49f   : > { %9505 = vmatprep.subr.mxu0 %v9269_v16 }
 0x4a0   : > { %9885 = vmatmul.mubr.f32.vlgmr.msra.gmra.mrb[18].mxu1 %v14398_v45  ;;  %v10509_v45 = vsub.f32 %v13205_v27, %v13205_v27  ;;  %v10517_v27 = vsub.f32 %v14490_v9, %v10516_v62 }
 0x4a1   : > { %9894 = vmatpush1.msra.mxu1 %v9656_v5  ;;  %9957 = vmatprep.mubr.f32.mxu1 %v15155_v58 }
 0x4a2   : > { %9970 = vmatprep.subr.mxu1 %v9734_v39  ;;  %v10518_v48 = vand.u32 4294901760, %v10517_v27  ;;  %v14537_v39 = vsub.f32 %v13237_v38, %v13237_v38  ;;  %v11026_v38 = vand.u32 4294901760, %v14545_v29 }
 0x4a4   : > { %v11020_v43 = vand.u32 4294901760, %v14537_v39  ;;  %v11027_v0 = vsub.f32 %v14545_v29, %v11026_v38 }
 0x4a5   : > { %9496 = vmatmul.mubr.f32.vlgmr.msra.gmra.mrb[18].mxu0 %v14402_v23 }
 0x4a6   : > { %9509 = vmatpush1.msra.mxu0 %v9275_v15  ;;  %9572 = vmatprep.mubr.f32.mxu0 %v15155_v58  ;;  %v11021_v63 = vsub.f32 %v14537_v39, %v11020_v43 }
 0x4a7   : > { %9581 = vmatprep.subr.mxu0 %v9189_v22  ;;  %v10510_v22 = vand.u32 4294901760, %v10509_v45 }
 0x4a8   : > { %9961 = vmatmul.mubr.f32.vlgmr.msra.gmra.mrb[18].mxu1 %v14402_v23  ;;  %v10521_v23 = vsub.f32 %v13211_v28, %v13211_v28 }
 0x4a9   : > { %9974 = vmatpush1.msra.mxu1 %v9740_v31  ;;  %10037 = vmatprep.mubr.f32.mxu1 %v15155_v58 }
 0x4aa   : > { %10046 = vmatprep.subr.mxu1 %v9654_v30  ;;  %v10522_v11 = vand.u32 4294901760, %v10521_v23  ;;  %v12675_v41 = vpack.c.bf16 %v10521_v23, %v10509_v45 }
 0x4ac   : > { %v10523_v50 = vsub.f32 %v10521_v23, %v10522_v11  ;;  %v14547_v7 = vpack.c.bf16 %v10522_v11, %v10510_v22  ;;  %v11015_v23 = vsub.f32 %v14541_v6, %v11014_v35  ;;  %v11022_v11 = vand.u32 4294901760, %v11021_v63 }
 0x4ad   : > { %9574 = vmatmul.mubr.f32.vlgmr.msra.gmra.mrb[18].mxu0 %v14392_v52 }
 0x4ae   : > { %9583 = vmatpush1.msra.mxu0 %v14450_v25  ;;  %9646 = vmatprep.mubr.f32.mxu0 %v15155_v58  ;;  %v14494_v25 = vsub.f32 %v13269_v49, %v13269_v49  ;;  %v10524_v15 = vand.u32 4294901760, %v10523_v50  ;;  %v11028_v50 = vand.u32 4294901760, %v11027_v0 }
 0x4af   : > { %12668 = vmatprep.subr.msk.bf16.mxu0 %vm14506_vm1, %v15138_v18 }
 0x4b0   : > { %10039 = vmatmul.mubr.f32.vlgmr.msra.gmra.mrb[18].mxu1 %v14392_v52 }
 0x4b1   : > { %10048 = vmatpush1.msra.mxu1 %v9656_v5  ;;  %10111 = vmatprep.mubr.f32.mxu1 %v15155_v58  ;;  %v10511_v5 = vsub.f32 %v10509_v45, %v10510_v22  ;;  %v11009_v45 = vsub.f32 %v14533_v33, %v11008_v14 }
 0x4b3   : > { %v10512_v30 = vand.u32 4294901760, %v10511_v5  ;;  %v11010_v22 = vand.u32 4294901760, %v11009_v45  ;;  %v11016_v5 = vand.u32 4294901760, %v11015_v23 }
 0x4b5   : > { %9648 = vmatmul.mubr.f32.vlgmr.msra.gmra.mrb[18].mxu0 %v14392_v52  ;;  %v12671_v16 = vpack.c.bf16 %v10524_v15, %v10512_v30  ;;  %v14559_v27 = vpack.c.bf16 %v11022_v11, %v11010_v22  ;;  %v14573_v30 = vsub.f32 %v13473_v13, %v13473_v13  ;;  %v14577_v15 = vsub.f32 %v13483_v61, %v13483_v61 }
 0x4b6   : > { %12670 = vmatpush1.bf16.xpose.msk.msra.mxu0 %vm14519_vm0, %v15138_v18 }
 0x4b7   : > { %12672 = vmatprep.subr.bf16.mxu1 %v12671_v16  ;;  %12676 = vmatprep.subr.bf16.mxu0 %v12675_v41  ;;  %15306 = vst [vmem:[#allocation32_spill] sm:$0xff] %v14573_v30  ;;  %15307 = vst [vmem:[#allocation33_spill] sm:$0xff] %v14577_v15  ;;  %v11512_v13 = vand.u32 4294901760, %v14573_v30  ;;  %v11524_v41 = vand.u32 4294901760, %v14577_v15 }
 0x4b8   : > { %10113 = vmatmul.mubr.f32.vlgmr.msra.gmra.mrb[18].mxu1 %v14392_v52  ;;  %v10528_v52 = vand.u32 4294901760, %v14494_v25 }
 0x4b9   : > { %v11513_v63 = vsub.f32 %v14573_v30, %v11512_v13  ;;  %v11525_v23 = vsub.f32 %v14577_v15, %v11524_v41  ;;  %v15337_v15 = vld [vmem:[#allocation14_spill] sm:$0xff] }
 0x4ba   : > { %v10529_v28 = vsub.f32 %v14494_v25, %v10528_v52  ;;  %v14551_v37 = vpack.c.bf16 %v10528_v52, %v10516_v62  ;;  %v14561_v62 = vpack.c.bf16 %v11028_v50, %v11016_v5  ;;  %v14565_v52 = vsub.f32 %v13421_v34, %v13421_v34 }
 0x4bb   : > { %v14583_v34 = vpack.c.bf16 %v11020_v43, %v11008_v14  ;;  %v11514_v0 = vand.u32 4294901760, %v11513_v63  ;;  %v11526_v22 = vand.u32 4294901760, %v11525_v23  ;;  %v14605_v50 = vsub.f32 %v13446_v46, %v13446_v46 }
 0x4bc   : > { %v10530_v4 = vand.u32 4294901760, %v10529_v28  ;;  %15304 = vst [vmem:[#allocation30_spill] sm:$0xff] %v14565_v52  ;;  %v14569_v28 = vsub.f32 %v13433_v36, %v13433_v36  ;;  %v11506_v16 = vand.u32 4294901760, %v14565_v52  ;;  %v14617_v63 = vsub.f32 %v13538_v56, %v13538_v56 }
 0x4bd   : > { %15308 = vst [vmem:[#allocation34_spill] sm:$0xff] %v14605_v50  ;;  %v14623_v46 = vpack.c.bf16 %v11524_v41, %v11512_v13 }
 0x4be   : > { %v12673_v55 = vpack.c.bf16 %v10530_v4, %v10518_v48  ;;  %15305 = vst [vmem:[#allocation31_spill] sm:$0xff] %v14569_v28  ;;  %v11518_v36 = vand.u32 4294901760, %v14569_v28  ;;  %v11507_v61 = vsub.f32 %v14565_v52, %v11506_v16  ;;  %15311 = vst [vmem:[#allocation37_spill] sm:$0xff] %v14617_v63 }
 0x4bf   : > { %15313 = vst [vmem:[#allocation39_spill] sm:$0xff] %v14623_v46  ;;  %v14643_v46 = vpop.permute.xlu1 %8229 }
 0x4c0   : > { %12674 = vmatpush1.bf16.xpose.msra.mxu1 %v12673_v55  ;;  %v14587_v55 = vpack.c.bf16 %v11026_v38, %v11014_v35  ;;  %v11519_v45 = vsub.f32 %v14569_v28, %v11518_v36  ;;  %v11508_v14 = vand.u32 4294901760, %v11507_v61  ;;  %v14597_v35 = vpack.c.bf16 %v11526_v22, %v11514_v0 }
 0x4c1   : > { %12680 = vmatprep.subr.msk.bf16.mxu1 %vm14506_vm1, %v15138_v18  ;;  %v14609_v61 = vsub.f32 %v13459_v54, %v13459_v54  ;;  %v14619_v23 = vpack.c.bf16 %v11518_v36, %v11506_v16  ;;  %v12022_v54 = vand.u32 4294901760, %v14617_v63 }
 0x4c2   : > { %v11520_v43 = vand.u32 4294901760, %v11519_v45  ;;  %v14613_v45 = vsub.f32 %v13532_v32, %v13532_v32 }
 0x4c3   : > { %15309 = vst [vmem:[#allocation35_spill] sm:$0xff] %v14609_v61  ;;  %15312 = vst [vmem:[#allocation38_spill] sm:$0xff] %v14619_v23  ;;  %v12023_v56 = vsub.f32 %v14617_v63, %v12022_v54  ;;  %v15335_v23 = vld [vmem:[#allocation13_spill] sm:$0xff] }
 0x4c4   : > { %v14595_v11 = vpack.c.bf16 %v11520_v43, %v11508_v14  ;;  %15310 = vst [vmem:[#allocation36_spill] sm:$0xff] %v14613_v45  ;;  %v12004_v14 = vand.u32 4294901760, %v14605_v50  ;;  %v12016_v43 = vand.u32 4294901760, %v14609_v61  ;;  %v12010_v0 = vand.u32 4294901760, %v14613_v45 }
 0x4c5   : > { %v12024_v4 = vand.u32 4294901760, %v12023_v56  ;;  %v15434_v3 = vld [vmem:[#allocation31_spill] sm:$0xff] }
 0x4c6   : > { %v12005_v22 = vsub.f32 %v14605_v50, %v12004_v14  ;;  %v12017_v32 = vsub.f32 %v14609_v61, %v12016_v43  ;;  %v12011_v5 = vsub.f32 %v14613_v45, %v12010_v0  ;;  %v14639_v18 = vpack.c.bf16 %v12016_v43, %v12004_v14  ;;  %v15333_v61 = vld [vmem:[#allocation11_spill] sm:$0xff] }
 0x4c7   : > { %v14641_v58 = vpack.c.bf16 %v12022_v54, %v12010_v0 }
 0x4c8   : > { %v12006_v16 = vand.u32 4294901760, %v12005_v22  ;;  %v12018_v36 = vand.u32 4294901760, %v12017_v32  ;;  %v12012_v38 = vand.u32 4294901760, %v12011_v5  ;;  %15316 = vst [vmem:[#allocation42_spill] sm:$0xff] %v14639_v18 }
 0x4c9   : > { %15317 = vst [vmem:[#allocation43_spill] sm:$0xff] %v14641_v58 }
 0x4ca   : > { %v14631_v48 = vpack.c.bf16 %v12018_v36, %v12006_v16  ;;  %v14633_v13 = vpack.c.bf16 %v12024_v4, %v12012_v38 }
 0x4cc   : > { %15314 = vst [vmem:[#allocation40_spill] sm:$0xff] %v14631_v48  ;;  %15315 = vst [vmem:[#allocation41_spill] sm:$0xff] %v14633_v13 }
 0x55c   : > { %v8719_v22 = vpop.f32.mrb[16].mxu0 }
 0x55d   : > { %v12787_v5 = vadd.f32 %v8719_v22, %v14643_v46  ;;  %v8721_v32 = vpop.f32.mrb[17].mxu0 }
 0x55e   : > { %v12788_v56 = vadd.f32 %v8721_v32, %v14643_v46 }
 0x55f   : > { %v10196_v38 = vrot.slane %v12787_v5, 1  ;;  %v10204_v14 = vrot.slane %v12787_v5, 2  ;;  %v10212_v43 = vrot.slane %v12787_v5, 3  ;;  %v10220_v0 = vrot.slane %v12787_v5, 4  ;;  %v9184_v54 = vpop.f32.mrb[16].mxu1 }
 0x560   : > { %v10268_v16 = vsel %vm14651_vm15, 0.0, %v12787_v5  ;;  %v14658_v36 = vadd.f32 %v9184_v54, %v14643_v46  ;;  %v10197_v22 = vrot.slane %v12788_v56, 1  ;;  %v10205_v32 = vrot.slane %v12788_v56, 2  ;;  %v9186_v31 = vpop.f32.mrb[17].mxu1 }
 0x561   : > { %v10276_v60 = vsel %vm13785_vm3, 0.0, %v10196_v38  ;;  %v10284_v41 = vsel %vm13797_vm13, 0.0, %v10204_v14  ;;  %v10292_v58 = vsel %vm13806_vm6, 0.0, %v10212_v43  ;;  %v10213_v18 = vrot.slane %v12788_v56, 3 }
 0x562   : > { %v10348_v4 = vrot.slane %v10276_v60, 7  ;;  %v10351_v5 = vrot.slane %v10284_v41, 6  ;;  %vm15322_vm15 = vcmp.lt.s32.totalorder %v13147_v2, 4  ;;  %v10198_v47 = vrot.slane %v14658_v36, 1 }
 0x563   : > { %vm14670_vm7 = vmand %vm15323_vm8, %vm15322_vm15  ;;  %v10206_v1 = vrot.slane %v14658_v36, 2  ;;  %v10214_v38 = vrot.slane %v14658_v36, 3  ;;  %v10222_v59 = vrot.slane %v14658_v36, 4  ;;  %vm15327_vm13 = vcmp.gt.f32.partialorder %v13790_v10, 0.0 }
 0x564   : > { %v10270_v41 = vsel %vm14670_vm7, 0.0, %v14658_v36  ;;  %vm15326_vm6 = vmmov %vm15322_vm15  ;;  %v10221_v14 = vrot.slane %v12788_v56, 4  ;;  %v10278_v60 = vsel %vm13818_vm5, 0.0, %v10198_v47  ;;  %v10277_v36 = vsel %vm13849_vm2, 0.0, %v10197_v22  ;;  %v15340_v22 = vld [vmem:[#allocation19_spill] sm:$0xff] }
 0x565   : > { %vm14685_vm3 = vmand %vm15327_vm13, %vm15326_vm6  ;;  %v10286_v63 = vsel %vm13831_vm10, 0.0, %v10206_v1  ;;  %vm15334_vm7 = vnez %v15333_v61  ;;  %v10368_v13 = vrot.slane %v10278_v60, 7  ;;  %vm15336_vm15 = vnez %v15335_v23 }
 0x566   : > { %v10269_v50 = vsel %vm14685_vm3, 0.0, %v12788_v56  ;;  %v10294_v10 = vsel %vm15334_vm7, 0.0, %v10214_v38  ;;  %v10370_v48 = vrot.slane %v10286_v63, 6  ;;  %v10285_v30 = vsel %vm15336_vm15, 0.0, %v10205_v32  ;;  %vm15343_vm10 = vmmov %vm15326_vm6  ;;  %v15344_v63 = vld [vmem:[#allocation9_spill] sm:$0xff] }
 0x567   : > { %vm15338_vm8 = vnez %v15337_v15  ;;  %v10360_v43 = vrot.slane %v10277_v36, 7  ;;  %v10362_v45 = vrot.slane %v10285_v30, 6  ;;  %v12790_v1 = vadd.f32 %v9186_v31, %v14643_v46  ;;  %v15352_v36 = vld [vmem:[#allocation16_spill] sm:$0xff] }
 0x568   : > { %v10293_v47 = vsel %vm15338_vm8, 0.0, %v10213_v18  ;;  %v10301_v56 = vsel %vm13909_vm11, 0.0, %v10221_v14  ;;  %vm15341_vm2 = vnez %v15340_v22  ;;  %vm15342_vm5 = vcmask 1041409  }
 0x569   : > { %v10364_v54 = vrot.slane %v10293_v47, 5  ;;  %v10300_v61 = vsel %vm15341_vm2, 0.0, %v10220_v0  ;;  %v10350_v38 = vsel %vm15342_vm5, %v10348_v4, %v10268_v16  ;;  %vm15345_vm6 = vcmp.gt.f32.partialorder %v15344_v63, 0.0  ;;  %vm15348_vm11 = vmmov %vm15342_vm5  ;;  %v15350_v4 = vld [vmem:[#allocation15_spill] sm:$0xff] }
 0x56a   : > { %vm14713_vm13 = vmand %vm15345_vm6, %vm15343_vm10  ;;  %v10199_v18 = vrot.slane %v12790_v1, 1  ;;  %v10207_v30 = vrot.slane %v12790_v1, 2  ;;  %v10215_v31 = vrot.slane %v12790_v1, 3  ;;  %v10223_v23 = vrot.slane %v12790_v1, 4 }
 0x56b   : > { %v10271_v32 = vsel %vm14713_vm13, 0.0, %v12790_v1  ;;  %v10361_v14 = vsel %vm15348_vm11, %v10360_v43, %v10269_v50  ;;  %v10366_v0 = vrot.slane %v10301_v56, 4  ;;  %vm15349_vm3 = vcmask 1042434   ;;  %vm15359_vm10 = vmmov %vm15348_vm11 }
 0x56c   : > { %v10353_v16 = vsel %vm15349_vm3, %v10351_v5, %v10350_v38  ;;  %vm15351_vm7 = vnez %v15350_v4  ;;  %vm15353_vm15 = vnez %v15352_v36  ;;  %vm15355_vm8 = vnez %v15354_v53  ;;  %vm15356_vm2 = vmmov %vm15349_vm3  ;;  %v15357_v5 = vld [vmem:[#allocation20_spill] sm:$0xff] }
 0x56d   : > { %v10279_v60 = vsel %vm15351_vm7, 0.0, %v10199_v18  ;;  %v10287_v47 = vsel %vm15353_vm15, 0.0, %v10207_v30  ;;  %v10295_v22 = vsel %vm15355_vm8, 0.0, %v10215_v31  ;;  %v10363_v63 = vsel %vm15356_vm2, %v10362_v45, %v10361_v14  ;;  %vm15360_vm6 = vmmov %vm15356_vm2 }
 0x56e   : > { %v10376_v52 = vrot.slane %v10279_v60, 7  ;;  %v10378_v28 = vrot.slane %v10287_v47, 6  ;;  %v10365_v1 = vsel %vm10355_vm4, %v10364_v54, %v10363_v63  ;;  %v10354_v15 = vrot.slane %v10292_v58, 5  ;;  %v15361_v60 = vld [vmem:[#allocation21_spill] sm:$0xff]  ;;  %vm15363_vm11 = vmmov %vm15359_vm10 }
 0x56f   : > { %v10367_v50 = vsel %vm10358_vm14, %v10366_v0, %v10365_v1  ;;  %v10357_v43 = vrot.slane %v10300_v61, 4  ;;  %vm15358_vm5 = vnez %v15357_v5  ;;  %v10380_v38 = vrot.slane %v10295_v22, 5  ;;  %vm15364_vm3 = vmmov %vm15356_vm2 }
 0x570   : > { %v10303_v56 = vsel %vm15358_vm5, 0.0, %v10223_v23  ;;  %v10492_v18 = vand.u32 4294901760, %v10367_v50  ;;  %v10356_v30 = vsel %vm10355_vm4, %v10354_v15, %v10353_v16  ;;  %v10377_v4 = vsel %vm15359_vm10, %v10376_v52, %v10271_v32 }
 0x571   : > { %v10382_v31 = vrot.slane %v10303_v56, 4  ;;  %v10359_v45 = vsel %vm10358_vm14, %v10357_v43, %v10356_v30  ;;  %v10379_v14 = vsel %vm15360_vm6, %v10378_v28, %v10377_v4  ;;  %vm15362_vm13 = vnez %v15361_v60 }
 0x572   : > { %v10302_v58 = vsel %vm15362_vm13, 0.0, %v10222_v59  ;;  %v10369_v54 = vsel %vm15363_vm11, %v10368_v13, %v10270_v41  ;;  %10593 = vmatprep.mubr.f32.mxu1 %v10492_v18  ;;  %v10498_v61 = vand.u32 4294901760, %v10359_v45  ;;  %v10493_v0 = vsub.f32 %v10367_v50, %v10492_v18 }
 0x573   : > { %v10381_v23 = vsel %vm10355_vm4, %v10380_v38, %v10379_v14  ;;  %v10371_v36 = vsel %vm15364_vm3, %v10370_v48, %v10369_v54  ;;  %v10372_v52 = vrot.slane %v10294_v10, 5  ;;  %v10374_v53 = vrot.slane %v10302_v58, 4 }
 0x574   : > { %v10383_v16 = vsel %vm10358_vm14, %v10382_v31, %v10381_v23  ;;  %v10499_v32 = vsub.f32 %v10359_v45, %v10498_v61  ;;  %10595 = vmatmul.mubr.f32.vlgmr.msra.gmra.mrb[20].mxu1 %v10498_v61  ;;  %v10494_v47 = vand.u32 4294901760, %v10493_v0  ;;  %v15365_v28 = vmov 1.0|1.0  }
 0x575   : > { %12682 = vmatpush1.bf16.xpose.msk.msra.mxu1 %vm14519_vm0, %v15365_v28  ;;  %v10373_v13 = vsel %vm10355_vm4, %v10372_v52, %v10371_v36  ;;  %v14750_v1 = vand.u32 4294901760, %v10383_v16  ;;  %v15366_v15 = vpack.c.bf16 %v14494_v25, %v14490_v9  ;;  %v15367_v9 = vld [vmem:[#allocation2_spill] sm:$0xff]  ;;  %vm15377_vm5 = vcmp.lt.s32.totalorder %v13147_v2, 4 }
 0x576   : > { %10753 = vmatprep.mubr.f32.mxu1 %v10494_v47  ;;  %v10495_v59 = vsub.f32 %v10493_v0, %v10494_v47  ;;  %v10500_v41 = vand.u32 4294901760, %v10499_v32  ;;  %12688 = vmatprep.subr.msk.bf16.mxu1 %vm14506_vm1, %v15365_v28  ;;  %v10375_v48 = vsel %vm10358_vm14, %v10374_v53, %v10373_v13  ;;  %vm15368_vm1 = vcmp.eq.s32.totalorder %v13147_v2, %v15367_v9 }
 0x577   : > { %v14758_v49 = vand.u32 4294901760, %v10375_v48  ;;  %v14763_v50 = vsub.f32 %v10383_v16, %v14750_v1  ;;  %vm15378_vm10 = vcmp.gt.f32.partialorder %v14001_v40, 0.0  ;;  %v15381_v52 = vpack.c.bf16 %v14537_v39, %v14533_v33 }
 0x578   : > { %v10496_v10 = vand.u32 4294901760, %v10495_v59  ;;  %v10501_v22 = vsub.f32 %v10499_v32, %v10500_v41  ;;  %vm14816_vm6 = vmand %vm15378_vm10, %vm15377_vm5  ;;  %vm15382_vm13 = vnez %v15230_v51  ;;  %vm15383_vm11 = vnez %v15232_v20 }
 0x579   : > { %v14766_v43 = vsub.f32 %v10375_v48, %v14758_v49  ;;  %v10992_v19 = vand.u32 4294901760, %v14763_v50  ;;  %vm15384_vm3 = vnez %v15234_v17  ;;  %vm15393_vm10 = vnez %v15236_v21 }
 0x57a   : > { %10497 = vmatprep.mubr.f32.mxu0 %v10496_v10  ;;  %v10502_v63 = vand.u32 4294901760, %v10501_v22 }
 0x57c   : > { %10757 = vmatmul.mubr.f32.vlgmr.msra.gmra.mrb[22].mxu1 %v10500_v41  ;;  %10503 = vmatmul.mubr.f32.vlgmr.msra.gmra.mrb[20].mxu0 %v10502_v63 }
 0x57d   : > { %12678 = vmatpush1.bf16.xpose.msra.mxu0 %v15366_v15  ;;  %12690 = vmatpush1.bf16.xpose.msk.msra.mxu1 %vm14519_vm0, %v15365_v28  ;;  %vm15369_vm0 = vcmp.eq.s32.totalorder %v13169_v12, %v15367_v9 }
 0x57e   : > { %10915 = vmatprep.mubr.f32.mxu1 %v10492_v18  ;;  %10674 = vmatprep.mubr.f32.mxu0 %v10493_v0  ;;  %vm14774_vm7 = vmpackc.low %vm15369_vm0, %vm15368_vm1  ;;  %vm15386_vm0 = vcmp.gt.f32.partialorder %v14007_v44, 0.0  ;;  %v15425_v44 = vld [vmem:[#allocation29_spill] sm:$0xff] }
 0x57f   : > { %12684 = vmatprep.subr.bf16.mxu0 %v14547_v7  ;;  %12696 = vmatprep.subr.bf16.mxu1 %v14559_v27  ;;  %v10998_v7 = vand.u32 4294901760, %v14766_v43  ;;  %v10993_v27 = vsub.f32 %v14763_v50, %v10992_v19  ;;  %vm15385_vm1 = vmmov %vm15377_vm5 }
 0x581   : > { %v10999_v5 = vsub.f32 %v14766_v43, %v10998_v7  ;;  %v10994_v38 = vand.u32 4294901760, %v10993_v27 }
 0x583   : > { %v11000_v31 = vand.u32 4294901760, %v10999_v5 }
 0x584   : > { %10677 = vmatmul.mubr.f32.vlgmr.msra.gmra.mrb[22].mxu0 %v10499_v32  ;;  %10917 = vmatmul.mubr.f32.vlgmr.msra.gmra.mrb[24].mxu1 %v10498_v61 }
 0x585   : > { %12686 = vmatpush1.bf16.xpose.msra.mxu0 %v14551_v37  ;;  %10839 = vmatprep.mubr.f32.mxu0 %v10492_v18  ;;  %v15372_v37 = vld [vmem:[#allocation3_spill] sm:$0xff] }
 0x586   : > { %12698 = vmatpush1.bf16.xpose.msra.mxu1 %v14561_v62  ;;  %11091 = vmatprep.mubr.f32.mxu1 %v14750_v1  ;;  %vm15373_vm15 = vcmp.eq.s32.totalorder %v13147_v2, %v15372_v37  ;;  %vm15374_vm8 = vcmp.eq.s32.totalorder %v13169_v12, %v15372_v37 }
 0x587   : > { %12692 = vmatprep.subr.msk.bf16.mxu0 %vm14774_vm7, %v15365_v28  ;;  %12704 = vmatprep.subr.msk.bf16.mxu1 %vm14774_vm7, %v15365_v28  ;;  %vm14797_vm2 = vmpackc.low %vm15374_vm8, %vm15373_vm15  ;;  %vm15390_vm8 = vcmp.gt.f32.partialorder %v14021_v42, 0.0 }
 0x588   : > { %v9649_v56 = vpop.f32.mrb[18].mxu0  ;;  %vm14846_vm15 = vmand %vm15386_vm0, %vm15385_vm1 }
 0x589   : > { %v12791_v18 = vadd.f32 %v9649_v56, %v14643_v46  ;;  %v9651_v30 = vpop.f32.mrb[19].mxu0  ;;  %v15400_v56 = vld [vmem:[#allocation27_spill] sm:$0xff] }
 0x58a   : > { %v14807_v4 = vadd.f32 %v9651_v30, %v14643_v46 }
 0x58b   : > { %v10200_v14 = vrot.slane %v12791_v18, 1  ;;  %v10208_v60 = vrot.slane %v12791_v18, 2  ;;  %v10216_v58 = vrot.slane %v12791_v18, 3  ;;  %v10224_v54 = vrot.slane %v12791_v18, 4 }
 0x58c   : > { %10841 = vmatmul.mubr.f32.vlgmr.msra.gmra.mrb[24].mxu0 %v10498_v61  ;;  %v10114_v61 = vpop.f32.mrb[18].mxu1  ;;  %v10272_v0 = vsel %vm14816_vm6, 0.0, %v12791_v18  ;;  %v10201_v36 = vrot.slane %v14807_v4, 1  ;;  %v10209_v40 = vrot.slane %v14807_v4, 2  ;;  %v10217_v13 = vrot.slane %v14807_v4, 3 }
 0x58d   : > { %11093 = vmatmul.mubr.f32.vlgmr.msra.gmra.mrb[26].mxu1 %v14758_v49  ;;  %12694 = vmatpush1.bf16.xpose.msk.msra.mxu0 %vm14797_vm2, %v15365_v28  ;;  %v14823_v23 = vadd.f32 %v10114_v61, %v14643_v46  ;;  %v10116_v16 = vpop.f32.mrb[19].mxu1  ;;  %v10280_v32 = vsel %vm15382_vm13, 0.0, %v10200_v14  ;;  %v10288_v47 = vsel %vm15383_vm11, 0.0, %v10208_v60  ;;  %v14836_v53 = vsel %vm15384_vm3, 0.0, %v10216_v58  ;;  %v15410_v14 = vld [vmem:[#allocation23_spill] sm:$0xff]  ;;  %v15412_v58 = vld [vmem:[#allocation24_spill] sm:$0xff] }
 0x58e   : > { %10995 = vmatprep.mubr.f32.mxu0 %v10994_v38  ;;  %12706 = vmatpush1.bf16.xpose.msk.msra.mxu1 %vm14797_vm2, %v15365_v28  ;;  %v10384_v59 = vrot.slane %v10280_v32, 7  ;;  %v10386_v41 = vrot.slane %v10288_v47, 6  ;;  %v10225_v10 = vrot.slane %v14807_v4, 4  ;;  %vm15394_vm6 = vnez %v15239_v26  ;;  %v15414_v61 = vld [vmem:[#allocation25_spill] sm:$0xff]  ;;  %v15417_v32 = vld [vmem:[#allocation28_spill] sm:$0xff] }
 0x58f   : > { %11251 = vmatprep.mubr.f32.mxu1 %v10992_v19  ;;  %12700 = vmatprep.subr.bf16.mxu0 %v15381_v52  ;;  %v10202_v20 = vrot.slane %v14823_v23, 1  ;;  %v10210_v17 = vrot.slane %v14823_v23, 2  ;;  %v10218_v33 = vrot.slane %v14823_v23, 3  ;;  %v10226_v39 = vrot.slane %v14823_v23, 4 }
 0x590   : > { %12712 = vmatprep.subr.msk.bf16.mxu1 %vm14774_vm7, %v15365_v28  ;;  %v10274_v48 = vsel %vm14846_vm15, 0.0, %v14823_v23  ;;  %vm15389_vm7 = vmmov %vm15385_vm1  ;;  %v10281_v42 = vsel %vm14078_vm9, 0.0, %v10201_v36  ;;  %vm15395_vm13 = vnez %v15241_v8  ;;  %vm15396_vm11 = vnez %v15245_v57 }
 0x591   : > { %vm14861_vm5 = vmand %vm15390_vm8, %vm15389_vm7  ;;  %v10282_v22 = vsel %vm15393_vm10, 0.0, %v10202_v20  ;;  %v14870_v63 = vsel %vm15394_vm6, 0.0, %v10210_v17  ;;  %v14879_v9 = vsel %vm15395_vm13, 0.0, %v10218_v33  ;;  %v10289_v21 = vsel %vm15396_vm11, 0.0, %v10209_v40 }
 0x592   : > { %v10273_v15 = vsel %vm14861_vm5, 0.0, %v14807_v4  ;;  %v10400_v25 = vrot.slane %v10282_v22, 7  ;;  %v10402_v19 = vrot.slane %v14870_v63, 6  ;;  %vm15397_vm3 = vnez %v15247_v24  ;;  %vm15403_vm0 = vmmov %vm15389_vm7 }
 0x593   : > { %v10297_v26 = vsel %vm15397_vm3, 0.0, %v10217_v13  ;;  %v10392_v27 = vrot.slane %v10281_v42, 7  ;;  %v10394_v5 = vrot.slane %v10289_v21, 6  ;;  %v12794_v37 = vadd.f32 %v10116_v16, %v14643_v46 }
 0x594   : > { %11001 = vmatmul.mubr.f32.vlgmr.msra.gmra.mrb[26].mxu0 %v11000_v31  ;;  %v15398_v8 = vpack.c.bf16 %v14545_v29, %v14541_v6  ;;  %v10305_v57 = vsel %vm14132_vm12, 0.0, %v10225_v10  ;;  %v10396_v24 = vrot.slane %v10297_v26, 5  ;;  %vm15401_vm9 = vnez %v15400_v56  ;;  %v15440_v6 = vld [vmem:[#allocation38_spill] sm:$0xff] }
 0x595   : > { %11255 = vmatmul.mubr.f32.vlgmr.msra.gmra.mrb[28].mxu1 %v10998_v7  ;;  %11172 = vmatprep.mubr.f32.mxu0 %v14763_v50  ;;  %v10304_v38 = vsel %vm15401_vm9, 0.0, %v10224_v54  ;;  %vm15402_vm1 = vcmask 1041409   ;;  %v15404_v7 = vld [vmem:[#allocation22_spill] sm:$0xff]  ;;  %v10203_v29 = vrot.slane %v12794_v37, 1  ;;  %v10211_v50 = vrot.slane %v12794_v37, 2 }
 0x596   : > { %12702 = vmatpush1.bf16.xpose.msra.mxu0 %v15398_v8  ;;  %12714 = vmatpush1.bf16.xpose.msk.msra.mxu1 %vm14797_vm2, %v15365_v28  ;;  %v10385_v46 = vsel %vm15402_vm1, %v10384_v59, %v10272_v0  ;;  %vm15405_vm15 = vcmp.gt.f32.partialorder %v15404_v7, 0.0  ;;  %v10219_v62 = vrot.slane %v12794_v37, 3  ;;  %v10227_v18 = vrot.slane %v12794_v37, 4  ;;  %vm15408_vm12 = vmmov %vm15402_vm1 }
 0x597   : > { %vm14903_vm7 = vmand %vm15405_vm15, %vm15403_vm0  ;;  %11413 = vmatprep.mubr.f32.mxu1 %v14750_v1  ;;  %12708 = vmatprep.subr.bf16.mxu0 %v14583_v34  ;;  %v10393_v4 = vsel %vm15408_vm12, %v10392_v27, %v10273_v15  ;;  %v10398_v31 = vrot.slane %v10305_v57, 4  ;;  %vm15409_vm2 = vcmask 1042434   ;;  %vm15411_vm8 = vnez %v15410_v14  ;;  %v15435_v57 = vld [vmem:[#allocation30_spill] sm:$0xff] }
 0x598   : > { %v10275_v30 = vsel %vm14903_vm7, 0.0, %v12794_v37  ;;  %12720 = vmatprep.subr.bf16.mxu1 %v14595_v11  ;;  %v10387_v45 = vsel %vm15409_vm2, %v10386_v41, %v10385_v46  ;;  %v10283_v60 = vsel %vm15411_vm8, 0.0, %v10203_v29  ;;  %vm15413_vm5 = vnez %v15412_v58  ;;  %vm15416_vm6 = vmmov %vm15409_vm2  ;;  %v15419_v41 = vld [vmem:[#allocation4_spill] sm:$0xff]  ;;  %v15449_v58 = vld [vmem:[#allocation7_spill] sm:$0xff] }
 0x599   : > { %v10291_v54 = vsel %vm15413_vm5, 0.0, %v10211_v50  ;;  %vm15415_vm10 = vnez %v15414_v61  ;;  %v10395_v34 = vsel %vm15416_vm6, %v10394_v5, %v10393_v4  ;;  %v10408_v23 = vrot.slane %v10283_v60, 7  ;;  %vm15424_vm0 = vmmov %vm15409_vm2  ;;  %v15438_v46 = vld [vmem:[#allocation32_spill] sm:$0xff] }
 0x59a   : > { %v10299_v0 = vsel %vm15415_vm10, 0.0, %v10219_v62  ;;  %v10410_v36 = vrot.slane %v10291_v54, 6  ;;  %v10397_v11 = vsel %vm10355_vm4, %v10396_v24, %v10395_v34  ;;  %v10388_v40 = vrot.slane %v14836_v53, 5  ;;  %vm15427_vm7 = vmmov %vm15402_vm1  ;;  %v15441_v29 = vld [vmem:[#allocation40_spill] sm:$0xff]  ;;  %v15455_v34 = vld [vmem:[#allocation34_spill] sm:$0xff] }
 0x59b   : > { %v10399_v16 = vsel %vm10358_vm14, %v10398_v31, %v10397_v11  ;;  %v10390_v52 = vrot.slane %v10304_v38, 4  ;;  %vm15418_vm13 = vnez %v15417_v32  ;;  %v10412_v13 = vrot.slane %v10299_v0, 5  ;;  %vm15428_vm12 = vmmov %vm15424_vm0  ;;  %v15437_v38 = vld [vmem:[#allocation33_spill] sm:$0xff]  ;;  %v15447_v31 = vld [vmem:[#allocation39_spill] sm:$0xff] }
 0x59c   : > { %v10307_v47 = vsel %vm15418_vm13, 0.0, %v10227_v18  ;;  %v11488_v59 = vand.u32 4294901760, %v10399_v16  ;;  %vm15420_vm11 = vcmp.eq.s32.totalorder %v13147_v2, %v15419_v41  ;;  %vm15421_vm3 = vcmp.eq.s32.totalorder %v13169_v12, %v15419_v41  ;;  %v15442_v18 = vld [vmem:[#allocation5_spill] sm:$0xff]  ;;  %v15461_v32 = vld [vmem:[#allocation43_spill] sm:$0xff] }
 0x59d   : > { %11175 = vmatmul.mubr.f32.vlgmr.msra.gmra.mrb[28].mxu0 %v14766_v43  ;;  %vm14933_vm9 = vmpackc.low %vm15421_vm3, %vm15420_vm11  ;;  %v10389_v53 = vsel %vm10355_vm4, %v10388_v40, %v10387_v45  ;;  %v10409_v20 = vsel %vm15402_vm1, %v10408_v23, %v10275_v30  ;;  %v10414_v17 = vrot.slane %v10307_v47, 4  ;;  %11415 = vmatmul.mubr.f32.vlgmr.msra.gmra.mrb[30].mxu1 %v14758_v49  ;;  %vm15426_vm15 = vnez %v15425_v44  ;;  %v15448_v45 = vld [vmem:[#allocation41_spill] sm:$0xff]  ;;  %v15458_v40 = vld [vmem:[#allocation36_spill] sm:$0xff] }
 0x59e   : > { %12710 = vmatpush1.bf16.xpose.msra.mxu0 %v14587_v55  ;;  %v10391_v43 = vsel %vm10358_vm14, %v10390_v52, %v10389_v53  ;;  %v10411_v33 = vsel %vm15424_vm0, %v10410_v36, %v10409_v20  ;;  %v10306_v10 = vsel %vm15426_vm15, 0.0, %v10226_v39  ;;  %v10401_v22 = vsel %vm15427_vm7, %v10400_v25, %v10274_v48  ;;  %11337 = vmatprep.mubr.f32.mxu0 %v14750_v1  ;;  %v15457_v11 = vld [vmem:[#allocation37_spill] sm:$0xff]  ;;  %v15460_v52 = vld [vmem:[#allocation42_spill] sm:$0xff] }
 0x59f   : > { %12722 = vmatpush1.bf16.xpose.msra.mxu1 %v14597_v35  ;;  %v11494_v63 = vand.u32 4294901760, %v10391_v43  ;;  %v11489_v15 = vsub.f32 %v10399_v16, %v11488_v59  ;;  %v10413_v42 = vsel %vm10355_vm4, %v10412_v13, %v10411_v33  ;;  %v10403_v21 = vsel %vm15428_vm12, %v10402_v19, %v10401_v22  ;;  %11589 = vmatprep.mubr.f32.mxu1 %v11488_v59  ;;  %v15429_v19 = vld [vmem:[#allocation6_spill] sm:$0xff] }
 0x5a0   : > { %12716 = vmatprep.subr.msk.bf16.mxu0 %vm14933_vm9, %v15365_v28  ;;  %v10415_v55 = vsel %vm10358_vm14, %v10414_v17, %v10413_v42  ;;  %v10404_v39 = vrot.slane %v14879_v9, 5  ;;  %12728 = vmatprep.subr.msk.bf16.mxu1 %vm14933_vm9, %v15365_v28  ;;  %v10406_v1 = vrot.slane %v10306_v10, 4  ;;  %vm15430_vm2 = vcmp.eq.s32.totalorder %v13147_v2, %v15429_v19 }
 0x5a1   : > { %v11495_v48 = vsub.f32 %v10391_v43, %v11494_v63  ;;  %v11490_v35 = vand.u32 4294901760, %v11489_v15  ;;  %vm15431_vm8 = vcmp.eq.s32.totalorder %v13169_v12, %v15429_v19  ;;  %v15436_v24 = vpack.c.bf16 %v15434_v3, %v15435_v57 }
 0x5a2   : > { %v10405_v25 = vsel %vm10355_vm4, %v10404_v39, %v10403_v21  ;;  %vm14965_vm5 = vmpackc.low %vm15431_vm8, %vm15430_vm2  ;;  %v11986_v56 = vand.u32 4294901760, %v10415_v55  ;;  %v15439_v7 = vpack.c.bf16 %v15437_v38, %v15438_v46  ;;  %vm15443_vm4 = vcmp.eq.s32.totalorder %v13147_v2, %v15442_v18 }
 0x5a3   : > { %v11491_v9 = vsub.f32 %v11489_v15, %v11490_v35  ;;  %v11496_v27 = vand.u32 4294901760, %v11495_v48  ;;  %v10407_v5 = vsel %vm10358_vm14, %v10406_v1, %v10405_v25  ;;  %vm15444_vm14 = vcmp.eq.s32.totalorder %v13169_v12, %v15442_v18 }
 0x5a4   : > { %v11987_v50 = vsub.f32 %v10415_v55, %v11986_v56  ;;  %v11992_v62 = vand.u32 4294901760, %v10407_v5  ;;  %vm14997_vm10 = vmpackc.low %vm15444_vm14, %vm15443_vm4  ;;  %vm15450_vm6 = vcmp.eq.s32.totalorder %v13147_v2, %v15449_v58  ;;  %vm15451_vm13 = vcmp.eq.s32.totalorder %v13169_v12, %v15449_v58  ;;  %v15454_v12 = vld [vmem:[#allocation35_spill] sm:$0xff] }
 0x5a5   : > { %11339 = vmatmul.mubr.f32.vlgmr.msra.gmra.mrb[30].mxu0 %v14758_v49  ;;  %v11492_v37 = vand.u32 4294901760, %v11491_v9  ;;  %v11497_v8 = vsub.f32 %v11495_v48, %v11496_v27  ;;  %vm15015_vm11 = vmpackc.low %vm15451_vm13, %vm15450_vm6  ;;  %v15456_v23 = vpack.c.bf16 %v15454_v12, %v15455_v34  ;;  %v15459_v16 = vpack.c.bf16 %v15457_v11, %v15458_v40 }
 0x5a6   : > { %11591 = vmatmul.mubr.f32.vlgmr.msra.gmra.mrb[32].mxu1 %v11494_v63  ;;  %12718 = vmatpush1.bf16.xpose.msk.msra.mxu0 %vm14965_vm5, %v15365_v28  ;;  %v11988_v4 = vand.u32 4294901760, %v11987_v50  ;;  %v11993_v14 = vsub.f32 %v10407_v5, %v11992_v62  ;;  %vm221_vm3 = vcmask 126976   ;;  %v15462_v47 = vmov 0.0  }
 0x5a7   : > { %12730 = vmatpush1.bf16.xpose.msk.msra.mxu1 %vm14965_vm5, %v15365_v28  ;;  %11749 = vmatprep.mubr.f32.mxu1 %v11490_v35  ;;  %v11498_v49 = vand.u32 4294901760, %v11497_v8  ;;  %222 = vst.msk [vmem:[%s15044_s23] sm:$0x1f] %vm221_vm3, %v15462_v47 }
 0x5a8   : > { %11493 = vmatprep.mubr.f32.mxu0 %v11492_v37  ;;  %12724 = vmatprep.subr.bf16.mxu0 %v15436_v24  ;;  %v11989_v60 = vsub.f32 %v11987_v50, %v11988_v4  ;;  %v11994_v61 = vand.u32 4294901760, %v11993_v14 }
 0x5a9   : > { %12736 = vmatprep.subr.msk.bf16.mxu1 %vm14933_vm9, %v15365_v28 }
 0x5aa   : > { %v11990_v0 = vand.u32 4294901760, %v11989_v60  ;;  %v11995_v2 = vsub.f32 %v11993_v14, %v11994_v61 }
 0x5ac   : > { %v11996_v36 = vand.u32 4294901760, %v11995_v2 }
 0x5ad   : > { %11499 = vmatmul.mubr.f32.vlgmr.msra.gmra.mrb[32].mxu0 %v11498_v49 }
 0x5ae   : > { %11753 = vmatmul.mubr.f32.vlgmr.msra.gmra.mrb[34].mxu1 %v11496_v27  ;;  %12726 = vmatpush1.bf16.xpose.msra.mxu0 %v15439_v7 }
 0x5af   : > { %11670 = vmatprep.mubr.f32.mxu0 %v11489_v15  ;;  %12738 = vmatpush1.bf16.xpose.msk.msra.mxu1 %vm14965_vm5, %v15365_v28 }
 0x5b0   : > { %11911 = vmatprep.mubr.f32.mxu1 %v11488_v59  ;;  %12732 = vmatprep.subr.bf16.mxu0 %v15440_v6 }
 0x5b1   : > { %12744 = vmatprep.subr.bf16.mxu1 %v15441_v29 }
 0x5b5   : > { %11673 = vmatmul.mubr.f32.vlgmr.msra.gmra.mrb[34].mxu0 %v11495_v48 }
 0x5b6   : > { %11913 = vmatmul.mubr.f32.vlgmr.msra.gmra.mrb[36].mxu1 %v11494_v63  ;;  %12734 = vmatpush1.bf16.xpose.msra.mxu0 %v15447_v31 }
 0x5b7   : > { %11835 = vmatprep.mubr.f32.mxu0 %v11488_v59  ;;  %12746 = vmatpush1.bf16.xpose.msra.mxu1 %v15448_v45 }
 0x5b8   : > { %12087 = vmatprep.mubr.f32.mxu1 %v11986_v56  ;;  %12740 = vmatprep.subr.msk.bf16.mxu0 %vm14997_vm10, %v15365_v28 }
 0x5b9   : > { %12752 = vmatprep.subr.msk.bf16.mxu1 %vm14997_vm10, %v15365_v28 }
 0x5bd   : > { %11837 = vmatmul.mubr.f32.vlgmr.msra.gmra.mrb[36].mxu0 %v11494_v63 }
 0x5be   : > { %12089 = vmatmul.mubr.f32.vlgmr.msra.gmra.mrb[38].mxu1 %v11992_v62  ;;  %12742 = vmatpush1.bf16.xpose.msk.msra.mxu0 %vm15015_vm11, %v15365_v28 }
 0x5bf   : > { %11991 = vmatprep.mubr.f32.mxu0 %v11990_v0  ;;  %12754 = vmatpush1.bf16.xpose.msk.msra.mxu1 %vm15015_vm11, %v15365_v28 }
 0x5c0   : > { %12247 = vmatprep.mubr.f32.mxu1 %v11988_v4  ;;  %12748 = vmatprep.subr.bf16.mxu0 %v15456_v23 }
 0x5c1   : > { %12760 = vmatprep.subr.msk.bf16.mxu1 %vm14997_vm10, %v15365_v28 }
 0x5c5   : > { %11997 = vmatmul.mubr.f32.vlgmr.msra.gmra.mrb[38].mxu0 %v11996_v36 }
 0x5c6   : > { %12251 = vmatmul.mubr.f32.vlgmr.msra.gmra.mrb[40].mxu1 %v11994_v61  ;;  %12750 = vmatpush1.bf16.xpose.msra.mxu0 %v15459_v16 }
 0x5c7   : > { %12168 = vmatprep.mubr.f32.mxu0 %v11987_v50  ;;  %12762 = vmatpush1.bf16.xpose.msk.msra.mxu1 %vm15015_vm11, %v15365_v28 }
 0x5c8   : > { %12409 = vmatprep.mubr.f32.mxu1 %v11986_v56  ;;  %12756 = vmatprep.subr.bf16.mxu0 %v15460_v52 }
 0x5cd   : > { %12171 = vmatmul.mubr.f32.vlgmr.msra.gmra.mrb[40].mxu0 %v11993_v14 }
 0x5ce   : > { %12411 = vmatmul.mubr.f32.vlgmr.msra.gmra.mrb[42].mxu1 %v11992_v62  ;;  %12758 = vmatpush1.bf16.xpose.msra.mxu0 %v15461_v32 }
 0x5cf   : > { %12333 = vmatprep.mubr.f32.mxu0 %v11986_v56 }
 0x5d5   : > { %12335 = vmatmul.mubr.f32.vlgmr.msra.gmra.mrb[42].mxu0 %v11992_v62 }
 0x647   : > { %v10596_v28 = vpop.f32.mrb[20].mxu1 }
 0x648   : > { %v10598_v13 = vpop.f32.mrb[21].mxu1 }
 0x64f   : > { %v10758_v59 = vpop.f32.mrb[22].mxu1  ;;  %v10504_v41 = vpop.f32.mrb[20].mxu0 }
 0x650   : > { %v10597_v51 = vadd.f32 %v10596_v28, %v10504_v41  ;;  %v10760_v53 = vpop.f32.mrb[23].mxu1  ;;  %v10506_v20 = vpop.f32.mrb[21].mxu0 }
 0x651   : > { %v12416_v20 = vld [vmem:[%s15044_s23] sm:$0x1f] }
 0x657   : > { %v10678_v17 = vpop.f32.mrb[22].mxu0  ;;  %v10918_v43 = vpop.f32.mrb[24].mxu1 }
 0x658   : > { %v10679_v33 = vadd.f32 %v10678_v17, %v10597_v51  ;;  %v10680_v44 = vpop.f32.mrb[23].mxu0  ;;  %v10920_v10 = vpop.f32.mrb[25].mxu1 }
 0x65a   : > { %v10759_v22 = vadd.f32 %v10758_v59, %v10679_v33 }
 0x65f   : > { %v10842_v63 = vpop.f32.mrb[24].mxu0 }
 0x660   : > { %v10843_v15 = vadd.f32 %v10842_v63, %v10759_v22  ;;  %v11094_v42 = vpop.f32.mrb[26].mxu1  ;;  %v10844_v21 = vpop.f32.mrb[25].mxu0 }
 0x661   : > { %v11096_v55 = vpop.f32.mrb[27].mxu1 }
 0x662   : > { %v10919_v39 = vadd.f32 %v10918_v43, %v10843_v15 }
 0x667   : > { %v11002_v48 = vpop.f32.mrb[26].mxu0 }
 0x668   : > { %v11003_v35 = vadd.f32 %v11002_v48, %v10919_v39  ;;  %v11256_v1 = vpop.f32.mrb[28].mxu1  ;;  %v11004_v25 = vpop.f32.mrb[27].mxu0 }
 0x669   : > { %v11258_v19 = vpop.f32.mrb[29].mxu1 }
 0x66a   : > { %v11095_v26 = vadd.f32 %v11094_v42, %v11003_v35 }
 0x670   : > { %v11176_v9 = vpop.f32.mrb[28].mxu0  ;;  %v11416_v5 = vpop.f32.mrb[30].mxu1 }
 0x671   : > { %v11177_v27 = vadd.f32 %v11176_v9, %v11095_v26  ;;  %v11178_v37 = vpop.f32.mrb[29].mxu0  ;;  %v11418_v8 = vpop.f32.mrb[31].mxu1 }
 0x673   : > { %v11257_v3 = vadd.f32 %v11256_v1, %v11177_v27 }
 0x678   : > { %v11340_v57 = vpop.f32.mrb[30].mxu0 }
 0x679   : > { %v11341_v24 = vadd.f32 %v11340_v57, %v11257_v3  ;;  %v11592_v49 = vpop.f32.mrb[32].mxu1  ;;  %v11342_v56 = vpop.f32.mrb[31].mxu0 }
 0x67a   : > { %v11594_v38 = vpop.f32.mrb[33].mxu1 }
 0x67b   : > { %v11417_v46 = vadd.f32 %v11416_v5, %v11341_v24 }
 0x680   : > { %v11500_v7 = vpop.f32.mrb[32].mxu0 }
 0x681   : > { %v11501_v6 = vadd.f32 %v11500_v7, %v11417_v46  ;;  %v11754_v29 = vpop.f32.mrb[34].mxu1  ;;  %v11502_v50 = vpop.f32.mrb[33].mxu0 }
 0x682   : > { %v11756_v62 = vpop.f32.mrb[35].mxu1 }
 0x683   : > { %v11593_v18 = vadd.f32 %v11592_v49, %v11501_v6 }
 0x688   : > { %v11674_v30 = vpop.f32.mrb[34].mxu0 }
 0x689   : > { %v11675_v4 = vadd.f32 %v11674_v30, %v11593_v18  ;;  %v11914_v31 = vpop.f32.mrb[36].mxu1  ;;  %v11676_v45 = vpop.f32.mrb[35].mxu0 }
 0x68a   : > { %v11916_v14 = vpop.f32.mrb[37].mxu1 }
 0x68b   : > { %v11755_v60 = vadd.f32 %v11754_v29, %v11675_v4 }
 0x690   : > { %v11838_v58 = vpop.f32.mrb[36].mxu0 }
 0x691   : > { %v11839_v54 = vadd.f32 %v11838_v58, %v11755_v60  ;;  %v12090_v61 = vpop.f32.mrb[38].mxu1  ;;  %v11840_v0 = vpop.f32.mrb[37].mxu0 }
 0x692   : > { %v12092_v2 = vpop.f32.mrb[39].mxu1 }
 0x693   : > { %v11915_v12 = vadd.f32 %v11914_v31, %v11839_v54 }
 0x698   : > { %v11998_v34 = vpop.f32.mrb[38].mxu0 }
 0x699   : > { %v11999_v23 = vadd.f32 %v11998_v34, %v11915_v12  ;;  %v12252_v36 = vpop.f32.mrb[40].mxu1  ;;  %v12000_v11 = vpop.f32.mrb[39].mxu0 }
 0x69a   : > { %v12254_v40 = vpop.f32.mrb[41].mxu1 }
 0x69b   : > { %v12091_v16 = vadd.f32 %v12090_v61, %v11999_v23 }
 0x6a0   : > { %v12172_v52 = vpop.f32.mrb[40].mxu0 }
 0x6a1   : > { %v12173_v32 = vadd.f32 %v12172_v52, %v12091_v16  ;;  %v12412_v47 = vpop.f32.mrb[42].mxu1  ;;  %v12174_v28 = vpop.f32.mrb[41].mxu0 }
 0x6a2   : > { %v12414_v13 = vpop.f32.mrb[43].mxu1 }
 0x6a3   : > { %v12253_v59 = vadd.f32 %v12252_v36, %v12173_v32 }
 0x6a8   : > { %v12336_v41 = vpop.f32.mrb[42].mxu0 }
 0x6a9   : > { %v12337_v51 = vadd.f32 %v12336_v41, %v12253_v59  ;;  %v12338_v53 = vpop.f32.mrb[43].mxu0 }
 0x6ab   : > { %v12413_v17 = vadd.f32 %v12412_v47, %v12337_v51 }
 0x6ad   : > { %v12417_v43 = vadd.f32 %v12416_v20, %v12413_v17 }
 0x6af   : > { %12419 = vst.msk [vmem:[%s15044_s23] sm:$0x1f] %vm221_vm3, %v12417_v43 }
 0x6b0 PF: > { %s14_s17 = sadd.s32 1, %s13094_s17   ;;  %s15463_s15 = smov %s13090_s16 }
 0x6b1   : > { %p11_p6 = scmp.ge.s32.totalorder %s14_s17, 4   ;;  %s15464_s16 = smov %s15466_s18 }
 0x6b3   :  { %13 = sbr.rel (!%p11_p6) target bundleno = 2 (0x2), region = 70 }

</bundles_post_ra>
